<compile_context>
chip_gen: v5e
topology: v5e:2x2
jax: 0.10.0
libtpu: 0.0.40
codegen_flags: <defaults>
</compile_context>

<pallas_src>
import math
import functools

import jax
import jax.numpy as jnp
from jax import lax
from jax.experimental import pallas as pl
from jax.experimental.pallas import tpu as pltpu  # noqa: F401  (TPU backend)


MM_DTYPE = jnp.bfloat16  # MXU operand dtype (f32 accumulation)


# ----------------------------------------------------------------------------
# Fused whole-model kernel (no grid: single invocation, everything in VMEM)
# ----------------------------------------------------------------------------
def fused_model_kernel(*refs, n_heads, d_k, d_v, n_layers, batch):
    (pep_x_ref, hla_x_ref, pep_b_ref, hla_b_ref, dec_b_ref, pe_dec_ref) = refs[:6]
    pep_w = refs[6:14]
    hla_w = refs[14:22]
    dec_w = refs[22:30]
    (hw1_ref, hb1_ref, bns_ref, bnsh_ref,
     hw2_ref, hb2_ref, hwca_ref, hbca_ref) = refs[30:38]
    out_ref = refs[38]

    hk = n_heads * d_k

    def layer(x, bias, w_refs, l):
        wqkv_r, wo_r, ln1g_r, ln1b_r, w1_r, w2_r, ln2g_r, ln2b_r = w_refs
        # --- fused QKV projection (bf16 weights already, scale folded in W_Q) ---
        xb = x.astype(MM_DTYPE)
        qkv = jnp.dot(xb, wqkv_r[l], preferred_element_type=jnp.float32)  # (N, QKV)
        q = qkv[:, :hk]
        k = qkv[:, hk:2 * hk]
        v = qkv[:, 2 * hk:]

        # --- per-head attention; output projection accumulated per head ---
        wo_l = wo_r[l]                                   # (H*dv, D) bf16
        attn_out = jnp.zeros(x.shape, jnp.float32)
        for h in range(n_heads):                         # static tiny loop
            qh = q[:, h * d_k:(h + 1) * d_k].astype(MM_DTYPE)
            kh = k[:, h * d_k:(h + 1) * d_k].astype(MM_DTYPE)
            vh = v[:, h * d_v:(h + 1) * d_v].astype(MM_DTYPE)
            s = lax.dot_general(qh, kh, (((1,), (1,)), ((), ())),
                                preferred_element_type=jnp.float32) + bias  # (N, N)
            m = jnp.max(s, axis=-1, keepdims=True)
            e = jnp.exp(s - m)
            p = e * pl.reciprocal(jnp.sum(e, axis=-1, keepdims=True), approx=True)
            ctx = jnp.dot(p.astype(MM_DTYPE), vh,
                          preferred_element_type=jnp.float32)               # (N, dv)
            attn_out = attn_out + jnp.dot(
                ctx.astype(MM_DTYPE), wo_l[h * d_v:(h + 1) * d_v, :],
                preferred_element_type=jnp.float32)                         # (N, D)

        # residual + LayerNorm 1 (f32)
        h1 = attn_out + x
        mu1 = jnp.mean(h1, axis=-1, keepdims=True)
        var1 = jnp.mean((h1 - mu1) ** 2, axis=-1, keepdims=True)
        h1 = (h1 - mu1) * lax.rsqrt(var1 + 1e-5) * ln1g_r[l] + ln1b_r[l]

        # position-wise FFN (bf16 weights, f32 accumulation)
        ff = jnp.maximum(jnp.dot(h1.astype(MM_DTYPE), w1_r[l],
                                 preferred_element_type=jnp.float32), 0.0)
        ff = jnp.dot(ff.astype(MM_DTYPE), w2_r[l],
                     preferred_element_type=jnp.float32)

        # residual + LayerNorm 2 (f32)
        h2 = ff + h1
        mu2 = jnp.mean(h2, axis=-1, keepdims=True)
        var2 = jnp.mean((h2 - mu2) ** 2, axis=-1, keepdims=True)
        return (h2 - mu2) * lax.rsqrt(var2 + 1e-5) * ln2g_r[l] + ln2b_r[l]

    def run_stack(x, bias, w_refs):
        for l in range(n_layers):                       # static loop over stacked weights
            x = layer(x, bias, w_refs, l)
        return x

    # encoders (batch folded into rows; bias handles padding + batch separation)
    pep_out = run_stack(pep_x_ref[...], pep_b_ref[...], pep_w)     # (S_pep*B, D)
    hla_out = run_stack(hla_x_ref[...], hla_b_ref[...], hla_w)     # (S_hla*B, D)

    # decoder: concat (rows are (position, batch) ordered) + PE + block-diag bias
    dec_in = jnp.concatenate([pep_out, hla_out], axis=0) + pe_dec_ref[...]
    dec_out = run_stack(dec_in, dec_b_ref[...], dec_w)             # (T*B, D)

    # --- fused MLP head ---
    # flatten+Linear as sum_t dec_rows(t) @ W1[t]; row blocks are contiguous.
    t_len = dec_out.shape[0] // batch
    acc = jnp.zeros((batch, hb1_ref.shape[-1]), jnp.float32)
    for t in range(t_len):
        blk = dec_out[t * batch:(t + 1) * batch, :].astype(MM_DTYPE)   # (B, D)
        acc = acc + jnp.dot(blk, hw1_ref[t], preferred_element_type=jnp.float32)
    h1 = jnp.maximum(acc + hb1_ref[...], 0.0)                      # Linear+ReLU
    bn = h1 * bns_ref[...] + bnsh_ref[...]                         # BatchNorm1d (eval, folded)
    h2 = jnp.maximum(jnp.dot(bn.astype(MM_DTYPE), hw2_ref[...],
                             preferred_element_type=jnp.float32) + hb2_ref[...], 0.0)
    out_ref[...] = jnp.dot(h2.astype(MM_DTYPE), hwca_ref[...],
                           preferred_element_type=jnp.float32) + hbca_ref[...]  # (B, 3)


# ----------------------------------------------------------------------------
# Parameter init (deterministic, matmul weights pre-cast to bf16)
# ----------------------------------------------------------------------------
def make_pe_table(max_len, d_model):
    pos = jnp.arange(max_len, dtype=jnp.float32)[:, None]
    div = jnp.exp(jnp.arange(0, d_model, 2, dtype=jnp.float32)
                  * (-math.log(10000.0) / d_model))
    pe = jnp.zeros((max_len, d_model), jnp.float32)
    pe = pe.at[:, 0::2].set(jnp.sin(pos * div))
    pe = pe.at[:, 1::2].set(jnp.cos(pos * div))
    return pe


def init_stack_params(key, n_layers, d_model, d_ff, d_k, d_v, n_heads):
    ks = jax.random.split(key, 6)
    s = 0.05
    hk, hv = n_heads * d_k, n_heads * d_v
    wq = jax.random.normal(ks[0], (n_layers, d_model, hk), jnp.float32) * s
    wk = jax.random.normal(ks[1], (n_layers, d_model, hk), jnp.float32) * s
    wv = jax.random.normal(ks[2], (n_layers, d_model, hv), jnp.float32) * s
    # fuse Wq|Wk|Wv and fold 1/sqrt(d_k) into Wq at zero runtime cost
    wqkv = jnp.concatenate([wq / math.sqrt(d_k), wk, wv], axis=-1).astype(MM_DTYPE)
    return {
        "wqkv": wqkv,
        "wo": (jax.random.normal(ks[3], (n_layers, hv, d_model), jnp.float32) * s
               ).astype(MM_DTYPE),
        "ln1g": jnp.ones((n_layers, 1, d_model), jnp.float32),
        "ln1b": jnp.zeros((n_layers, 1, d_model), jnp.float32),
        "w1": (jax.random.normal(ks[4], (n_layers, d_model, d_ff), jnp.float32) * s
               ).astype(MM_DTYPE),
        "w2": (jax.random.normal(ks[5], (n_layers, d_ff, d_model), jnp.float32) * s
               ).astype(MM_DTYPE),
        "ln2g": jnp.ones((n_layers, 1, d_model), jnp.float32),
        "ln2b": jnp.zeros((n_layers, 1, d_model), jnp.float32),
    }


def init_head_params(key, tgt_len, d_model):
    ks = jax.random.split(key, 8)
    s = 0.05
    F = tgt_len * d_model
    w1 = jax.random.normal(ks[0], (F, 256), jnp.float32) * s
    b1 = jax.random.normal(ks[1], (1, 256), jnp.float32) * s
    # BatchNorm1d eval mode (running mean=0, var=1, gamma=1, beta=0) folded to affine
    bn_gamma = jnp.ones((1, 256), jnp.float32)
    bn_beta = jnp.zeros((1, 256), jnp.float32)
    bn_mean = jnp.zeros((1, 256), jnp.float32)
    bn_var = jnp.ones((1, 256), jnp.float32)
    bn_scale = bn_gamma * lax.rsqrt(bn_var + 1e-5)
    bn_shift = bn_beta - bn_mean * bn_scale
    w2 = jax.random.normal(ks[2], (256, 64), jnp.float32) * s
    b2 = jax.random.normal(ks[3], (1, 64), jnp.float32) * s
    wc = jax.random.normal(ks[4], (64, 2), jnp.float32) * s
    bc = jax.random.normal(ks[5], (1, 2), jnp.float32) * s
    wa = jax.random.normal(ks[6], (64, 1), jnp.float32) * s
    ba = jax.random.normal(ks[7], (1, 1), jnp.float32) * s
    return {
        "w1": w1.reshape(tgt_len, d_model, 256).astype(MM_DTYPE),  # (T, D, 256)
        "b1": b1,
        "bn_scale": bn_scale,
        "bn_shift": bn_shift,
        "w2": w2.astype(MM_DTYPE),
        "b2": b2,
        "wca": jnp.concatenate([wc, wa], axis=1).astype(MM_DTYPE),  # (64, 3) cls|aff fused
        "bca": jnp.concatenate([bc, ba], axis=1),                   # (1, 3)
    }


def init_params(key, vocab_size, d_model, d_ff, d_k, d_v, n_heads, n_layers, tgt_len):
    keys = jax.random.split(key, 6)
    return {
        "pep_embed": jax.random.normal(keys[0], (vocab_size, d_model), jnp.float32),
        "hla_embed": jax.random.normal(keys[1], (vocab_size, d_model), jnp.float32),
        "pep_stack": init_stack_params(keys[2], n_layers, d_model, d_ff, d_k, d_v, n_heads),
        "hla_stack": init_stack_params(keys[3], n_layers, d_model, d_ff, d_k, d_v, n_heads),
        "dec_stack": init_stack_params(keys[4], n_layers, d_model, d_ff, d_k, d_v, n_heads),
        "head": init_head_params(keys[5], tgt_len, d_model),
    }


# ----------------------------------------------------------------------------
# Forward pass: embedding/PE/mask prep in JAX, one fused pallas_call
# ----------------------------------------------------------------------------
def transformer_forward(params, pe_table, pep_in, pse_in, *,
                        n_heads, d_k, d_v, n_layers):
    B, S_pep = pep_in.shape
    _, S_hla = pse_in.shape
    T = S_pep + S_hla

    # TODO(synk): embedding lookup (gather) stays in plain JAX.
    pep_x = params["pep_embed"][pep_in] + pe_table[:S_pep][None]   # (B, S_pep, D)
    hla_x = params["hla_embed"][pse_in] + pe_table[:S_hla][None]   # (B, S_hla, D)

    def fold(x):   # (B, S, D) -> (S*B, D), rows ordered (position, batch)
        return jnp.transpose(x, (1, 0, 2)).reshape(-1, x.shape[-1])

    def enc_bias(tokens):
        b, s = tokens.shape
        bid = jnp.arange(s * b, dtype=jnp.int32) % b                       # batch id per row
        key_pad = jnp.transpose(tokens).reshape(-1) == 0                   # (s, b)-ordered keys
        bad = (bid[:, None] != bid[None, :]) | key_pad[None, :]
        return jnp.where(bad, -1e9, 0.0).astype(jnp.float32)

    bid_dec = jnp.arange(T * B, dtype=jnp.int32) % B
    dec_bias = jnp.where(bid_dec[:, None] != bid_dec[None, :],
                         -1e9, 0.0).astype(jnp.float32)                    # block-diag only
    pe_dec = jnp.repeat(pe_table[:T], B, axis=0)                           # (T*B, D)

    stack_keys = ("wqkv", "wo", "ln1g", "ln1b", "w1", "w2", "ln2g", "ln2b")

    def sa(p):
        return [p[k] for k in stack_keys]

    hp = params["head"]
    kernel = functools.partial(fused_model_kernel, n_heads=n_heads, d_k=d_k,
                               d_v=d_v, n_layers=n_layers, batch=B)
    out = pl.pallas_call(
        kernel,
        out_shape=jax.ShapeDtypeStruct((B, 3), jnp.float32),
    )(fold(pep_x), fold(hla_x), enc_bias(pep_in), enc_bias(pse_in), dec_bias, pe_dec,
      *sa(params["pep_stack"]), *sa(params["hla_stack"]), *sa(params["dec_stack"]),
      hp["w1"], hp["b1"], hp["bn_scale"], hp["bn_shift"],
      hp["w2"], hp["b2"], hp["wca"], hp["bca"])

    cls_logits = out[:, 0:2]
    affinity = out[:, 2]
    return cls_logits, affinity


# ----------------------------------------------------------------------------
if __name__ == "__main__":
    # Small, module-consistent configuration
    VOCAB = 22          # len(AMINO_ACIDS) + 1 (pad id 0)
    D_MODEL = 32
    D_FF = 64
    D_K = D_V = 8
    N_HEADS = 2
    N_LAYERS = 2
    PEP_LEN = 8
    HLA_LEN = 8
    B = 2
    TGT_LEN = PEP_LEN + HLA_LEN

    key = jax.random.PRNGKey(0)
    k_params, k_pep, k_pse = jax.random.split(key, 3)

    params = init_params(k_params, VOCAB, D_MODEL, D_FF, D_K, D_V,
                         N_HEADS, N_LAYERS, TGT_LEN)
    pe_table = make_pe_table(64, D_MODEL)

    pep_in = jax.random.randint(k_pep, (B, PEP_LEN), 0, VOCAB, dtype=jnp.int32)
    pse_in = jax.random.randint(k_pse, (B, HLA_LEN), 0, VOCAB, dtype=jnp.int32)

    fwd = jax.jit(functools.partial(transformer_forward,
                                    n_heads=N_HEADS, d_k=D_K, d_v=D_V,
                                    n_layers=N_LAYERS))
    cls_logits, affinity = fwd(params, pe_table, pep_in, pse_in)
    jax.block_until_ready((cls_logits, affinity))

    assert cls_logits.shape == (B, 2) and affinity.shape == (B,)
    assert bool(jnp.all(jnp.isfinite(cls_logits))) and bool(jnp.all(jnp.isfinite(affinity)))
    print("KERNEL_OK")
</pallas_src>

<mosaic_0001>
module attributes {stable_mosaic.version = 11 : i64} {
  func.func @fused_model_kernel(%arg0: memref<16x32xf32, #tpu.memory_space<vmem>>, %arg1: memref<16x32xf32, #tpu.memory_space<vmem>>, %arg2: memref<16x16xf32, #tpu.memory_space<vmem>>, %arg3: memref<16x16xf32, #tpu.memory_space<vmem>>, %arg4: memref<32x32xf32, #tpu.memory_space<vmem>>, %arg5: memref<32x32xf32, #tpu.memory_space<vmem>>, %arg6: memref<2x32x48xbf16, #tpu.memory_space<vmem>>, %arg7: memref<2x16x32xbf16, #tpu.memory_space<vmem>>, %arg8: memref<2x1x32xf32, #tpu.memory_space<vmem>>, %arg9: memref<2x1x32xf32, #tpu.memory_space<vmem>>, %arg10: memref<2x32x64xbf16, #tpu.memory_space<vmem>>, %arg11: memref<2x64x32xbf16, #tpu.memory_space<vmem>>, %arg12: memref<2x1x32xf32, #tpu.memory_space<vmem>>, %arg13: memref<2x1x32xf32, #tpu.memory_space<vmem>>, %arg14: memref<2x32x48xbf16, #tpu.memory_space<vmem>>, %arg15: memref<2x16x32xbf16, #tpu.memory_space<vmem>>, %arg16: memref<2x1x32xf32, #tpu.memory_space<vmem>>, %arg17: memref<2x1x32xf32, #tpu.memory_space<vmem>>, %arg18: memref<2x32x64xbf16, #tpu.memory_space<vmem>>, %arg19: memref<2x64x32xbf16, #tpu.memory_space<vmem>>, %arg20: memref<2x1x32xf32, #tpu.memory_space<vmem>>, %arg21: memref<2x1x32xf32, #tpu.memory_space<vmem>>, %arg22: memref<2x32x48xbf16, #tpu.memory_space<vmem>>, %arg23: memref<2x16x32xbf16, #tpu.memory_space<vmem>>, %arg24: memref<2x1x32xf32, #tpu.memory_space<vmem>>, %arg25: memref<2x1x32xf32, #tpu.memory_space<vmem>>, %arg26: memref<2x32x64xbf16, #tpu.memory_space<vmem>>, %arg27: memref<2x64x32xbf16, #tpu.memory_space<vmem>>, %arg28: memref<2x1x32xf32, #tpu.memory_space<vmem>>, %arg29: memref<2x1x32xf32, #tpu.memory_space<vmem>>, %arg30: memref<16x32x256xbf16, #tpu.memory_space<vmem>>, %arg31: memref<1x256xf32, #tpu.memory_space<vmem>>, %arg32: memref<1x256xf32, #tpu.memory_space<vmem>>, %arg33: memref<1x256xf32, #tpu.memory_space<vmem>>, %arg34: memref<256x64xbf16, #tpu.memory_space<vmem>>, %arg35: memref<1x64xf32, #tpu.memory_space<vmem>>, %arg36: memref<64x3xbf16, #tpu.memory_space<vmem>>, %arg37: memref<1x3xf32, #tpu.memory_space<vmem>>, %arg38: memref<2x3xf32, #tpu.memory_space<vmem>>) attributes {dimension_semantics = [], scalar_prefetch = 0 : i64, scratch_operands = 0 : i64, tpu.core_type = #tpu.core_type<tc>} {
    %c0 = arith.constant 0 : index
    %c0_0 = arith.constant 0 : index
    %0 = vector.load %arg0[%c0, %c0_0] : memref<16x32xf32, #tpu.memory_space<vmem>>, vector<16x32xf32>
    %c0_1 = arith.constant 0 : index
    %c0_2 = arith.constant 0 : index
    %1 = vector.load %arg2[%c0_1, %c0_2] : memref<16x16xf32, #tpu.memory_space<vmem>>, vector<16x16xf32>
    %2 = arith.truncf %0 : vector<16x32xf32> to vector<16x32xbf16>
    %c0_3 = arith.constant 0 : index
    %c0_4 = arith.constant 0 : index
    %c0_5 = arith.constant 0 : index
    %3 = vector.load %arg6[%c0_3, %c0_4, %c0_5] : memref<2x32x48xbf16, #tpu.memory_space<vmem>>, vector<1x32x48xbf16>
    %4 = vector.shape_cast %3 : vector<1x32x48xbf16> to vector<32x48xbf16>
    %cst = arith.constant dense<0.000000e+00> : vector<16x48xf32>
    %5 = tpu.matmul %2, %4, %cst {dimension_numbers = #tpu.dot_dimension_numbers<[1], [0], [0], [1], [0, 0, 1, 1], [], []>} : vector<16x32xbf16>, vector<32x48xbf16>, vector<16x48xf32> -> vector<16x48xf32>
    %6 = vector.extract_strided_slice %5 {offsets = [0, 0], sizes = [16, 16], strides = [1, 1]} : vector<16x48xf32> to vector<16x16xf32>
    %7 = vector.extract_strided_slice %5 {offsets = [0, 16], sizes = [16, 16], strides = [1, 1]} : vector<16x48xf32> to vector<16x16xf32>
    %8 = vector.extract_strided_slice %5 {offsets = [0, 32], sizes = [16, 16], strides = [1, 1]} : vector<16x48xf32> to vector<16x16xf32>
    %c0_6 = arith.constant 0 : index
    %c0_7 = arith.constant 0 : index
    %c0_8 = arith.constant 0 : index
    %9 = vector.load %arg7[%c0_6, %c0_7, %c0_8] : memref<2x16x32xbf16, #tpu.memory_space<vmem>>, vector<1x16x32xbf16>
    %10 = vector.shape_cast %9 : vector<1x16x32xbf16> to vector<16x32xbf16>
    %cst_9 = arith.constant 0.000000e+00 : f32
    %11 = vector.broadcast %cst_9 : f32 to vector<16x32xf32>
    %12 = vector.extract_strided_slice %6 {offsets = [0, 0], sizes = [16, 8], strides = [1, 1]} : vector<16x16xf32> to vector<16x8xf32>
    %13 = arith.truncf %12 : vector<16x8xf32> to vector<16x8xbf16>
    %14 = vector.extract_strided_slice %7 {offsets = [0, 0], sizes = [16, 8], strides = [1, 1]} : vector<16x16xf32> to vector<16x8xf32>
    %15 = arith.truncf %14 : vector<16x8xf32> to vector<16x8xbf16>
    %16 = vector.extract_strided_slice %8 {offsets = [0, 0], sizes = [16, 8], strides = [1, 1]} : vector<16x16xf32> to vector<16x8xf32>
    %17 = arith.truncf %16 : vector<16x8xf32> to vector<16x8xbf16>
    %cst_10 = arith.constant dense<0.000000e+00> : vector<16x16xf32>
    %18 = tpu.matmul %13, %15, %cst_10 {dimension_numbers = #tpu.dot_dimension_numbers<[1], [1], [0], [0], [0, 0, 1, 0], [], []>} : vector<16x8xbf16>, vector<16x8xbf16>, vector<16x16xf32> -> vector<16x16xf32>
    %19 = arith.addf %18, %1 : vector<16x16xf32>
    %cst_11 = arith.constant dense<0xFF800000> : vector<16xf32>
    %20 = vector.multi_reduction <maximumf>, %19, %cst_11 [1] : vector<16x16xf32> to vector<16xf32>
    %21 = vector.shape_cast %20 : vector<16xf32> to vector<16x1xf32>
    %22 = vector.broadcast %21 : vector<16x1xf32> to vector<16x16xf32>
    %23 = arith.subf %19, %22 : vector<16x16xf32>
    %24 = math.exp %23 : vector<16x16xf32>
    %cst_12 = arith.constant dense<0.000000e+00> : vector<16xf32>
    %25 = vector.multi_reduction <add>, %24, %cst_12 [1] : vector<16x16xf32> to vector<16xf32>
    %26 = vector.shape_cast %25 : vector<16xf32> to vector<16x1xf32>
    %27 = tpu.reciprocal %26 {approx = true} : vector<16x1xf32> -> vector<16x1xf32>
    %28 = vector.broadcast %27 : vector<16x1xf32> to vector<16x16xf32>
    %29 = arith.mulf %24, %28 : vector<16x16xf32>
    %30 = arith.truncf %29 : vector<16x16xf32> to vector<16x16xbf16>
    %cst_13 = arith.constant dense<0.000000e+00> : vector<16x8xf32>
    %31 = tpu.matmul %30, %17, %cst_13 {dimension_numbers = #tpu.dot_dimension_numbers<[1], [0], [0], [1], [0, 0, 1, 1], [], []>} : vector<16x16xbf16>, vector<16x8xbf16>, vector<16x8xf32> -> vector<16x8xf32>
    %32 = arith.truncf %31 : vector<16x8xf32> to vector<16x8xbf16>
    %33 = vector.extract_strided_slice %10 {offsets = [0, 0], sizes = [8, 32], strides = [1, 1]} : vector<16x32xbf16> to vector<8x32xbf16>
    %cst_14 = arith.constant dense<0.000000e+00> : vector<16x32xf32>
    %34 = tpu.matmul %32, %33, %cst_14 {dimension_numbers = #tpu.dot_dimension_numbers<[1], [0], [0], [1], [0, 0, 1, 1], [], []>} : vector<16x8xbf16>, vector<8x32xbf16>, vector<16x32xf32> -> vector<16x32xf32>
    %35 = arith.addf %11, %34 : vector<16x32xf32>
    %36 = vector.extract_strided_slice %6 {offsets = [0, 8], sizes = [16, 8], strides = [1, 1]} : vector<16x16xf32> to vector<16x8xf32>
    %37 = arith.truncf %36 : vector<16x8xf32> to vector<16x8xbf16>
    %38 = vector.extract_strided_slice %7 {offsets = [0, 8], sizes = [16, 8], strides = [1, 1]} : vector<16x16xf32> to vector<16x8xf32>
    %39 = arith.truncf %38 : vector<16x8xf32> to vector<16x8xbf16>
    %40 = vector.extract_strided_slice %8 {offsets = [0, 8], sizes = [16, 8], strides = [1, 1]} : vector<16x16xf32> to vector<16x8xf32>
    %41 = arith.truncf %40 : vector<16x8xf32> to vector<16x8xbf16>
    %cst_15 = arith.constant dense<0.000000e+00> : vector<16x16xf32>
    %42 = tpu.matmul %37, %39, %cst_15 {dimension_numbers = #tpu.dot_dimension_numbers<[1], [1], [0], [0], [0, 0, 1, 0], [], []>} : vector<16x8xbf16>, vector<16x8xbf16>, vector<16x16xf32> -> vector<16x16xf32>
    %43 = arith.addf %42, %1 : vector<16x16xf32>
    %cst_16 = arith.constant dense<0xFF800000> : vector<16xf32>
    %44 = vector.multi_reduction <maximumf>, %43, %cst_16 [1] : vector<16x16xf32> to vector<16xf32>
    %45 = vector.shape_cast %44 : vector<16xf32> to vector<16x1xf32>
    %46 = vector.broadcast %45 : vector<16x1xf32> to vector<16x16xf32>
    %47 = arith.subf %43, %46 : vector<16x16xf32>
    %48 = math.exp %47 : vector<16x16xf32>
    %cst_17 = arith.constant dense<0.000000e+00> : vector<16xf32>
    %49 = vector.multi_reduction <add>, %48, %cst_17 [1] : vector<16x16xf32> to vector<16xf32>
    %50 = vector.shape_cast %49 : vector<16xf32> to vector<16x1xf32>
    %51 = tpu.reciprocal %50 {approx = true} : vector<16x1xf32> -> vector<16x1xf32>
    %52 = vector.broadcast %51 : vector<16x1xf32> to vector<16x16xf32>
    %53 = arith.mulf %48, %52 : vector<16x16xf32>
    %54 = arith.truncf %53 : vector<16x16xf32> to vector<16x16xbf16>
    %cst_18 = arith.constant dense<0.000000e+00> : vector<16x8xf32>
    %55 = tpu.matmul %54, %41, %cst_18 {dimension_numbers = #tpu.dot_dimension_numbers<[1], [0], [0], [1], [0, 0, 1, 1], [], []>} : vector<16x16xbf16>, vector<16x8xbf16>, vector<16x8xf32> -> vector<16x8xf32>
    %56 = arith.truncf %55 : vector<16x8xf32> to vector<16x8xbf16>
    %57 = vector.extract_strided_slice %10 {offsets = [8, 0], sizes = [8, 32], strides = [1, 1]} : vector<16x32xbf16> to vector<8x32xbf16>
    %cst_19 = arith.constant dense<0.000000e+00> : vector<16x32xf32>
    %58 = tpu.matmul %56, %57, %cst_19 {dimension_numbers = #tpu.dot_dimension_numbers<[1], [0], [0], [1], [0, 0, 1, 1], [], []>} : vector<16x8xbf16>, vector<8x32xbf16>, vector<16x32xf32> -> vector<16x32xf32>
    %59 = arith.addf %35, %58 : vector<16x32xf32>
    %60 = arith.addf %59, %0 : vector<16x32xf32>
    %cst_20 = arith.constant dense<0.000000e+00> : vector<16xf32>
    %61 = vector.multi_reduction <add>, %60, %cst_20 [1] : vector<16x32xf32> to vector<16xf32>
    %62 = vector.shape_cast %61 : vector<16xf32> to vector<16x1xf32>
    %cst_21 = arith.constant 3.200000e+01 : f32
    %63 = vector.broadcast %cst_21 : f32 to vector<16x1xf32>
    %64 = arith.divf %62, %63 : vector<16x1xf32>
    %65 = vector.broadcast %64 : vector<16x1xf32> to vector<16x32xf32>
    %66 = arith.subf %60, %65 : vector<16x32xf32>
    %67 = arith.mulf %66, %66 : vector<16x32xf32>
    %cst_22 = arith.constant dense<0.000000e+00> : vector<16xf32>
    %68 = vector.multi_reduction <add>, %67, %cst_22 [1] : vector<16x32xf32> to vector<16xf32>
    %69 = vector.shape_cast %68 : vector<16xf32> to vector<16x1xf32>
    %cst_23 = arith.constant 3.200000e+01 : f32
    %70 = vector.broadcast %cst_23 : f32 to vector<16x1xf32>
    %71 = arith.divf %69, %70 : vector<16x1xf32>
    %72 = vector.broadcast %64 : vector<16x1xf32> to vector<16x32xf32>
    %73 = arith.subf %60, %72 : vector<16x32xf32>
    %cst_24 = arith.constant 9.99999974E-6 : f32
    %74 = vector.broadcast %cst_24 : f32 to vector<16x1xf32>
    %75 = arith.addf %71, %74 : vector<16x1xf32>
    %76 = math.rsqrt %75 : vector<16x1xf32>
    %77 = vector.broadcast %76 : vector<16x1xf32> to vector<16x32xf32>
    %78 = arith.mulf %73, %77 : vector<16x32xf32>
    %c0_25 = arith.constant 0 : index
    %c0_26 = arith.constant 0 : index
    %c0_27 = arith.constant 0 : index
    %79 = vector.load %arg8[%c0_25, %c0_26, %c0_27] : memref<2x1x32xf32, #tpu.memory_space<vmem>>, vector<1x1x32xf32>
    %80 = vector.shape_cast %79 : vector<1x1x32xf32> to vector<1x32xf32>
    %81 = vector.broadcast %80 : vector<1x32xf32> to vector<16x32xf32>
    %82 = arith.mulf %78, %81 : vector<16x32xf32>
    %c0_28 = arith.constant 0 : index
    %c0_29 = arith.constant 0 : index
    %c0_30 = arith.constant 0 : index
    %83 = vector.load %arg9[%c0_28, %c0_29, %c0_30] : memref<2x1x32xf32, #tpu.memory_space<vmem>>, vector<1x1x32xf32>
    %84 = vector.shape_cast %83 : vector<1x1x32xf32> to vector<1x32xf32>
    %85 = vector.broadcast %84 : vector<1x32xf32> to vector<16x32xf32>
    %86 = arith.addf %82, %85 : vector<16x32xf32>
    %87 = arith.truncf %86 : vector<16x32xf32> to vector<16x32xbf16>
    %c0_31 = arith.constant 0 : index
    %c0_32 = arith.constant 0 : index
    %c0_33 = arith.constant 0 : index
    %88 = vector.load %arg10[%c0_31, %c0_32, %c0_33] : memref<2x32x64xbf16, #tpu.memory_space<vmem>>, vector<1x32x64xbf16>
    %89 = vector.shape_cast %88 : vector<1x32x64xbf16> to vector<32x64xbf16>
    %cst_34 = arith.constant dense<0.000000e+00> : vector<16x64xf32>
    %90 = tpu.matmul %87, %89, %cst_34 {dimension_numbers = #tpu.dot_dimension_numbers<[1], [0], [0], [1], [0, 0, 1, 1], [], []>} : vector<16x32xbf16>, vector<32x64xbf16>, vector<16x64xf32> -> vector<16x64xf32>
    %cst_35 = arith.constant 0.000000e+00 : f32
    %91 = vector.broadcast %cst_35 : f32 to vector<16x64xf32>
    %92 = arith.maximumf %90, %91 : vector<16x64xf32>
    %93 = arith.truncf %92 : vector<16x64xf32> to vector<16x64xbf16>
    %c0_36 = arith.constant 0 : index
    %c0_37 = arith.constant 0 : index
    %c0_38 = arith.constant 0 : index
    %94 = vector.load %arg11[%c0_36, %c0_37, %c0_38] : memref<2x64x32xbf16, #tpu.memory_space<vmem>>, vector<1x64x32xbf16>
    %95 = vector.shape_cast %94 : vector<1x64x32xbf16> to vector<64x32xbf16>
    %cst_39 = arith.constant dense<0.000000e+00> : vector<16x32xf32>
    %96 = tpu.matmul %93, %95, %cst_39 {dimension_numbers = #tpu.dot_dimension_numbers<[1], [0], [0], [1], [0, 0, 1, 1], [], []>} : vector<16x64xbf16>, vector<64x32xbf16>, vector<16x32xf32> -> vector<16x32xf32>
    %97 = arith.addf %96, %86 : vector<16x32xf32>
    %cst_40 = arith.constant dense<0.000000e+00> : vector<16xf32>
    %98 = vector.multi_reduction <add>, %97, %cst_40 [1] : vector<16x32xf32> to vector<16xf32>
    %99 = vector.shape_cast %98 : vector<16xf32> to vector<16x1xf32>
    %cst_41 = arith.constant 3.200000e+01 : f32
    %100 = vector.broadcast %cst_41 : f32 to vector<16x1xf32>
    %101 = arith.divf %99, %100 : vector<16x1xf32>
    %102 = vector.broadcast %101 : vector<16x1xf32> to vector<16x32xf32>
    %103 = arith.subf %97, %102 : vector<16x32xf32>
    %104 = arith.mulf %103, %103 : vector<16x32xf32>
    %cst_42 = arith.constant dense<0.000000e+00> : vector<16xf32>
    %105 = vector.multi_reduction <add>, %104, %cst_42 [1] : vector<16x32xf32> to vector<16xf32>
    %106 = vector.shape_cast %105 : vector<16xf32> to vector<16x1xf32>
    %cst_43 = arith.constant 3.200000e+01 : f32
    %107 = vector.broadcast %cst_43 : f32 to vector<16x1xf32>
    %108 = arith.divf %106, %107 : vector<16x1xf32>
    %109 = vector.broadcast %101 : vector<16x1xf32> to vector<16x32xf32>
    %110 = arith.subf %97, %109 : vector<16x32xf32>
    %cst_44 = arith.constant 9.99999974E-6 : f32
    %111 = vector.broadcast %cst_44 : f32 to vector<16x1xf32>
    %112 = arith.addf %108, %111 : vector<16x1xf32>
    %113 = math.rsqrt %112 : vector<16x1xf32>
    %114 = vector.broadcast %113 : vector<16x1xf32> to vector<16x32xf32>
    %115 = arith.mulf %110, %114 : vector<16x32xf32>
    %c0_45 = arith.constant 0 : index
    %c0_46 = arith.constant 0 : index
    %c0_47 = arith.constant 0 : index
    %116 = vector.load %arg12[%c0_45, %c0_46, %c0_47] : memref<2x1x32xf32, #tpu.memory_space<vmem>>, vector<1x1x32xf32>
    %117 = vector.shape_cast %116 : vector<1x1x32xf32> to vector<1x32xf32>
    %118 = vector.broadcast %117 : vector<1x32xf32> to vector<16x32xf32>
    %119 = arith.mulf %115, %118 : vector<16x32xf32>
    %c0_48 = arith.constant 0 : index
    %c0_49 = arith.constant 0 : index
    %c0_50 = arith.constant 0 : index
    %120 = vector.load %arg13[%c0_48, %c0_49, %c0_50] : memref<2x1x32xf32, #tpu.memory_space<vmem>>, vector<1x1x32xf32>
    %121 = vector.shape_cast %120 : vector<1x1x32xf32> to vector<1x32xf32>
    %122 = vector.broadcast %121 : vector<1x32xf32> to vector<16x32xf32>
    %123 = arith.addf %119, %122 : vector<16x32xf32>
    %124 = arith.truncf %123 : vector<16x32xf32> to vector<16x32xbf16>
    %c1 = arith.constant 1 : index
    %c0_51 = arith.constant 0 : index
    %c0_52 = arith.constant 0 : index
    %125 = vector.load %arg6[%c1, %c0_51, %c0_52] : memref<2x32x48xbf16, #tpu.memory_space<vmem>>, vector<1x32x48xbf16>
    %126 = vector.shape_cast %125 : vector<1x32x48xbf16> to vector<32x48xbf16>
    %cst_53 = arith.constant dense<0.000000e+00> : vector<16x48xf32>
    %127 = tpu.matmul %124, %126, %cst_53 {dimension_numbers = #tpu.dot_dimension_numbers<[1], [0], [0], [1], [0, 0, 1, 1], [], []>} : vector<16x32xbf16>, vector<32x48xbf16>, vector<16x48xf32> -> vector<16x48xf32>
    %128 = vector.extract_strided_slice %127 {offsets = [0, 0], sizes = [16, 16], strides = [1, 1]} : vector<16x48xf32> to vector<16x16xf32>
    %129 = vector.extract_strided_slice %127 {offsets = [0, 16], sizes = [16, 16], strides = [1, 1]} : vector<16x48xf32> to vector<16x16xf32>
    %130 = vector.extract_strided_slice %127 {offsets = [0, 32], sizes = [16, 16], strides = [1, 1]} : vector<16x48xf32> to vector<16x16xf32>
    %c1_54 = arith.constant 1 : index
    %c0_55 = arith.constant 0 : index
    %c0_56 = arith.constant 0 : index
    %131 = vector.load %arg7[%c1_54, %c0_55, %c0_56] : memref<2x16x32xbf16, #tpu.memory_space<vmem>>, vector<1x16x32xbf16>
    %132 = vector.shape_cast %131 : vector<1x16x32xbf16> to vector<16x32xbf16>
    %cst_57 = arith.constant 0.000000e+00 : f32
    %133 = vector.broadcast %cst_57 : f32 to vector<16x32xf32>
    %134 = vector.extract_strided_slice %128 {offsets = [0, 0], sizes = [16, 8], strides = [1, 1]} : vector<16x16xf32> to vector<16x8xf32>
    %135 = arith.truncf %134 : vector<16x8xf32> to vector<16x8xbf16>
    %136 = vector.extract_strided_slice %129 {offsets = [0, 0], sizes = [16, 8], strides = [1, 1]} : vector<16x16xf32> to vector<16x8xf32>
    %137 = arith.truncf %136 : vector<16x8xf32> to vector<16x8xbf16>
    %138 = vector.extract_strided_slice %130 {offsets = [0, 0], sizes = [16, 8], strides = [1, 1]} : vector<16x16xf32> to vector<16x8xf32>
    %139 = arith.truncf %138 : vector<16x8xf32> to vector<16x8xbf16>
    %cst_58 = arith.constant dense<0.000000e+00> : vector<16x16xf32>
    %140 = tpu.matmul %135, %137, %cst_58 {dimension_numbers = #tpu.dot_dimension_numbers<[1], [1], [0], [0], [0, 0, 1, 0], [], []>} : vector<16x8xbf16>, vector<16x8xbf16>, vector<16x16xf32> -> vector<16x16xf32>
    %141 = arith.addf %140, %1 : vector<16x16xf32>
    %cst_59 = arith.constant dense<0xFF800000> : vector<16xf32>
    %142 = vector.multi_reduction <maximumf>, %141, %cst_59 [1] : vector<16x16xf32> to vector<16xf32>
    %143 = vector.shape_cast %142 : vector<16xf32> to vector<16x1xf32>
    %144 = vector.broadcast %143 : vector<16x1xf32> to vector<16x16xf32>
    %145 = arith.subf %141, %144 : vector<16x16xf32>
    %146 = math.exp %145 : vector<16x16xf32>
    %cst_60 = arith.constant dense<0.000000e+00> : vector<16xf32>
    %147 = vector.multi_reduction <add>, %146, %cst_60 [1] : vector<16x16xf32> to vector<16xf32>
    %148 = vector.shape_cast %147 : vector<16xf32> to vector<16x1xf32>
    %149 = tpu.reciprocal %148 {approx = true} : vector<16x1xf32> -> vector<16x1xf32>
    %150 = vector.broadcast %149 : vector<16x1xf32> to vector<16x16xf32>
    %151 = arith.mulf %146, %150 : vector<16x16xf32>
    %152 = arith.truncf %151 : vector<16x16xf32> to vector<16x16xbf16>
    %cst_61 = arith.constant dense<0.000000e+00> : vector<16x8xf32>
    %153 = tpu.matmul %152, %139, %cst_61 {dimension_numbers = #tpu.dot_dimension_numbers<[1], [0], [0], [1], [0, 0, 1, 1], [], []>} : vector<16x16xbf16>, vector<16x8xbf16>, vector<16x8xf32> -> vector<16x8xf32>
    %154 = arith.truncf %153 : vector<16x8xf32> to vector<16x8xbf16>
    %155 = vector.extract_strided_slice %132 {offsets = [0, 0], sizes = [8, 32], strides = [1, 1]} : vector<16x32xbf16> to vector<8x32xbf16>
    %cst_62 = arith.constant dense<0.000000e+00> : vector<16x32xf32>
    %156 = tpu.matmul %154, %155, %cst_62 {dimension_numbers = #tpu.dot_dimension_numbers<[1], [0], [0], [1], [0, 0, 1, 1], [], []>} : vector<16x8xbf16>, vector<8x32xbf16>, vector<16x32xf32> -> vector<16x32xf32>
    %157 = arith.addf %133, %156 : vector<16x32xf32>
    %158 = vector.extract_strided_slice %128 {offsets = [0, 8], sizes = [16, 8], strides = [1, 1]} : vector<16x16xf32> to vector<16x8xf32>
    %159 = arith.truncf %158 : vector<16x8xf32> to vector<16x8xbf16>
    %160 = vector.extract_strided_slice %129 {offsets = [0, 8], sizes = [16, 8], strides = [1, 1]} : vector<16x16xf32> to vector<16x8xf32>
    %161 = arith.truncf %160 : vector<16x8xf32> to vector<16x8xbf16>
    %162 = vector.extract_strided_slice %130 {offsets = [0, 8], sizes = [16, 8], strides = [1, 1]} : vector<16x16xf32> to vector<16x8xf32>
    %163 = arith.truncf %162 : vector<16x8xf32> to vector<16x8xbf16>
    %cst_63 = arith.constant dense<0.000000e+00> : vector<16x16xf32>
    %164 = tpu.matmul %159, %161, %cst_63 {dimension_numbers = #tpu.dot_dimension_numbers<[1], [1], [0], [0], [0, 0, 1, 0], [], []>} : vector<16x8xbf16>, vector<16x8xbf16>, vector<16x16xf32> -> vector<16x16xf32>
    %165 = arith.addf %164, %1 : vector<16x16xf32>
    %cst_64 = arith.constant dense<0xFF800000> : vector<16xf32>
    %166 = vector.multi_reduction <maximumf>, %165, %cst_64 [1] : vector<16x16xf32> to vector<16xf32>
    %167 = vector.shape_cast %166 : vector<16xf32> to vector<16x1xf32>
    %168 = vector.broadcast %167 : vector<16x1xf32> to vector<16x16xf32>
    %169 = arith.subf %165, %168 : vector<16x16xf32>
    %170 = math.exp %169 : vector<16x16xf32>
    %cst_65 = arith.constant dense<0.000000e+00> : vector<16xf32>
    %171 = vector.multi_reduction <add>, %170, %cst_65 [1] : vector<16x16xf32> to vector<16xf32>
    %172 = vector.shape_cast %171 : vector<16xf32> to vector<16x1xf32>
    %173 = tpu.reciprocal %172 {approx = true} : vector<16x1xf32> -> vector<16x1xf32>
    %174 = vector.broadcast %173 : vector<16x1xf32> to vector<16x16xf32>
    %175 = arith.mulf %170, %174 : vector<16x16xf32>
    %176 = arith.truncf %175 : vector<16x16xf32> to vector<16x16xbf16>
    %cst_66 = arith.constant dense<0.000000e+00> : vector<16x8xf32>
    %177 = tpu.matmul %176, %163, %cst_66 {dimension_numbers = #tpu.dot_dimension_numbers<[1], [0], [0], [1], [0, 0, 1, 1], [], []>} : vector<16x16xbf16>, vector<16x8xbf16>, vector<16x8xf32> -> vector<16x8xf32>
    %178 = arith.truncf %177 : vector<16x8xf32> to vector<16x8xbf16>
    %179 = vector.extract_strided_slice %132 {offsets = [8, 0], sizes = [8, 32], strides = [1, 1]} : vector<16x32xbf16> to vector<8x32xbf16>
    %cst_67 = arith.constant dense<0.000000e+00> : vector<16x32xf32>
    %180 = tpu.matmul %178, %179, %cst_67 {dimension_numbers = #tpu.dot_dimension_numbers<[1], [0], [0], [1], [0, 0, 1, 1], [], []>} : vector<16x8xbf16>, vector<8x32xbf16>, vector<16x32xf32> -> vector<16x32xf32>
    %181 = arith.addf %157, %180 : vector<16x32xf32>
    %182 = arith.addf %181, %123 : vector<16x32xf32>
    %cst_68 = arith.constant dense<0.000000e+00> : vector<16xf32>
    %183 = vector.multi_reduction <add>, %182, %cst_68 [1] : vector<16x32xf32> to vector<16xf32>
    %184 = vector.shape_cast %183 : vector<16xf32> to vector<16x1xf32>
    %cst_69 = arith.constant 3.200000e+01 : f32
    %185 = vector.broadcast %cst_69 : f32 to vector<16x1xf32>
    %186 = arith.divf %184, %185 : vector<16x1xf32>
    %187 = vector.broadcast %186 : vector<16x1xf32> to vector<16x32xf32>
    %188 = arith.subf %182, %187 : vector<16x32xf32>
    %189 = arith.mulf %188, %188 : vector<16x32xf32>
    %cst_70 = arith.constant dense<0.000000e+00> : vector<16xf32>
    %190 = vector.multi_reduction <add>, %189, %cst_70 [1] : vector<16x32xf32> to vector<16xf32>
    %191 = vector.shape_cast %190 : vector<16xf32> to vector<16x1xf32>
    %cst_71 = arith.constant 3.200000e+01 : f32
    %192 = vector.broadcast %cst_71 : f32 to vector<16x1xf32>
    %193 = arith.divf %191, %192 : vector<16x1xf32>
    %194 = vector.broadcast %186 : vector<16x1xf32> to vector<16x32xf32>
    %195 = arith.subf %182, %194 : vector<16x32xf32>
    %cst_72 = arith.constant 9.99999974E-6 : f32
    %196 = vector.broadcast %cst_72 : f32 to vector<16x1xf32>
    %197 = arith.addf %193, %196 : vector<16x1xf32>
    %198 = math.rsqrt %197 : vector<16x1xf32>
    %199 = vector.broadcast %198 : vector<16x1xf32> to vector<16x32xf32>
    %200 = arith.mulf %195, %199 : vector<16x32xf32>
    %c1_73 = arith.constant 1 : index
    %c0_74 = arith.constant 0 : index
    %c0_75 = arith.constant 0 : index
    %201 = vector.load %arg8[%c1_73, %c0_74, %c0_75] : memref<2x1x32xf32, #tpu.memory_space<vmem>>, vector<1x1x32xf32>
    %202 = vector.shape_cast %201 : vector<1x1x32xf32> to vector<1x32xf32>
    %203 = vector.broadcast %202 : vector<1x32xf32> to vector<16x32xf32>
    %204 = arith.mulf %200, %203 : vector<16x32xf32>
    %c1_76 = arith.constant 1 : index
    %c0_77 = arith.constant 0 : index
    %c0_78 = arith.constant 0 : index
    %205 = vector.load %arg9[%c1_76, %c0_77, %c0_78] : memref<2x1x32xf32, #tpu.memory_space<vmem>>, vector<1x1x32xf32>
    %206 = vector.shape_cast %205 : vector<1x1x32xf32> to vector<1x32xf32>
    %207 = vector.broadcast %206 : vector<1x32xf32> to vector<16x32xf32>
    %208 = arith.addf %204, %207 : vector<16x32xf32>
    %209 = arith.truncf %208 : vector<16x32xf32> to vector<16x32xbf16>
    %c1_79 = arith.constant 1 : index
    %c0_80 = arith.constant 0 : index
    %c0_81 = arith.constant 0 : index
    %210 = vector.load %arg10[%c1_79, %c0_80, %c0_81] : memref<2x32x64xbf16, #tpu.memory_space<vmem>>, vector<1x32x64xbf16>
    %211 = vector.shape_cast %210 : vector<1x32x64xbf16> to vector<32x64xbf16>
    %cst_82 = arith.constant dense<0.000000e+00> : vector<16x64xf32>
    %212 = tpu.matmul %209, %211, %cst_82 {dimension_numbers = #tpu.dot_dimension_numbers<[1], [0], [0], [1], [0, 0, 1, 1], [], []>} : vector<16x32xbf16>, vector<32x64xbf16>, vector<16x64xf32> -> vector<16x64xf32>
    %cst_83 = arith.constant 0.000000e+00 : f32
    %213 = vector.broadcast %cst_83 : f32 to vector<16x64xf32>
    %214 = arith.maximumf %212, %213 : vector<16x64xf32>
    %215 = arith.truncf %214 : vector<16x64xf32> to vector<16x64xbf16>
    %c1_84 = arith.constant 1 : index
    %c0_85 = arith.constant 0 : index
    %c0_86 = arith.constant 0 : index
    %216 = vector.load %arg11[%c1_84, %c0_85, %c0_86] : memref<2x64x32xbf16, #tpu.memory_space<vmem>>, vector<1x64x32xbf16>
    %217 = vector.shape_cast %216 : vector<1x64x32xbf16> to vector<64x32xbf16>
    %cst_87 = arith.constant dense<0.000000e+00> : vector<16x32xf32>
    %218 = tpu.matmul %215, %217, %cst_87 {dimension_numbers = #tpu.dot_dimension_numbers<[1], [0], [0], [1], [0, 0, 1, 1], [], []>} : vector<16x64xbf16>, vector<64x32xbf16>, vector<16x32xf32> -> vector<16x32xf32>
    %219 = arith.addf %218, %208 : vector<16x32xf32>
    %cst_88 = arith.constant dense<0.000000e+00> : vector<16xf32>
    %220 = vector.multi_reduction <add>, %219, %cst_88 [1] : vector<16x32xf32> to vector<16xf32>
    %221 = vector.shape_cast %220 : vector<16xf32> to vector<16x1xf32>
    %cst_89 = arith.constant 3.200000e+01 : f32
    %222 = vector.broadcast %cst_89 : f32 to vector<16x1xf32>
    %223 = arith.divf %221, %222 : vector<16x1xf32>
    %224 = vector.broadcast %223 : vector<16x1xf32> to vector<16x32xf32>
    %225 = arith.subf %219, %224 : vector<16x32xf32>
    %226 = arith.mulf %225, %225 : vector<16x32xf32>
    %cst_90 = arith.constant dense<0.000000e+00> : vector<16xf32>
    %227 = vector.multi_reduction <add>, %226, %cst_90 [1] : vector<16x32xf32> to vector<16xf32>
    %228 = vector.shape_cast %227 : vector<16xf32> to vector<16x1xf32>
    %cst_91 = arith.constant 3.200000e+01 : f32
    %229 = vector.broadcast %cst_91 : f32 to vector<16x1xf32>
    %230 = arith.divf %228, %229 : vector<16x1xf32>
    %231 = vector.broadcast %223 : vector<16x1xf32> to vector<16x32xf32>
    %232 = arith.subf %219, %231 : vector<16x32xf32>
    %cst_92 = arith.constant 9.99999974E-6 : f32
    %233 = vector.broadcast %cst_92 : f32 to vector<16x1xf32>
    %234 = arith.addf %230, %233 : vector<16x1xf32>
    %235 = math.rsqrt %234 : vector<16x1xf32>
    %236 = vector.broadcast %235 : vector<16x1xf32> to vector<16x32xf32>
    %237 = arith.mulf %232, %236 : vector<16x32xf32>
    %c1_93 = arith.constant 1 : index
    %c0_94 = arith.constant 0 : index
    %c0_95 = arith.constant 0 : index
    %238 = vector.load %arg12[%c1_93, %c0_94, %c0_95] : memref<2x1x32xf32, #tpu.memory_space<vmem>>, vector<1x1x32xf32>
    %239 = vector.shape_cast %238 : vector<1x1x32xf32> to vector<1x32xf32>
    %240 = vector.broadcast %239 : vector<1x32xf32> to vector<16x32xf32>
    %241 = arith.mulf %237, %240 : vector<16x32xf32>
    %c1_96 = arith.constant 1 : index
    %c0_97 = arith.constant 0 : index
    %c0_98 = arith.constant 0 : index
    %242 = vector.load %arg13[%c1_96, %c0_97, %c0_98] : memref<2x1x32xf32, #tpu.memory_space<vmem>>, vector<1x1x32xf32>
    %243 = vector.shape_cast %242 : vector<1x1x32xf32> to vector<1x32xf32>
    %244 = vector.broadcast %243 : vector<1x32xf32> to vector<16x32xf32>
    %245 = arith.addf %241, %244 : vector<16x32xf32>
    %c0_99 = arith.constant 0 : index
    %c0_100 = arith.constant 0 : index
    %246 = vector.load %arg1[%c0_99, %c0_100] : memref<16x32xf32, #tpu.memory_space<vmem>>, vector<16x32xf32>
    %c0_101 = arith.constant 0 : index
    %c0_102 = arith.constant 0 : index
    %247 = vector.load %arg3[%c0_101, %c0_102] : memref<16x16xf32, #tpu.memory_space<vmem>>, vector<16x16xf32>
    %248 = arith.truncf %246 : vector<16x32xf32> to vector<16x32xbf16>
    %c0_103 = arith.constant 0 : index
    %c0_104 = arith.constant 0 : index
    %c0_105 = arith.constant 0 : index
    %249 = vector.load %arg14[%c0_103, %c0_104, %c0_105] : memref<2x32x48xbf16, #tpu.memory_space<vmem>>, vector<1x32x48xbf16>
    %250 = vector.shape_cast %249 : vector<1x32x48xbf16> to vector<32x48xbf16>
    %cst_106 = arith.constant dense<0.000000e+00> : vector<16x48xf32>
    %251 = tpu.matmul %248, %250, %cst_106 {dimension_numbers = #tpu.dot_dimension_numbers<[1], [0], [0], [1], [0, 0, 1, 1], [], []>} : vector<16x32xbf16>, vector<32x48xbf16>, vector<16x48xf32> -> vector<16x48xf32>
    %252 = vector.extract_strided_slice %251 {offsets = [0, 0], sizes = [16, 16], strides = [1, 1]} : vector<16x48xf32> to vector<16x16xf32>
    %253 = vector.extract_strided_slice %251 {offsets = [0, 16], sizes = [16, 16], strides = [1, 1]} : vector<16x48xf32> to vector<16x16xf32>
    %254 = vector.extract_strided_slice %251 {offsets = [0, 32], sizes = [16, 16], strides = [1, 1]} : vector<16x48xf32> to vector<16x16xf32>
    %c0_107 = arith.constant 0 : index
    %c0_108 = arith.constant 0 : index
    %c0_109 = arith.constant 0 : index
    %255 = vector.load %arg15[%c0_107, %c0_108, %c0_109] : memref<2x16x32xbf16, #tpu.memory_space<vmem>>, vector<1x16x32xbf16>
    %256 = vector.shape_cast %255 : vector<1x16x32xbf16> to vector<16x32xbf16>
    %cst_110 = arith.constant 0.000000e+00 : f32
    %257 = vector.broadcast %cst_110 : f32 to vector<16x32xf32>
    %258 = vector.extract_strided_slice %252 {offsets = [0, 0], sizes = [16, 8], strides = [1, 1]} : vector<16x16xf32> to vector<16x8xf32>
    %259 = arith.truncf %258 : vector<16x8xf32> to vector<16x8xbf16>
    %260 = vector.extract_strided_slice %253 {offsets = [0, 0], sizes = [16, 8], strides = [1, 1]} : vector<16x16xf32> to vector<16x8xf32>
    %261 = arith.truncf %260 : vector<16x8xf32> to vector<16x8xbf16>
    %262 = vector.extract_strided_slice %254 {offsets = [0, 0], sizes = [16, 8], strides = [1, 1]} : vector<16x16xf32> to vector<16x8xf32>
    %263 = arith.truncf %262 : vector<16x8xf32> to vector<16x8xbf16>
    %cst_111 = arith.constant dense<0.000000e+00> : vector<16x16xf32>
    %264 = tpu.matmul %259, %261, %cst_111 {dimension_numbers = #tpu.dot_dimension_numbers<[1], [1], [0], [0], [0, 0, 1, 0], [], []>} : vector<16x8xbf16>, vector<16x8xbf16>, vector<16x16xf32> -> vector<16x16xf32>
    %265 = arith.addf %264, %247 : vector<16x16xf32>
    %cst_112 = arith.constant dense<0xFF800000> : vector<16xf32>
    %266 = vector.multi_reduction <maximumf>, %265, %cst_112 [1] : vector<16x16xf32> to vector<16xf32>
    %267 = vector.shape_cast %266 : vector<16xf32> to vector<16x1xf32>
    %268 = vector.broadcast %267 : vector<16x1xf32> to vector<16x16xf32>
    %269 = arith.subf %265, %268 : vector<16x16xf32>
    %270 = math.exp %269 : vector<16x16xf32>
    %cst_113 = arith.constant dense<0.000000e+00> : vector<16xf32>
    %271 = vector.multi_reduction <add>, %270, %cst_113 [1] : vector<16x16xf32> to vector<16xf32>
    %272 = vector.shape_cast %271 : vector<16xf32> to vector<16x1xf32>
    %273 = tpu.reciprocal %272 {approx = true} : vector<16x1xf32> -> vector<16x1xf32>
    %274 = vector.broadcast %273 : vector<16x1xf32> to vector<16x16xf32>
    %275 = arith.mulf %270, %274 : vector<16x16xf32>
    %276 = arith.truncf %275 : vector<16x16xf32> to vector<16x16xbf16>
    %cst_114 = arith.constant dense<0.000000e+00> : vector<16x8xf32>
    %277 = tpu.matmul %276, %263, %cst_114 {dimension_numbers = #tpu.dot_dimension_numbers<[1], [0], [0], [1], [0, 0, 1, 1], [], []>} : vector<16x16xbf16>, vector<16x8xbf16>, vector<16x8xf32> -> vector<16x8xf32>
    %278 = arith.truncf %277 : vector<16x8xf32> to vector<16x8xbf16>
    %279 = vector.extract_strided_slice %256 {offsets = [0, 0], sizes = [8, 32], strides = [1, 1]} : vector<16x32xbf16> to vector<8x32xbf16>
    %cst_115 = arith.constant dense<0.000000e+00> : vector<16x32xf32>
    %280 = tpu.matmul %278, %279, %cst_115 {dimension_numbers = #tpu.dot_dimension_numbers<[1], [0], [0], [1], [0, 0, 1, 1], [], []>} : vector<16x8xbf16>, vector<8x32xbf16>, vector<16x32xf32> -> vector<16x32xf32>
    %281 = arith.addf %257, %280 : vector<16x32xf32>
    %282 = vector.extract_strided_slice %252 {offsets = [0, 8], sizes = [16, 8], strides = [1, 1]} : vector<16x16xf32> to vector<16x8xf32>
    %283 = arith.truncf %282 : vector<16x8xf32> to vector<16x8xbf16>
    %284 = vector.extract_strided_slice %253 {offsets = [0, 8], sizes = [16, 8], strides = [1, 1]} : vector<16x16xf32> to vector<16x8xf32>
    %285 = arith.truncf %284 : vector<16x8xf32> to vector<16x8xbf16>
    %286 = vector.extract_strided_slice %254 {offsets = [0, 8], sizes = [16, 8], strides = [1, 1]} : vector<16x16xf32> to vector<16x8xf32>
    %287 = arith.truncf %286 : vector<16x8xf32> to vector<16x8xbf16>
    %cst_116 = arith.constant dense<0.000000e+00> : vector<16x16xf32>
    %288 = tpu.matmul %283, %285, %cst_116 {dimension_numbers = #tpu.dot_dimension_numbers<[1], [1], [0], [0], [0, 0, 1, 0], [], []>} : vector<16x8xbf16>, vector<16x8xbf16>, vector<16x16xf32> -> vector<16x16xf32>
    %289 = arith.addf %288, %247 : vector<16x16xf32>
    %cst_117 = arith.constant dense<0xFF800000> : vector<16xf32>
    %290 = vector.multi_reduction <maximumf>, %289, %cst_117 [1] : vector<16x16xf32> to vector<16xf32>
    %291 = vector.shape_cast %290 : vector<16xf32> to vector<16x1xf32>
    %292 = vector.broadcast %291 : vector<16x1xf32> to vector<16x16xf32>
    %293 = arith.subf %289, %292 : vector<16x16xf32>
    %294 = math.exp %293 : vector<16x16xf32>
    %cst_118 = arith.constant dense<0.000000e+00> : vector<16xf32>
    %295 = vector.multi_reduction <add>, %294, %cst_118 [1] : vector<16x16xf32> to vector<16xf32>
    %296 = vector.shape_cast %295 : vector<16xf32> to vector<16x1xf32>
    %297 = tpu.reciprocal %296 {approx = true} : vector<16x1xf32> -> vector<16x1xf32>
    %298 = vector.broadcast %297 : vector<16x1xf32> to vector<16x16xf32>
    %299 = arith.mulf %294, %298 : vector<16x16xf32>
    %300 = arith.truncf %299 : vector<16x16xf32> to vector<16x16xbf16>
    %cst_119 = arith.constant dense<0.000000e+00> : vector<16x8xf32>
    %301 = tpu.matmul %300, %287, %cst_119 {dimension_numbers = #tpu.dot_dimension_numbers<[1], [0], [0], [1], [0, 0, 1, 1], [], []>} : vector<16x16xbf16>, vector<16x8xbf16>, vector<16x8xf32> -> vector<16x8xf32>
    %302 = arith.truncf %301 : vector<16x8xf32> to vector<16x8xbf16>
    %303 = vector.extract_strided_slice %256 {offsets = [8, 0], sizes = [8, 32], strides = [1, 1]} : vector<16x32xbf16> to vector<8x32xbf16>
    %cst_120 = arith.constant dense<0.000000e+00> : vector<16x32xf32>
    %304 = tpu.matmul %302, %303, %cst_120 {dimension_numbers = #tpu.dot_dimension_numbers<[1], [0], [0], [1], [0, 0, 1, 1], [], []>} : vector<16x8xbf16>, vector<8x32xbf16>, vector<16x32xf32> -> vector<16x32xf32>
    %305 = arith.addf %281, %304 : vector<16x32xf32>
    %306 = arith.addf %305, %246 : vector<16x32xf32>
    %cst_121 = arith.constant dense<0.000000e+00> : vector<16xf32>
    %307 = vector.multi_reduction <add>, %306, %cst_121 [1] : vector<16x32xf32> to vector<16xf32>
    %308 = vector.shape_cast %307 : vector<16xf32> to vector<16x1xf32>
    %cst_122 = arith.constant 3.200000e+01 : f32
    %309 = vector.broadcast %cst_122 : f32 to vector<16x1xf32>
    %310 = arith.divf %308, %309 : vector<16x1xf32>
    %311 = vector.broadcast %310 : vector<16x1xf32> to vector<16x32xf32>
    %312 = arith.subf %306, %311 : vector<16x32xf32>
    %313 = arith.mulf %312, %312 : vector<16x32xf32>
    %cst_123 = arith.constant dense<0.000000e+00> : vector<16xf32>
    %314 = vector.multi_reduction <add>, %313, %cst_123 [1] : vector<16x32xf32> to vector<16xf32>
    %315 = vector.shape_cast %314 : vector<16xf32> to vector<16x1xf32>
    %cst_124 = arith.constant 3.200000e+01 : f32
    %316 = vector.broadcast %cst_124 : f32 to vector<16x1xf32>
    %317 = arith.divf %315, %316 : vector<16x1xf32>
    %318 = vector.broadcast %310 : vector<16x1xf32> to vector<16x32xf32>
    %319 = arith.subf %306, %318 : vector<16x32xf32>
    %cst_125 = arith.constant 9.99999974E-6 : f32
    %320 = vector.broadcast %cst_125 : f32 to vector<16x1xf32>
    %321 = arith.addf %317, %320 : vector<16x1xf32>
    %322 = math.rsqrt %321 : vector<16x1xf32>
    %323 = vector.broadcast %322 : vector<16x1xf32> to vector<16x32xf32>
    %324 = arith.mulf %319, %323 : vector<16x32xf32>
    %c0_126 = arith.constant 0 : index
    %c0_127 = arith.constant 0 : index
    %c0_128 = arith.constant 0 : index
    %325 = vector.load %arg16[%c0_126, %c0_127, %c0_128] : memref<2x1x32xf32, #tpu.memory_space<vmem>>, vector<1x1x32xf32>
    %326 = vector.shape_cast %325 : vector<1x1x32xf32> to vector<1x32xf32>
    %327 = vector.broadcast %326 : vector<1x32xf32> to vector<16x32xf32>
    %328 = arith.mulf %324, %327 : vector<16x32xf32>
    %c0_129 = arith.constant 0 : index
    %c0_130 = arith.constant 0 : index
    %c0_131 = arith.constant 0 : index
    %329 = vector.load %arg17[%c0_129, %c0_130, %c0_131] : memref<2x1x32xf32, #tpu.memory_space<vmem>>, vector<1x1x32xf32>
    %330 = vector.shape_cast %329 : vector<1x1x32xf32> to vector<1x32xf32>
    %331 = vector.broadcast %330 : vector<1x32xf32> to vector<16x32xf32>
    %332 = arith.addf %328, %331 : vector<16x32xf32>
    %333 = arith.truncf %332 : vector<16x32xf32> to vector<16x32xbf16>
    %c0_132 = arith.constant 0 : index
    %c0_133 = arith.constant 0 : index
    %c0_134 = arith.constant 0 : index
    %334 = vector.load %arg18[%c0_132, %c0_133, %c0_134] : memref<2x32x64xbf16, #tpu.memory_space<vmem>>, vector<1x32x64xbf16>
    %335 = vector.shape_cast %334 : vector<1x32x64xbf16> to vector<32x64xbf16>
    %cst_135 = arith.constant dense<0.000000e+00> : vector<16x64xf32>
    %336 = tpu.matmul %333, %335, %cst_135 {dimension_numbers = #tpu.dot_dimension_numbers<[1], [0], [0], [1], [0, 0, 1, 1], [], []>} : vector<16x32xbf16>, vector<32x64xbf16>, vector<16x64xf32> -> vector<16x64xf32>
    %cst_136 = arith.constant 0.000000e+00 : f32
    %337 = vector.broadcast %cst_136 : f32 to vector<16x64xf32>
    %338 = arith.maximumf %336, %337 : vector<16x64xf32>
    %339 = arith.truncf %338 : vector<16x64xf32> to vector<16x64xbf16>
    %c0_137 = arith.constant 0 : index
    %c0_138 = arith.constant 0 : index
    %c0_139 = arith.constant 0 : index
    %340 = vector.load %arg19[%c0_137, %c0_138, %c0_139] : memref<2x64x32xbf16, #tpu.memory_space<vmem>>, vector<1x64x32xbf16>
    %341 = vector.shape_cast %340 : vector<1x64x32xbf16> to vector<64x32xbf16>
    %cst_140 = arith.constant dense<0.000000e+00> : vector<16x32xf32>
    %342 = tpu.matmul %339, %341, %cst_140 {dimension_numbers = #tpu.dot_dimension_numbers<[1], [0], [0], [1], [0, 0, 1, 1], [], []>} : vector<16x64xbf16>, vector<64x32xbf16>, vector<16x32xf32> -> vector<16x32xf32>
    %343 = arith.addf %342, %332 : vector<16x32xf32>
    %cst_141 = arith.constant dense<0.000000e+00> : vector<16xf32>
    %344 = vector.multi_reduction <add>, %343, %cst_141 [1] : vector<16x32xf32> to vector<16xf32>
    %345 = vector.shape_cast %344 : vector<16xf32> to vector<16x1xf32>
    %cst_142 = arith.constant 3.200000e+01 : f32
    %346 = vector.broadcast %cst_142 : f32 to vector<16x1xf32>
    %347 = arith.divf %345, %346 : vector<16x1xf32>
    %348 = vector.broadcast %347 : vector<16x1xf32> to vector<16x32xf32>
    %349 = arith.subf %343, %348 : vector<16x32xf32>
    %350 = arith.mulf %349, %349 : vector<16x32xf32>
    %cst_143 = arith.constant dense<0.000000e+00> : vector<16xf32>
    %351 = vector.multi_reduction <add>, %350, %cst_143 [1] : vector<16x32xf32> to vector<16xf32>
    %352 = vector.shape_cast %351 : vector<16xf32> to vector<16x1xf32>
    %cst_144 = arith.constant 3.200000e+01 : f32
    %353 = vector.broadcast %cst_144 : f32 to vector<16x1xf32>
    %354 = arith.divf %352, %353 : vector<16x1xf32>
    %355 = vector.broadcast %347 : vector<16x1xf32> to vector<16x32xf32>
    %356 = arith.subf %343, %355 : vector<16x32xf32>
    %cst_145 = arith.constant 9.99999974E-6 : f32
    %357 = vector.broadcast %cst_145 : f32 to vector<16x1xf32>
    %358 = arith.addf %354, %357 : vector<16x1xf32>
    %359 = math.rsqrt %358 : vector<16x1xf32>
    %360 = vector.broadcast %359 : vector<16x1xf32> to vector<16x32xf32>
    %361 = arith.mulf %356, %360 : vector<16x32xf32>
    %c0_146 = arith.constant 0 : index
    %c0_147 = arith.constant 0 : index
    %c0_148 = arith.constant 0 : index
    %362 = vector.load %arg20[%c0_146, %c0_147, %c0_148] : memref<2x1x32xf32, #tpu.memory_space<vmem>>, vector<1x1x32xf32>
    %363 = vector.shape_cast %362 : vector<1x1x32xf32> to vector<1x32xf32>
    %364 = vector.broadcast %363 : vector<1x32xf32> to vector<16x32xf32>
    %365 = arith.mulf %361, %364 : vector<16x32xf32>
    %c0_149 = arith.constant 0 : index
    %c0_150 = arith.constant 0 : index
    %c0_151 = arith.constant 0 : index
    %366 = vector.load %arg21[%c0_149, %c0_150, %c0_151] : memref<2x1x32xf32, #tpu.memory_space<vmem>>, vector<1x1x32xf32>
    %367 = vector.shape_cast %366 : vector<1x1x32xf32> to vector<1x32xf32>
    %368 = vector.broadcast %367 : vector<1x32xf32> to vector<16x32xf32>
    %369 = arith.addf %365, %368 : vector<16x32xf32>
    %370 = arith.truncf %369 : vector<16x32xf32> to vector<16x32xbf16>
    %c1_152 = arith.constant 1 : index
    %c0_153 = arith.constant 0 : index
    %c0_154 = arith.constant 0 : index
    %371 = vector.load %arg14[%c1_152, %c0_153, %c0_154] : memref<2x32x48xbf16, #tpu.memory_space<vmem>>, vector<1x32x48xbf16>
    %372 = vector.shape_cast %371 : vector<1x32x48xbf16> to vector<32x48xbf16>
    %cst_155 = arith.constant dense<0.000000e+00> : vector<16x48xf32>
    %373 = tpu.matmul %370, %372, %cst_155 {dimension_numbers = #tpu.dot_dimension_numbers<[1], [0], [0], [1], [0, 0, 1, 1], [], []>} : vector<16x32xbf16>, vector<32x48xbf16>, vector<16x48xf32> -> vector<16x48xf32>
    %374 = vector.extract_strided_slice %373 {offsets = [0, 0], sizes = [16, 16], strides = [1, 1]} : vector<16x48xf32> to vector<16x16xf32>
    %375 = vector.extract_strided_slice %373 {offsets = [0, 16], sizes = [16, 16], strides = [1, 1]} : vector<16x48xf32> to vector<16x16xf32>
    %376 = vector.extract_strided_slice %373 {offsets = [0, 32], sizes = [16, 16], strides = [1, 1]} : vector<16x48xf32> to vector<16x16xf32>
    %c1_156 = arith.constant 1 : index
    %c0_157 = arith.constant 0 : index
    %c0_158 = arith.constant 0 : index
    %377 = vector.load %arg15[%c1_156, %c0_157, %c0_158] : memref<2x16x32xbf16, #tpu.memory_space<vmem>>, vector<1x16x32xbf16>
    %378 = vector.shape_cast %377 : vector<1x16x32xbf16> to vector<16x32xbf16>
    %cst_159 = arith.constant 0.000000e+00 : f32
    %379 = vector.broadcast %cst_159 : f32 to vector<16x32xf32>
    %380 = vector.extract_strided_slice %374 {offsets = [0, 0], sizes = [16, 8], strides = [1, 1]} : vector<16x16xf32> to vector<16x8xf32>
    %381 = arith.truncf %380 : vector<16x8xf32> to vector<16x8xbf16>
    %382 = vector.extract_strided_slice %375 {offsets = [0, 0], sizes = [16, 8], strides = [1, 1]} : vector<16x16xf32> to vector<16x8xf32>
    %383 = arith.truncf %382 : vector<16x8xf32> to vector<16x8xbf16>
    %384 = vector.extract_strided_slice %376 {offsets = [0, 0], sizes = [16, 8], strides = [1, 1]} : vector<16x16xf32> to vector<16x8xf32>
    %385 = arith.truncf %384 : vector<16x8xf32> to vector<16x8xbf16>
    %cst_160 = arith.constant dense<0.000000e+00> : vector<16x16xf32>
    %386 = tpu.matmul %381, %383, %cst_160 {dimension_numbers = #tpu.dot_dimension_numbers<[1], [1], [0], [0], [0, 0, 1, 0], [], []>} : vector<16x8xbf16>, vector<16x8xbf16>, vector<16x16xf32> -> vector<16x16xf32>
    %387 = arith.addf %386, %247 : vector<16x16xf32>
    %cst_161 = arith.constant dense<0xFF800000> : vector<16xf32>
    %388 = vector.multi_reduction <maximumf>, %387, %cst_161 [1] : vector<16x16xf32> to vector<16xf32>
    %389 = vector.shape_cast %388 : vector<16xf32> to vector<16x1xf32>
    %390 = vector.broadcast %389 : vector<16x1xf32> to vector<16x16xf32>
    %391 = arith.subf %387, %390 : vector<16x16xf32>
    %392 = math.exp %391 : vector<16x16xf32>
    %cst_162 = arith.constant dense<0.000000e+00> : vector<16xf32>
    %393 = vector.multi_reduction <add>, %392, %cst_162 [1] : vector<16x16xf32> to vector<16xf32>
    %394 = vector.shape_cast %393 : vector<16xf32> to vector<16x1xf32>
    %395 = tpu.reciprocal %394 {approx = true} : vector<16x1xf32> -> vector<16x1xf32>
    %396 = vector.broadcast %395 : vector<16x1xf32> to vector<16x16xf32>
    %397 = arith.mulf %392, %396 : vector<16x16xf32>
    %398 = arith.truncf %397 : vector<16x16xf32> to vector<16x16xbf16>
    %cst_163 = arith.constant dense<0.000000e+00> : vector<16x8xf32>
    %399 = tpu.matmul %398, %385, %cst_163 {dimension_numbers = #tpu.dot_dimension_numbers<[1], [0], [0], [1], [0, 0, 1, 1], [], []>} : vector<16x16xbf16>, vector<16x8xbf16>, vector<16x8xf32> -> vector<16x8xf32>
    %400 = arith.truncf %399 : vector<16x8xf32> to vector<16x8xbf16>
    %401 = vector.extract_strided_slice %378 {offsets = [0, 0], sizes = [8, 32], strides = [1, 1]} : vector<16x32xbf16> to vector<8x32xbf16>
    %cst_164 = arith.constant dense<0.000000e+00> : vector<16x32xf32>
    %402 = tpu.matmul %400, %401, %cst_164 {dimension_numbers = #tpu.dot_dimension_numbers<[1], [0], [0], [1], [0, 0, 1, 1], [], []>} : vector<16x8xbf16>, vector<8x32xbf16>, vector<16x32xf32> -> vector<16x32xf32>
    %403 = arith.addf %379, %402 : vector<16x32xf32>
    %404 = vector.extract_strided_slice %374 {offsets = [0, 8], sizes = [16, 8], strides = [1, 1]} : vector<16x16xf32> to vector<16x8xf32>
    %405 = arith.truncf %404 : vector<16x8xf32> to vector<16x8xbf16>
    %406 = vector.extract_strided_slice %375 {offsets = [0, 8], sizes = [16, 8], strides = [1, 1]} : vector<16x16xf32> to vector<16x8xf32>
    %407 = arith.truncf %406 : vector<16x8xf32> to vector<16x8xbf16>
    %408 = vector.extract_strided_slice %376 {offsets = [0, 8], sizes = [16, 8], strides = [1, 1]} : vector<16x16xf32> to vector<16x8xf32>
    %409 = arith.truncf %408 : vector<16x8xf32> to vector<16x8xbf16>
    %cst_165 = arith.constant dense<0.000000e+00> : vector<16x16xf32>
    %410 = tpu.matmul %405, %407, %cst_165 {dimension_numbers = #tpu.dot_dimension_numbers<[1], [1], [0], [0], [0, 0, 1, 0], [], []>} : vector<16x8xbf16>, vector<16x8xbf16>, vector<16x16xf32> -> vector<16x16xf32>
    %411 = arith.addf %410, %247 : vector<16x16xf32>
    %cst_166 = arith.constant dense<0xFF800000> : vector<16xf32>
    %412 = vector.multi_reduction <maximumf>, %411, %cst_166 [1] : vector<16x16xf32> to vector<16xf32>
    %413 = vector.shape_cast %412 : vector<16xf32> to vector<16x1xf32>
    %414 = vector.broadcast %413 : vector<16x1xf32> to vector<16x16xf32>
    %415 = arith.subf %411, %414 : vector<16x16xf32>
    %416 = math.exp %415 : vector<16x16xf32>
    %cst_167 = arith.constant dense<0.000000e+00> : vector<16xf32>
    %417 = vector.multi_reduction <add>, %416, %cst_167 [1] : vector<16x16xf32> to vector<16xf32>
    %418 = vector.shape_cast %417 : vector<16xf32> to vector<16x1xf32>
    %419 = tpu.reciprocal %418 {approx = true} : vector<16x1xf32> -> vector<16x1xf32>
    %420 = vector.broadcast %419 : vector<16x1xf32> to vector<16x16xf32>
    %421 = arith.mulf %416, %420 : vector<16x16xf32>
    %422 = arith.truncf %421 : vector<16x16xf32> to vector<16x16xbf16>
    %cst_168 = arith.constant dense<0.000000e+00> : vector<16x8xf32>
    %423 = tpu.matmul %422, %409, %cst_168 {dimension_numbers = #tpu.dot_dimension_numbers<[1], [0], [0], [1], [0, 0, 1, 1], [], []>} : vector<16x16xbf16>, vector<16x8xbf16>, vector<16x8xf32> -> vector<16x8xf32>
    %424 = arith.truncf %423 : vector<16x8xf32> to vector<16x8xbf16>
    %425 = vector.extract_strided_slice %378 {offsets = [8, 0], sizes = [8, 32], strides = [1, 1]} : vector<16x32xbf16> to vector<8x32xbf16>
    %cst_169 = arith.constant dense<0.000000e+00> : vector<16x32xf32>
    %426 = tpu.matmul %424, %425, %cst_169 {dimension_numbers = #tpu.dot_dimension_numbers<[1], [0], [0], [1], [0, 0, 1, 1], [], []>} : vector<16x8xbf16>, vector<8x32xbf16>, vector<16x32xf32> -> vector<16x32xf32>
    %427 = arith.addf %403, %426 : vector<16x32xf32>
    %428 = arith.addf %427, %369 : vector<16x32xf32>
    %cst_170 = arith.constant dense<0.000000e+00> : vector<16xf32>
    %429 = vector.multi_reduction <add>, %428, %cst_170 [1] : vector<16x32xf32> to vector<16xf32>
    %430 = vector.shape_cast %429 : vector<16xf32> to vector<16x1xf32>
    %cst_171 = arith.constant 3.200000e+01 : f32
    %431 = vector.broadcast %cst_171 : f32 to vector<16x1xf32>
    %432 = arith.divf %430, %431 : vector<16x1xf32>
    %433 = vector.broadcast %432 : vector<16x1xf32> to vector<16x32xf32>
    %434 = arith.subf %428, %433 : vector<16x32xf32>
    %435 = arith.mulf %434, %434 : vector<16x32xf32>
    %cst_172 = arith.constant dense<0.000000e+00> : vector<16xf32>
    %436 = vector.multi_reduction <add>, %435, %cst_172 [1] : vector<16x32xf32> to vector<16xf32>
    %437 = vector.shape_cast %436 : vector<16xf32> to vector<16x1xf32>
    %cst_173 = arith.constant 3.200000e+01 : f32
    %438 = vector.broadcast %cst_173 : f32 to vector<16x1xf32>
    %439 = arith.divf %437, %438 : vector<16x1xf32>
    %440 = vector.broadcast %432 : vector<16x1xf32> to vector<16x32xf32>
    %441 = arith.subf %428, %440 : vector<16x32xf32>
    %cst_174 = arith.constant 9.99999974E-6 : f32
    %442 = vector.broadcast %cst_174 : f32 to vector<16x1xf32>
    %443 = arith.addf %439, %442 : vector<16x1xf32>
    %444 = math.rsqrt %443 : vector<16x1xf32>
    %445 = vector.broadcast %444 : vector<16x1xf32> to vector<16x32xf32>
    %446 = arith.mulf %441, %445 : vector<16x32xf32>
    %c1_175 = arith.constant 1 : index
    %c0_176 = arith.constant 0 : index
    %c0_177 = arith.constant 0 : index
    %447 = vector.load %arg16[%c1_175, %c0_176, %c0_177] : memref<2x1x32xf32, #tpu.memory_space<vmem>>, vector<1x1x32xf32>
    %448 = vector.shape_cast %447 : vector<1x1x32xf32> to vector<1x32xf32>
    %449 = vector.broadcast %448 : vector<1x32xf32> to vector<16x32xf32>
    %450 = arith.mulf %446, %449 : vector<16x32xf32>
    %c1_178 = arith.constant 1 : index
    %c0_179 = arith.constant 0 : index
    %c0_180 = arith.constant 0 : index
    %451 = vector.load %arg17[%c1_178, %c0_179, %c0_180] : memref<2x1x32xf32, #tpu.memory_space<vmem>>, vector<1x1x32xf32>
    %452 = vector.shape_cast %451 : vector<1x1x32xf32> to vector<1x32xf32>
    %453 = vector.broadcast %452 : vector<1x32xf32> to vector<16x32xf32>
    %454 = arith.addf %450, %453 : vector<16x32xf32>
    %455 = arith.truncf %454 : vector<16x32xf32> to vector<16x32xbf16>
    %c1_181 = arith.constant 1 : index
    %c0_182 = arith.constant 0 : index
    %c0_183 = arith.constant 0 : index
    %456 = vector.load %arg18[%c1_181, %c0_182, %c0_183] : memref<2x32x64xbf16, #tpu.memory_space<vmem>>, vector<1x32x64xbf16>
    %457 = vector.shape_cast %456 : vector<1x32x64xbf16> to vector<32x64xbf16>
    %cst_184 = arith.constant dense<0.000000e+00> : vector<16x64xf32>
    %458 = tpu.matmul %455, %457, %cst_184 {dimension_numbers = #tpu.dot_dimension_numbers<[1], [0], [0], [1], [0, 0, 1, 1], [], []>} : vector<16x32xbf16>, vector<32x64xbf16>, vector<16x64xf32> -> vector<16x64xf32>
    %cst_185 = arith.constant 0.000000e+00 : f32
    %459 = vector.broadcast %cst_185 : f32 to vector<16x64xf32>
    %460 = arith.maximumf %458, %459 : vector<16x64xf32>
    %461 = arith.truncf %460 : vector<16x64xf32> to vector<16x64xbf16>
    %c1_186 = arith.constant 1 : index
    %c0_187 = arith.constant 0 : index
    %c0_188 = arith.constant 0 : index
    %462 = vector.load %arg19[%c1_186, %c0_187, %c0_188] : memref<2x64x32xbf16, #tpu.memory_space<vmem>>, vector<1x64x32xbf16>
    %463 = vector.shape_cast %462 : vector<1x64x32xbf16> to vector<64x32xbf16>
    %cst_189 = arith.constant dense<0.000000e+00> : vector<16x32xf32>
    %464 = tpu.matmul %461, %463, %cst_189 {dimension_numbers = #tpu.dot_dimension_numbers<[1], [0], [0], [1], [0, 0, 1, 1], [], []>} : vector<16x64xbf16>, vector<64x32xbf16>, vector<16x32xf32> -> vector<16x32xf32>
    %465 = arith.addf %464, %454 : vector<16x32xf32>
    %cst_190 = arith.constant dense<0.000000e+00> : vector<16xf32>
    %466 = vector.multi_reduction <add>, %465, %cst_190 [1] : vector<16x32xf32> to vector<16xf32>
    %467 = vector.shape_cast %466 : vector<16xf32> to vector<16x1xf32>
    %cst_191 = arith.constant 3.200000e+01 : f32
    %468 = vector.broadcast %cst_191 : f32 to vector<16x1xf32>
    %469 = arith.divf %467, %468 : vector<16x1xf32>
    %470 = vector.broadcast %469 : vector<16x1xf32> to vector<16x32xf32>
    %471 = arith.subf %465, %470 : vector<16x32xf32>
    %472 = arith.mulf %471, %471 : vector<16x32xf32>
    %cst_192 = arith.constant dense<0.000000e+00> : vector<16xf32>
    %473 = vector.multi_reduction <add>, %472, %cst_192 [1] : vector<16x32xf32> to vector<16xf32>
    %474 = vector.shape_cast %473 : vector<16xf32> to vector<16x1xf32>
    %cst_193 = arith.constant 3.200000e+01 : f32
    %475 = vector.broadcast %cst_193 : f32 to vector<16x1xf32>
    %476 = arith.divf %474, %475 : vector<16x1xf32>
    %477 = vector.broadcast %469 : vector<16x1xf32> to vector<16x32xf32>
    %478 = arith.subf %465, %477 : vector<16x32xf32>
    %cst_194 = arith.constant 9.99999974E-6 : f32
    %479 = vector.broadcast %cst_194 : f32 to vector<16x1xf32>
    %480 = arith.addf %476, %479 : vector<16x1xf32>
    %481 = math.rsqrt %480 : vector<16x1xf32>
    %482 = vector.broadcast %481 : vector<16x1xf32> to vector<16x32xf32>
    %483 = arith.mulf %478, %482 : vector<16x32xf32>
    %c1_195 = arith.constant 1 : index
    %c0_196 = arith.constant 0 : index
    %c0_197 = arith.constant 0 : index
    %484 = vector.load %arg20[%c1_195, %c0_196, %c0_197] : memref<2x1x32xf32, #tpu.memory_space<vmem>>, vector<1x1x32xf32>
    %485 = vector.shape_cast %484 : vector<1x1x32xf32> to vector<1x32xf32>
    %486 = vector.broadcast %485 : vector<1x32xf32> to vector<16x32xf32>
    %487 = arith.mulf %483, %486 : vector<16x32xf32>
    %c1_198 = arith.constant 1 : index
    %c0_199 = arith.constant 0 : index
    %c0_200 = arith.constant 0 : index
    %488 = vector.load %arg21[%c1_198, %c0_199, %c0_200] : memref<2x1x32xf32, #tpu.memory_space<vmem>>, vector<1x1x32xf32>
    %489 = vector.shape_cast %488 : vector<1x1x32xf32> to vector<1x32xf32>
    %490 = vector.broadcast %489 : vector<1x32xf32> to vector<16x32xf32>
    %491 = arith.addf %487, %490 : vector<16x32xf32>
    %492 = tpu.concatenate %245, %491 in 0 : vector<16x32xf32>, vector<16x32xf32> -> vector<32x32xf32>
    %c0_201 = arith.constant 0 : index
    %c0_202 = arith.constant 0 : index
    %493 = vector.load %arg5[%c0_201, %c0_202] : memref<32x32xf32, #tpu.memory_space<vmem>>, vector<32x32xf32>
    %494 = arith.addf %492, %493 : vector<32x32xf32>
    %c0_203 = arith.constant 0 : index
    %c0_204 = arith.constant 0 : index
    %495 = vector.load %arg4[%c0_203, %c0_204] : memref<32x32xf32, #tpu.memory_space<vmem>>, vector<32x32xf32>
    %496 = arith.truncf %494 : vector<32x32xf32> to vector<32x32xbf16>
    %c0_205 = arith.constant 0 : index
    %c0_206 = arith.constant 0 : index
    %c0_207 = arith.constant 0 : index
    %497 = vector.load %arg22[%c0_205, %c0_206, %c0_207] : memref<2x32x48xbf16, #tpu.memory_space<vmem>>, vector<1x32x48xbf16>
    %498 = vector.shape_cast %497 : vector<1x32x48xbf16> to vector<32x48xbf16>
    %cst_208 = arith.constant dense<0.000000e+00> : vector<32x48xf32>
    %499 = tpu.matmul %496, %498, %cst_208 {dimension_numbers = #tpu.dot_dimension_numbers<[1], [0], [0], [1], [0, 0, 1, 1], [], []>} : vector<32x32xbf16>, vector<32x48xbf16>, vector<32x48xf32> -> vector<32x48xf32>
    %500 = vector.extract_strided_slice %499 {offsets = [0, 0], sizes = [32, 16], strides = [1, 1]} : vector<32x48xf32> to vector<32x16xf32>
    %501 = vector.extract_strided_slice %499 {offsets = [0, 16], sizes = [32, 16], strides = [1, 1]} : vector<32x48xf32> to vector<32x16xf32>
    %502 = vector.extract_strided_slice %499 {offsets = [0, 32], sizes = [32, 16], strides = [1, 1]} : vector<32x48xf32> to vector<32x16xf32>
    %c0_209 = arith.constant 0 : index
    %c0_210 = arith.constant 0 : index
    %c0_211 = arith.constant 0 : index
    %503 = vector.load %arg23[%c0_209, %c0_210, %c0_211] : memref<2x16x32xbf16, #tpu.memory_space<vmem>>, vector<1x16x32xbf16>
    %504 = vector.shape_cast %503 : vector<1x16x32xbf16> to vector<16x32xbf16>
    %cst_212 = arith.constant 0.000000e+00 : f32
    %505 = vector.broadcast %cst_212 : f32 to vector<32x32xf32>
    %506 = vector.extract_strided_slice %500 {offsets = [0, 0], sizes = [32, 8], strides = [1, 1]} : vector<32x16xf32> to vector<32x8xf32>
    %507 = arith.truncf %506 : vector<32x8xf32> to vector<32x8xbf16>
    %508 = vector.extract_strided_slice %501 {offsets = [0, 0], sizes = [32, 8], strides = [1, 1]} : vector<32x16xf32> to vector<32x8xf32>
    %509 = arith.truncf %508 : vector<32x8xf32> to vector<32x8xbf16>
    %510 = vector.extract_strided_slice %502 {offsets = [0, 0], sizes = [32, 8], strides = [1, 1]} : vector<32x16xf32> to vector<32x8xf32>
    %511 = arith.truncf %510 : vector<32x8xf32> to vector<32x8xbf16>
    %cst_213 = arith.constant dense<0.000000e+00> : vector<32x32xf32>
    %512 = tpu.matmul %507, %509, %cst_213 {dimension_numbers = #tpu.dot_dimension_numbers<[1], [1], [0], [0], [0, 0, 1, 0], [], []>} : vector<32x8xbf16>, vector<32x8xbf16>, vector<32x32xf32> -> vector<32x32xf32>
    %513 = arith.addf %512, %495 : vector<32x32xf32>
    %cst_214 = arith.constant dense<0xFF800000> : vector<32xf32>
    %514 = vector.multi_reduction <maximumf>, %513, %cst_214 [1] : vector<32x32xf32> to vector<32xf32>
    %515 = vector.shape_cast %514 : vector<32xf32> to vector<32x1xf32>
    %516 = vector.broadcast %515 : vector<32x1xf32> to vector<32x32xf32>
    %517 = arith.subf %513, %516 : vector<32x32xf32>
    %518 = math.exp %517 : vector<32x32xf32>
    %cst_215 = arith.constant dense<0.000000e+00> : vector<32xf32>
    %519 = vector.multi_reduction <add>, %518, %cst_215 [1] : vector<32x32xf32> to vector<32xf32>
    %520 = vector.shape_cast %519 : vector<32xf32> to vector<32x1xf32>
    %521 = tpu.reciprocal %520 {approx = true} : vector<32x1xf32> -> vector<32x1xf32>
    %522 = vector.broadcast %521 : vector<32x1xf32> to vector<32x32xf32>
    %523 = arith.mulf %518, %522 : vector<32x32xf32>
    %524 = arith.truncf %523 : vector<32x32xf32> to vector<32x32xbf16>
    %cst_216 = arith.constant dense<0.000000e+00> : vector<32x8xf32>
    %525 = tpu.matmul %524, %511, %cst_216 {dimension_numbers = #tpu.dot_dimension_numbers<[1], [0], [0], [1], [0, 0, 1, 1], [], []>} : vector<32x32xbf16>, vector<32x8xbf16>, vector<32x8xf32> -> vector<32x8xf32>
    %526 = arith.truncf %525 : vector<32x8xf32> to vector<32x8xbf16>
    %527 = vector.extract_strided_slice %504 {offsets = [0, 0], sizes = [8, 32], strides = [1, 1]} : vector<16x32xbf16> to vector<8x32xbf16>
    %cst_217 = arith.constant dense<0.000000e+00> : vector<32x32xf32>
    %528 = tpu.matmul %526, %527, %cst_217 {dimension_numbers = #tpu.dot_dimension_numbers<[1], [0], [0], [1], [0, 0, 1, 1], [], []>} : vector<32x8xbf16>, vector<8x32xbf16>, vector<32x32xf32> -> vector<32x32xf32>
    %529 = arith.addf %505, %528 : vector<32x32xf32>
    %530 = vector.extract_strided_slice %500 {offsets = [0, 8], sizes = [32, 8], strides = [1, 1]} : vector<32x16xf32> to vector<32x8xf32>
    %531 = arith.truncf %530 : vector<32x8xf32> to vector<32x8xbf16>
    %532 = vector.extract_strided_slice %501 {offsets = [0, 8], sizes = [32, 8], strides = [1, 1]} : vector<32x16xf32> to vector<32x8xf32>
    %533 = arith.truncf %532 : vector<32x8xf32> to vector<32x8xbf16>
    %534 = vector.extract_strided_slice %502 {offsets = [0, 8], sizes = [32, 8], strides = [1, 1]} : vector<32x16xf32> to vector<32x8xf32>
    %535 = arith.truncf %534 : vector<32x8xf32> to vector<32x8xbf16>
    %cst_218 = arith.constant dense<0.000000e+00> : vector<32x32xf32>
    %536 = tpu.matmul %531, %533, %cst_218 {dimension_numbers = #tpu.dot_dimension_numbers<[1], [1], [0], [0], [0, 0, 1, 0], [], []>} : vector<32x8xbf16>, vector<32x8xbf16>, vector<32x32xf32> -> vector<32x32xf32>
    %537 = arith.addf %536, %495 : vector<32x32xf32>
    %cst_219 = arith.constant dense<0xFF800000> : vector<32xf32>
    %538 = vector.multi_reduction <maximumf>, %537, %cst_219 [1] : vector<32x32xf32> to vector<32xf32>
    %539 = vector.shape_cast %538 : vector<32xf32> to vector<32x1xf32>
    %540 = vector.broadcast %539 : vector<32x1xf32> to vector<32x32xf32>
    %541 = arith.subf %537, %540 : vector<32x32xf32>
    %542 = math.exp %541 : vector<32x32xf32>
    %cst_220 = arith.constant dense<0.000000e+00> : vector<32xf32>
    %543 = vector.multi_reduction <add>, %542, %cst_220 [1] : vector<32x32xf32> to vector<32xf32>
    %544 = vector.shape_cast %543 : vector<32xf32> to vector<32x1xf32>
    %545 = tpu.reciprocal %544 {approx = true} : vector<32x1xf32> -> vector<32x1xf32>
    %546 = vector.broadcast %545 : vector<32x1xf32> to vector<32x32xf32>
    %547 = arith.mulf %542, %546 : vector<32x32xf32>
    %548 = arith.truncf %547 : vector<32x32xf32> to vector<32x32xbf16>
    %cst_221 = arith.constant dense<0.000000e+00> : vector<32x8xf32>
    %549 = tpu.matmul %548, %535, %cst_221 {dimension_numbers = #tpu.dot_dimension_numbers<[1], [0], [0], [1], [0, 0, 1, 1], [], []>} : vector<32x32xbf16>, vector<32x8xbf16>, vector<32x8xf32> -> vector<32x8xf32>
    %550 = arith.truncf %549 : vector<32x8xf32> to vector<32x8xbf16>
    %551 = vector.extract_strided_slice %504 {offsets = [8, 0], sizes = [8, 32], strides = [1, 1]} : vector<16x32xbf16> to vector<8x32xbf16>
    %cst_222 = arith.constant dense<0.000000e+00> : vector<32x32xf32>
    %552 = tpu.matmul %550, %551, %cst_222 {dimension_numbers = #tpu.dot_dimension_numbers<[1], [0], [0], [1], [0, 0, 1, 1], [], []>} : vector<32x8xbf16>, vector<8x32xbf16>, vector<32x32xf32> -> vector<32x32xf32>
    %553 = arith.addf %529, %552 : vector<32x32xf32>
    %554 = arith.addf %553, %494 : vector<32x32xf32>
    %cst_223 = arith.constant dense<0.000000e+00> : vector<32xf32>
    %555 = vector.multi_reduction <add>, %554, %cst_223 [1] : vector<32x32xf32> to vector<32xf32>
    %556 = vector.shape_cast %555 : vector<32xf32> to vector<32x1xf32>
    %cst_224 = arith.constant 3.200000e+01 : f32
    %557 = vector.broadcast %cst_224 : f32 to vector<32x1xf32>
    %558 = arith.divf %556, %557 : vector<32x1xf32>
    %559 = vector.broadcast %558 : vector<32x1xf32> to vector<32x32xf32>
    %560 = arith.subf %554, %559 : vector<32x32xf32>
    %561 = arith.mulf %560, %560 : vector<32x32xf32>
    %cst_225 = arith.constant dense<0.000000e+00> : vector<32xf32>
    %562 = vector.multi_reduction <add>, %561, %cst_225 [1] : vector<32x32xf32> to vector<32xf32>
    %563 = vector.shape_cast %562 : vector<32xf32> to vector<32x1xf32>
    %cst_226 = arith.constant 3.200000e+01 : f32
    %564 = vector.broadcast %cst_226 : f32 to vector<32x1xf32>
    %565 = arith.divf %563, %564 : vector<32x1xf32>
    %566 = vector.broadcast %558 : vector<32x1xf32> to vector<32x32xf32>
    %567 = arith.subf %554, %566 : vector<32x32xf32>
    %cst_227 = arith.constant 9.99999974E-6 : f32
    %568 = vector.broadcast %cst_227 : f32 to vector<32x1xf32>
    %569 = arith.addf %565, %568 : vector<32x1xf32>
    %570 = math.rsqrt %569 : vector<32x1xf32>
    %571 = vector.broadcast %570 : vector<32x1xf32> to vector<32x32xf32>
    %572 = arith.mulf %567, %571 : vector<32x32xf32>
    %c0_228 = arith.constant 0 : index
    %c0_229 = arith.constant 0 : index
    %c0_230 = arith.constant 0 : index
    %573 = vector.load %arg24[%c0_228, %c0_229, %c0_230] : memref<2x1x32xf32, #tpu.memory_space<vmem>>, vector<1x1x32xf32>
    %574 = vector.shape_cast %573 : vector<1x1x32xf32> to vector<1x32xf32>
    %575 = vector.broadcast %574 : vector<1x32xf32> to vector<32x32xf32>
    %576 = arith.mulf %572, %575 : vector<32x32xf32>
    %c0_231 = arith.constant 0 : index
    %c0_232 = arith.constant 0 : index
    %c0_233 = arith.constant 0 : index
    %577 = vector.load %arg25[%c0_231, %c0_232, %c0_233] : memref<2x1x32xf32, #tpu.memory_space<vmem>>, vector<1x1x32xf32>
    %578 = vector.shape_cast %577 : vector<1x1x32xf32> to vector<1x32xf32>
    %579 = vector.broadcast %578 : vector<1x32xf32> to vector<32x32xf32>
    %580 = arith.addf %576, %579 : vector<32x32xf32>
    %581 = arith.truncf %580 : vector<32x32xf32> to vector<32x32xbf16>
    %c0_234 = arith.constant 0 : index
    %c0_235 = arith.constant 0 : index
    %c0_236 = arith.constant 0 : index
    %582 = vector.load %arg26[%c0_234, %c0_235, %c0_236] : memref<2x32x64xbf16, #tpu.memory_space<vmem>>, vector<1x32x64xbf16>
    %583 = vector.shape_cast %582 : vector<1x32x64xbf16> to vector<32x64xbf16>
    %cst_237 = arith.constant dense<0.000000e+00> : vector<32x64xf32>
    %584 = tpu.matmul %581, %583, %cst_237 {dimension_numbers = #tpu.dot_dimension_numbers<[1], [0], [0], [1], [0, 0, 1, 1], [], []>} : vector<32x32xbf16>, vector<32x64xbf16>, vector<32x64xf32> -> vector<32x64xf32>
    %cst_238 = arith.constant 0.000000e+00 : f32
    %585 = vector.broadcast %cst_238 : f32 to vector<32x64xf32>
    %586 = arith.maximumf %584, %585 : vector<32x64xf32>
    %587 = arith.truncf %586 : vector<32x64xf32> to vector<32x64xbf16>
    %c0_239 = arith.constant 0 : index
    %c0_240 = arith.constant 0 : index
    %c0_241 = arith.constant 0 : index
    %588 = vector.load %arg27[%c0_239, %c0_240, %c0_241] : memref<2x64x32xbf16, #tpu.memory_space<vmem>>, vector<1x64x32xbf16>
    %589 = vector.shape_cast %588 : vector<1x64x32xbf16> to vector<64x32xbf16>
    %cst_242 = arith.constant dense<0.000000e+00> : vector<32x32xf32>
    %590 = tpu.matmul %587, %589, %cst_242 {dimension_numbers = #tpu.dot_dimension_numbers<[1], [0], [0], [1], [0, 0, 1, 1], [], []>} : vector<32x64xbf16>, vector<64x32xbf16>, vector<32x32xf32> -> vector<32x32xf32>
    %591 = arith.addf %590, %580 : vector<32x32xf32>
    %cst_243 = arith.constant dense<0.000000e+00> : vector<32xf32>
    %592 = vector.multi_reduction <add>, %591, %cst_243 [1] : vector<32x32xf32> to vector<32xf32>
    %593 = vector.shape_cast %592 : vector<32xf32> to vector<32x1xf32>
    %cst_244 = arith.constant 3.200000e+01 : f32
    %594 = vector.broadcast %cst_244 : f32 to vector<32x1xf32>
    %595 = arith.divf %593, %594 : vector<32x1xf32>
    %596 = vector.broadcast %595 : vector<32x1xf32> to vector<32x32xf32>
    %597 = arith.subf %591, %596 : vector<32x32xf32>
    %598 = arith.mulf %597, %597 : vector<32x32xf32>
    %cst_245 = arith.constant dense<0.000000e+00> : vector<32xf32>
    %599 = vector.multi_reduction <add>, %598, %cst_245 [1] : vector<32x32xf32> to vector<32xf32>
    %600 = vector.shape_cast %599 : vector<32xf32> to vector<32x1xf32>
    %cst_246 = arith.constant 3.200000e+01 : f32
    %601 = vector.broadcast %cst_246 : f32 to vector<32x1xf32>
    %602 = arith.divf %600, %601 : vector<32x1xf32>
    %603 = vector.broadcast %595 : vector<32x1xf32> to vector<32x32xf32>
    %604 = arith.subf %591, %603 : vector<32x32xf32>
    %cst_247 = arith.constant 9.99999974E-6 : f32
    %605 = vector.broadcast %cst_247 : f32 to vector<32x1xf32>
    %606 = arith.addf %602, %605 : vector<32x1xf32>
    %607 = math.rsqrt %606 : vector<32x1xf32>
    %608 = vector.broadcast %607 : vector<32x1xf32> to vector<32x32xf32>
    %609 = arith.mulf %604, %608 : vector<32x32xf32>
    %c0_248 = arith.constant 0 : index
    %c0_249 = arith.constant 0 : index
    %c0_250 = arith.constant 0 : index
    %610 = vector.load %arg28[%c0_248, %c0_249, %c0_250] : memref<2x1x32xf32, #tpu.memory_space<vmem>>, vector<1x1x32xf32>
    %611 = vector.shape_cast %610 : vector<1x1x32xf32> to vector<1x32xf32>
    %612 = vector.broadcast %611 : vector<1x32xf32> to vector<32x32xf32>
    %613 = arith.mulf %609, %612 : vector<32x32xf32>
    %c0_251 = arith.constant 0 : index
    %c0_252 = arith.constant 0 : index
    %c0_253 = arith.constant 0 : index
    %614 = vector.load %arg29[%c0_251, %c0_252, %c0_253] : memref<2x1x32xf32, #tpu.memory_space<vmem>>, vector<1x1x32xf32>
    %615 = vector.shape_cast %614 : vector<1x1x32xf32> to vector<1x32xf32>
    %616 = vector.broadcast %615 : vector<1x32xf32> to vector<32x32xf32>
    %617 = arith.addf %613, %616 : vector<32x32xf32>
    %618 = arith.truncf %617 : vector<32x32xf32> to vector<32x32xbf16>
    %c1_254 = arith.constant 1 : index
    %c0_255 = arith.constant 0 : index
    %c0_256 = arith.constant 0 : index
    %619 = vector.load %arg22[%c1_254, %c0_255, %c0_256] : memref<2x32x48xbf16, #tpu.memory_space<vmem>>, vector<1x32x48xbf16>
    %620 = vector.shape_cast %619 : vector<1x32x48xbf16> to vector<32x48xbf16>
    %cst_257 = arith.constant dense<0.000000e+00> : vector<32x48xf32>
    %621 = tpu.matmul %618, %620, %cst_257 {dimension_numbers = #tpu.dot_dimension_numbers<[1], [0], [0], [1], [0, 0, 1, 1], [], []>} : vector<32x32xbf16>, vector<32x48xbf16>, vector<32x48xf32> -> vector<32x48xf32>
    %622 = vector.extract_strided_slice %621 {offsets = [0, 0], sizes = [32, 16], strides = [1, 1]} : vector<32x48xf32> to vector<32x16xf32>
    %623 = vector.extract_strided_slice %621 {offsets = [0, 16], sizes = [32, 16], strides = [1, 1]} : vector<32x48xf32> to vector<32x16xf32>
    %624 = vector.extract_strided_slice %621 {offsets = [0, 32], sizes = [32, 16], strides = [1, 1]} : vector<32x48xf32> to vector<32x16xf32>
    %c1_258 = arith.constant 1 : index
    %c0_259 = arith.constant 0 : index
    %c0_260 = arith.constant 0 : index
    %625 = vector.load %arg23[%c1_258, %c0_259, %c0_260] : memref<2x16x32xbf16, #tpu.memory_space<vmem>>, vector<1x16x32xbf16>
    %626 = vector.shape_cast %625 : vector<1x16x32xbf16> to vector<16x32xbf16>
    %cst_261 = arith.constant 0.000000e+00 : f32
    %627 = vector.broadcast %cst_261 : f32 to vector<32x32xf32>
    %628 = vector.extract_strided_slice %622 {offsets = [0, 0], sizes = [32, 8], strides = [1, 1]} : vector<32x16xf32> to vector<32x8xf32>
    %629 = arith.truncf %628 : vector<32x8xf32> to vector<32x8xbf16>
    %630 = vector.extract_strided_slice %623 {offsets = [0, 0], sizes = [32, 8], strides = [1, 1]} : vector<32x16xf32> to vector<32x8xf32>
    %631 = arith.truncf %630 : vector<32x8xf32> to vector<32x8xbf16>
    %632 = vector.extract_strided_slice %624 {offsets = [0, 0], sizes = [32, 8], strides = [1, 1]} : vector<32x16xf32> to vector<32x8xf32>
    %633 = arith.truncf %632 : vector<32x8xf32> to vector<32x8xbf16>
    %cst_262 = arith.constant dense<0.000000e+00> : vector<32x32xf32>
    %634 = tpu.matmul %629, %631, %cst_262 {dimension_numbers = #tpu.dot_dimension_numbers<[1], [1], [0], [0], [0, 0, 1, 0], [], []>} : vector<32x8xbf16>, vector<32x8xbf16>, vector<32x32xf32> -> vector<32x32xf32>
    %635 = arith.addf %634, %495 : vector<32x32xf32>
    %cst_263 = arith.constant dense<0xFF800000> : vector<32xf32>
    %636 = vector.multi_reduction <maximumf>, %635, %cst_263 [1] : vector<32x32xf32> to vector<32xf32>
    %637 = vector.shape_cast %636 : vector<32xf32> to vector<32x1xf32>
    %638 = vector.broadcast %637 : vector<32x1xf32> to vector<32x32xf32>
    %639 = arith.subf %635, %638 : vector<32x32xf32>
    %640 = math.exp %639 : vector<32x32xf32>
    %cst_264 = arith.constant dense<0.000000e+00> : vector<32xf32>
    %641 = vector.multi_reduction <add>, %640, %cst_264 [1] : vector<32x32xf32> to vector<32xf32>
    %642 = vector.shape_cast %641 : vector<32xf32> to vector<32x1xf32>
    %643 = tpu.reciprocal %642 {approx = true} : vector<32x1xf32> -> vector<32x1xf32>
    %644 = vector.broadcast %643 : vector<32x1xf32> to vector<32x32xf32>
    %645 = arith.mulf %640, %644 : vector<32x32xf32>
    %646 = arith.truncf %645 : vector<32x32xf32> to vector<32x32xbf16>
    %cst_265 = arith.constant dense<0.000000e+00> : vector<32x8xf32>
    %647 = tpu.matmul %646, %633, %cst_265 {dimension_numbers = #tpu.dot_dimension_numbers<[1], [0], [0], [1], [0, 0, 1, 1], [], []>} : vector<32x32xbf16>, vector<32x8xbf16>, vector<32x8xf32> -> vector<32x8xf32>
    %648 = arith.truncf %647 : vector<32x8xf32> to vector<32x8xbf16>
    %649 = vector.extract_strided_slice %626 {offsets = [0, 0], sizes = [8, 32], strides = [1, 1]} : vector<16x32xbf16> to vector<8x32xbf16>
    %cst_266 = arith.constant dense<0.000000e+00> : vector<32x32xf32>
    %650 = tpu.matmul %648, %649, %cst_266 {dimension_numbers = #tpu.dot_dimension_numbers<[1], [0], [0], [1], [0, 0, 1, 1], [], []>} : vector<32x8xbf16>, vector<8x32xbf16>, vector<32x32xf32> -> vector<32x32xf32>
    %651 = arith.addf %627, %650 : vector<32x32xf32>
    %652 = vector.extract_strided_slice %622 {offsets = [0, 8], sizes = [32, 8], strides = [1, 1]} : vector<32x16xf32> to vector<32x8xf32>
    %653 = arith.truncf %652 : vector<32x8xf32> to vector<32x8xbf16>
    %654 = vector.extract_strided_slice %623 {offsets = [0, 8], sizes = [32, 8], strides = [1, 1]} : vector<32x16xf32> to vector<32x8xf32>
    %655 = arith.truncf %654 : vector<32x8xf32> to vector<32x8xbf16>
    %656 = vector.extract_strided_slice %624 {offsets = [0, 8], sizes = [32, 8], strides = [1, 1]} : vector<32x16xf32> to vector<32x8xf32>
    %657 = arith.truncf %656 : vector<32x8xf32> to vector<32x8xbf16>
    %cst_267 = arith.constant dense<0.000000e+00> : vector<32x32xf32>
    %658 = tpu.matmul %653, %655, %cst_267 {dimension_numbers = #tpu.dot_dimension_numbers<[1], [1], [0], [0], [0, 0, 1, 0], [], []>} : vector<32x8xbf16>, vector<32x8xbf16>, vector<32x32xf32> -> vector<32x32xf32>
    %659 = arith.addf %658, %495 : vector<32x32xf32>
    %cst_268 = arith.constant dense<0xFF800000> : vector<32xf32>
    %660 = vector.multi_reduction <maximumf>, %659, %cst_268 [1] : vector<32x32xf32> to vector<32xf32>
    %661 = vector.shape_cast %660 : vector<32xf32> to vector<32x1xf32>
    %662 = vector.broadcast %661 : vector<32x1xf32> to vector<32x32xf32>
    %663 = arith.subf %659, %662 : vector<32x32xf32>
    %664 = math.exp %663 : vector<32x32xf32>
    %cst_269 = arith.constant dense<0.000000e+00> : vector<32xf32>
    %665 = vector.multi_reduction <add>, %664, %cst_269 [1] : vector<32x32xf32> to vector<32xf32>
    %666 = vector.shape_cast %665 : vector<32xf32> to vector<32x1xf32>
    %667 = tpu.reciprocal %666 {approx = true} : vector<32x1xf32> -> vector<32x1xf32>
    %668 = vector.broadcast %667 : vector<32x1xf32> to vector<32x32xf32>
    %669 = arith.mulf %664, %668 : vector<32x32xf32>
    %670 = arith.truncf %669 : vector<32x32xf32> to vector<32x32xbf16>
    %cst_270 = arith.constant dense<0.000000e+00> : vector<32x8xf32>
    %671 = tpu.matmul %670, %657, %cst_270 {dimension_numbers = #tpu.dot_dimension_numbers<[1], [0], [0], [1], [0, 0, 1, 1], [], []>} : vector<32x32xbf16>, vector<32x8xbf16>, vector<32x8xf32> -> vector<32x8xf32>
    %672 = arith.truncf %671 : vector<32x8xf32> to vector<32x8xbf16>
    %673 = vector.extract_strided_slice %626 {offsets = [8, 0], sizes = [8, 32], strides = [1, 1]} : vector<16x32xbf16> to vector<8x32xbf16>
    %cst_271 = arith.constant dense<0.000000e+00> : vector<32x32xf32>
    %674 = tpu.matmul %672, %673, %cst_271 {dimension_numbers = #tpu.dot_dimension_numbers<[1], [0], [0], [1], [0, 0, 1, 1], [], []>} : vector<32x8xbf16>, vector<8x32xbf16>, vector<32x32xf32> -> vector<32x32xf32>
    %675 = arith.addf %651, %674 : vector<32x32xf32>
    %676 = arith.addf %675, %617 : vector<32x32xf32>
    %cst_272 = arith.constant dense<0.000000e+00> : vector<32xf32>
    %677 = vector.multi_reduction <add>, %676, %cst_272 [1] : vector<32x32xf32> to vector<32xf32>
    %678 = vector.shape_cast %677 : vector<32xf32> to vector<32x1xf32>
    %cst_273 = arith.constant 3.200000e+01 : f32
    %679 = vector.broadcast %cst_273 : f32 to vector<32x1xf32>
    %680 = arith.divf %678, %679 : vector<32x1xf32>
    %681 = vector.broadcast %680 : vector<32x1xf32> to vector<32x32xf32>
    %682 = arith.subf %676, %681 : vector<32x32xf32>
    %683 = arith.mulf %682, %682 : vector<32x32xf32>
    %cst_274 = arith.constant dense<0.000000e+00> : vector<32xf32>
    %684 = vector.multi_reduction <add>, %683, %cst_274 [1] : vector<32x32xf32> to vector<32xf32>
    %685 = vector.shape_cast %684 : vector<32xf32> to vector<32x1xf32>
    %cst_275 = arith.constant 3.200000e+01 : f32
    %686 = vector.broadcast %cst_275 : f32 to vector<32x1xf32>
    %687 = arith.divf %685, %686 : vector<32x1xf32>
    %688 = vector.broadcast %680 : vector<32x1xf32> to vector<32x32xf32>
    %689 = arith.subf %676, %688 : vector<32x32xf32>
    %cst_276 = arith.constant 9.99999974E-6 : f32
    %690 = vector.broadcast %cst_276 : f32 to vector<32x1xf32>
    %691 = arith.addf %687, %690 : vector<32x1xf32>
    %692 = math.rsqrt %691 : vector<32x1xf32>
    %693 = vector.broadcast %692 : vector<32x1xf32> to vector<32x32xf32>
    %694 = arith.mulf %689, %693 : vector<32x32xf32>
    %c1_277 = arith.constant 1 : index
    %c0_278 = arith.constant 0 : index
    %c0_279 = arith.constant 0 : index
    %695 = vector.load %arg24[%c1_277, %c0_278, %c0_279] : memref<2x1x32xf32, #tpu.memory_space<vmem>>, vector<1x1x32xf32>
    %696 = vector.shape_cast %695 : vector<1x1x32xf32> to vector<1x32xf32>
    %697 = vector.broadcast %696 : vector<1x32xf32> to vector<32x32xf32>
    %698 = arith.mulf %694, %697 : vector<32x32xf32>
    %c1_280 = arith.constant 1 : index
    %c0_281 = arith.constant 0 : index
    %c0_282 = arith.constant 0 : index
    %699 = vector.load %arg25[%c1_280, %c0_281, %c0_282] : memref<2x1x32xf32, #tpu.memory_space<vmem>>, vector<1x1x32xf32>
    %700 = vector.shape_cast %699 : vector<1x1x32xf32> to vector<1x32xf32>
    %701 = vector.broadcast %700 : vector<1x32xf32> to vector<32x32xf32>
    %702 = arith.addf %698, %701 : vector<32x32xf32>
    %703 = arith.truncf %702 : vector<32x32xf32> to vector<32x32xbf16>
    %c1_283 = arith.constant 1 : index
    %c0_284 = arith.constant 0 : index
    %c0_285 = arith.constant 0 : index
    %704 = vector.load %arg26[%c1_283, %c0_284, %c0_285] : memref<2x32x64xbf16, #tpu.memory_space<vmem>>, vector<1x32x64xbf16>
    %705 = vector.shape_cast %704 : vector<1x32x64xbf16> to vector<32x64xbf16>
    %cst_286 = arith.constant dense<0.000000e+00> : vector<32x64xf32>
    %706 = tpu.matmul %703, %705, %cst_286 {dimension_numbers = #tpu.dot_dimension_numbers<[1], [0], [0], [1], [0, 0, 1, 1], [], []>} : vector<32x32xbf16>, vector<32x64xbf16>, vector<32x64xf32> -> vector<32x64xf32>
    %cst_287 = arith.constant 0.000000e+00 : f32
    %707 = vector.broadcast %cst_287 : f32 to vector<32x64xf32>
    %708 = arith.maximumf %706, %707 : vector<32x64xf32>
    %709 = arith.truncf %708 : vector<32x64xf32> to vector<32x64xbf16>
    %c1_288 = arith.constant 1 : index
    %c0_289 = arith.constant 0 : index
    %c0_290 = arith.constant 0 : index
    %710 = vector.load %arg27[%c1_288, %c0_289, %c0_290] : memref<2x64x32xbf16, #tpu.memory_space<vmem>>, vector<1x64x32xbf16>
    %711 = vector.shape_cast %710 : vector<1x64x32xbf16> to vector<64x32xbf16>
    %cst_291 = arith.constant dense<0.000000e+00> : vector<32x32xf32>
    %712 = tpu.matmul %709, %711, %cst_291 {dimension_numbers = #tpu.dot_dimension_numbers<[1], [0], [0], [1], [0, 0, 1, 1], [], []>} : vector<32x64xbf16>, vector<64x32xbf16>, vector<32x32xf32> -> vector<32x32xf32>
    %713 = arith.addf %712, %702 : vector<32x32xf32>
    %cst_292 = arith.constant dense<0.000000e+00> : vector<32xf32>
    %714 = vector.multi_reduction <add>, %713, %cst_292 [1] : vector<32x32xf32> to vector<32xf32>
    %715 = vector.shape_cast %714 : vector<32xf32> to vector<32x1xf32>
    %cst_293 = arith.constant 3.200000e+01 : f32
    %716 = vector.broadcast %cst_293 : f32 to vector<32x1xf32>
    %717 = arith.divf %715, %716 : vector<32x1xf32>
    %718 = vector.broadcast %717 : vector<32x1xf32> to vector<32x32xf32>
    %719 = arith.subf %713, %718 : vector<32x32xf32>
    %720 = arith.mulf %719, %719 : vector<32x32xf32>
    %cst_294 = arith.constant dense<0.000000e+00> : vector<32xf32>
    %721 = vector.multi_reduction <add>, %720, %cst_294 [1] : vector<32x32xf32> to vector<32xf32>
    %722 = vector.shape_cast %721 : vector<32xf32> to vector<32x1xf32>
    %cst_295 = arith.constant 3.200000e+01 : f32
    %723 = vector.broadcast %cst_295 : f32 to vector<32x1xf32>
    %724 = arith.divf %722, %723 : vector<32x1xf32>
    %725 = vector.broadcast %717 : vector<32x1xf32> to vector<32x32xf32>
    %726 = arith.subf %713, %725 : vector<32x32xf32>
    %cst_296 = arith.constant 9.99999974E-6 : f32
    %727 = vector.broadcast %cst_296 : f32 to vector<32x1xf32>
    %728 = arith.addf %724, %727 : vector<32x1xf32>
    %729 = math.rsqrt %728 : vector<32x1xf32>
    %730 = vector.broadcast %729 : vector<32x1xf32> to vector<32x32xf32>
    %731 = arith.mulf %726, %730 : vector<32x32xf32>
    %c1_297 = arith.constant 1 : index
    %c0_298 = arith.constant 0 : index
    %c0_299 = arith.constant 0 : index
    %732 = vector.load %arg28[%c1_297, %c0_298, %c0_299] : memref<2x1x32xf32, #tpu.memory_space<vmem>>, vector<1x1x32xf32>
    %733 = vector.shape_cast %732 : vector<1x1x32xf32> to vector<1x32xf32>
    %734 = vector.broadcast %733 : vector<1x32xf32> to vector<32x32xf32>
    %735 = arith.mulf %731, %734 : vector<32x32xf32>
    %c1_300 = arith.constant 1 : index
    %c0_301 = arith.constant 0 : index
    %c0_302 = arith.constant 0 : index
    %736 = vector.load %arg29[%c1_300, %c0_301, %c0_302] : memref<2x1x32xf32, #tpu.memory_space<vmem>>, vector<1x1x32xf32>
    %737 = vector.shape_cast %736 : vector<1x1x32xf32> to vector<1x32xf32>
    %738 = vector.broadcast %737 : vector<1x32xf32> to vector<32x32xf32>
    %739 = arith.addf %735, %738 : vector<32x32xf32>
    %cst_303 = arith.constant 0.000000e+00 : f32
    %740 = vector.broadcast %cst_303 : f32 to vector<2x256xf32>
    %741 = vector.extract_strided_slice %739 {offsets = [0, 0], sizes = [2, 32], strides = [1, 1]} : vector<32x32xf32> to vector<2x32xf32>
    %742 = arith.truncf %741 : vector<2x32xf32> to vector<2x32xbf16>
    %c0_304 = arith.constant 0 : index
    %c0_305 = arith.constant 0 : index
    %c0_306 = arith.constant 0 : index
    %743 = vector.load %arg30[%c0_304, %c0_305, %c0_306] : memref<16x32x256xbf16, #tpu.memory_space<vmem>>, vector<1x32x256xbf16>
    %744 = vector.shape_cast %743 : vector<1x32x256xbf16> to vector<32x256xbf16>
    %cst_307 = arith.constant dense<0.000000e+00> : vector<2x256xf32>
    %745 = tpu.matmul %742, %744, %cst_307 {dimension_numbers = #tpu.dot_dimension_numbers<[1], [0], [0], [1], [0, 0, 1, 1], [], []>} : vector<2x32xbf16>, vector<32x256xbf16>, vector<2x256xf32> -> vector<2x256xf32>
    %746 = arith.addf %740, %745 : vector<2x256xf32>
    %747 = vector.extract_strided_slice %739 {offsets = [2, 0], sizes = [2, 32], strides = [1, 1]} : vector<32x32xf32> to vector<2x32xf32>
    %748 = arith.truncf %747 : vector<2x32xf32> to vector<2x32xbf16>
    %c1_308 = arith.constant 1 : index
    %c0_309 = arith.constant 0 : index
    %c0_310 = arith.constant 0 : index
    %749 = vector.load %arg30[%c1_308, %c0_309, %c0_310] : memref<16x32x256xbf16, #tpu.memory_space<vmem>>, vector<1x32x256xbf16>
    %750 = vector.shape_cast %749 : vector<1x32x256xbf16> to vector<32x256xbf16>
    %cst_311 = arith.constant dense<0.000000e+00> : vector<2x256xf32>
    %751 = tpu.matmul %748, %750, %cst_311 {dimension_numbers = #tpu.dot_dimension_numbers<[1], [0], [0], [1], [0, 0, 1, 1], [], []>} : vector<2x32xbf16>, vector<32x256xbf16>, vector<2x256xf32> -> vector<2x256xf32>
    %752 = arith.addf %746, %751 : vector<2x256xf32>
    %753 = vector.extract_strided_slice %739 {offsets = [4, 0], sizes = [2, 32], strides = [1, 1]} : vector<32x32xf32> to vector<2x32xf32>
    %754 = arith.truncf %753 : vector<2x32xf32> to vector<2x32xbf16>
    %c2 = arith.constant 2 : index
    %c0_312 = arith.constant 0 : index
    %c0_313 = arith.constant 0 : index
    %755 = vector.load %arg30[%c2, %c0_312, %c0_313] : memref<16x32x256xbf16, #tpu.memory_space<vmem>>, vector<1x32x256xbf16>
    %756 = vector.shape_cast %755 : vector<1x32x256xbf16> to vector<32x256xbf16>
    %cst_314 = arith.constant dense<0.000000e+00> : vector<2x256xf32>
    %757 = tpu.matmul %754, %756, %cst_314 {dimension_numbers = #tpu.dot_dimension_numbers<[1], [0], [0], [1], [0, 0, 1, 1], [], []>} : vector<2x32xbf16>, vector<32x256xbf16>, vector<2x256xf32> -> vector<2x256xf32>
    %758 = arith.addf %752, %757 : vector<2x256xf32>
    %759 = vector.extract_strided_slice %739 {offsets = [6, 0], sizes = [2, 32], strides = [1, 1]} : vector<32x32xf32> to vector<2x32xf32>
    %760 = arith.truncf %759 : vector<2x32xf32> to vector<2x32xbf16>
    %c3 = arith.constant 3 : index
    %c0_315 = arith.constant 0 : index
    %c0_316 = arith.constant 0 : index
    %761 = vector.load %arg30[%c3, %c0_315, %c0_316] : memref<16x32x256xbf16, #tpu.memory_space<vmem>>, vector<1x32x256xbf16>
    %762 = vector.shape_cast %761 : vector<1x32x256xbf16> to vector<32x256xbf16>
    %cst_317 = arith.constant dense<0.000000e+00> : vector<2x256xf32>
    %763 = tpu.matmul %760, %762, %cst_317 {dimension_numbers = #tpu.dot_dimension_numbers<[1], [0], [0], [1], [0, 0, 1, 1], [], []>} : vector<2x32xbf16>, vector<32x256xbf16>, vector<2x256xf32> -> vector<2x256xf32>
    %764 = arith.addf %758, %763 : vector<2x256xf32>
    %765 = vector.extract_strided_slice %739 {offsets = [8, 0], sizes = [2, 32], strides = [1, 1]} : vector<32x32xf32> to vector<2x32xf32>
    %766 = arith.truncf %765 : vector<2x32xf32> to vector<2x32xbf16>
    %c4 = arith.constant 4 : index
    %c0_318 = arith.constant 0 : index
    %c0_319 = arith.constant 0 : index
    %767 = vector.load %arg30[%c4, %c0_318, %c0_319] : memref<16x32x256xbf16, #tpu.memory_space<vmem>>, vector<1x32x256xbf16>
    %768 = vector.shape_cast %767 : vector<1x32x256xbf16> to vector<32x256xbf16>
    %cst_320 = arith.constant dense<0.000000e+00> : vector<2x256xf32>
    %769 = tpu.matmul %766, %768, %cst_320 {dimension_numbers = #tpu.dot_dimension_numbers<[1], [0], [0], [1], [0, 0, 1, 1], [], []>} : vector<2x32xbf16>, vector<32x256xbf16>, vector<2x256xf32> -> vector<2x256xf32>
    %770 = arith.addf %764, %769 : vector<2x256xf32>
    %771 = vector.extract_strided_slice %739 {offsets = [10, 0], sizes = [2, 32], strides = [1, 1]} : vector<32x32xf32> to vector<2x32xf32>
    %772 = arith.truncf %771 : vector<2x32xf32> to vector<2x32xbf16>
    %c5 = arith.constant 5 : index
    %c0_321 = arith.constant 0 : index
    %c0_322 = arith.constant 0 : index
    %773 = vector.load %arg30[%c5, %c0_321, %c0_322] : memref<16x32x256xbf16, #tpu.memory_space<vmem>>, vector<1x32x256xbf16>
    %774 = vector.shape_cast %773 : vector<1x32x256xbf16> to vector<32x256xbf16>
    %cst_323 = arith.constant dense<0.000000e+00> : vector<2x256xf32>
    %775 = tpu.matmul %772, %774, %cst_323 {dimension_numbers = #tpu.dot_dimension_numbers<[1], [0], [0], [1], [0, 0, 1, 1], [], []>} : vector<2x32xbf16>, vector<32x256xbf16>, vector<2x256xf32> -> vector<2x256xf32>
    %776 = arith.addf %770, %775 : vector<2x256xf32>
    %777 = vector.extract_strided_slice %739 {offsets = [12, 0], sizes = [2, 32], strides = [1, 1]} : vector<32x32xf32> to vector<2x32xf32>
    %778 = arith.truncf %777 : vector<2x32xf32> to vector<2x32xbf16>
    %c6 = arith.constant 6 : index
    %c0_324 = arith.constant 0 : index
    %c0_325 = arith.constant 0 : index
    %779 = vector.load %arg30[%c6, %c0_324, %c0_325] : memref<16x32x256xbf16, #tpu.memory_space<vmem>>, vector<1x32x256xbf16>
    %780 = vector.shape_cast %779 : vector<1x32x256xbf16> to vector<32x256xbf16>
    %cst_326 = arith.constant dense<0.000000e+00> : vector<2x256xf32>
    %781 = tpu.matmul %778, %780, %cst_326 {dimension_numbers = #tpu.dot_dimension_numbers<[1], [0], [0], [1], [0, 0, 1, 1], [], []>} : vector<2x32xbf16>, vector<32x256xbf16>, vector<2x256xf32> -> vector<2x256xf32>
    %782 = arith.addf %776, %781 : vector<2x256xf32>
    %783 = vector.extract_strided_slice %739 {offsets = [14, 0], sizes = [2, 32], strides = [1, 1]} : vector<32x32xf32> to vector<2x32xf32>
    %784 = arith.truncf %783 : vector<2x32xf32> to vector<2x32xbf16>
    %c7 = arith.constant 7 : index
    %c0_327 = arith.constant 0 : index
    %c0_328 = arith.constant 0 : index
    %785 = vector.load %arg30[%c7, %c0_327, %c0_328] : memref<16x32x256xbf16, #tpu.memory_space<vmem>>, vector<1x32x256xbf16>
    %786 = vector.shape_cast %785 : vector<1x32x256xbf16> to vector<32x256xbf16>
    %cst_329 = arith.constant dense<0.000000e+00> : vector<2x256xf32>
    %787 = tpu.matmul %784, %786, %cst_329 {dimension_numbers = #tpu.dot_dimension_numbers<[1], [0], [0], [1], [0, 0, 1, 1], [], []>} : vector<2x32xbf16>, vector<32x256xbf16>, vector<2x256xf32> -> vector<2x256xf32>
    %788 = arith.addf %782, %787 : vector<2x256xf32>
    %789 = vector.extract_strided_slice %739 {offsets = [16, 0], sizes = [2, 32], strides = [1, 1]} : vector<32x32xf32> to vector<2x32xf32>
    %790 = arith.truncf %789 : vector<2x32xf32> to vector<2x32xbf16>
    %c8 = arith.constant 8 : index
    %c0_330 = arith.constant 0 : index
    %c0_331 = arith.constant 0 : index
    %791 = vector.load %arg30[%c8, %c0_330, %c0_331] : memref<16x32x256xbf16, #tpu.memory_space<vmem>>, vector<1x32x256xbf16>
    %792 = vector.shape_cast %791 : vector<1x32x256xbf16> to vector<32x256xbf16>
    %cst_332 = arith.constant dense<0.000000e+00> : vector<2x256xf32>
    %793 = tpu.matmul %790, %792, %cst_332 {dimension_numbers = #tpu.dot_dimension_numbers<[1], [0], [0], [1], [0, 0, 1, 1], [], []>} : vector<2x32xbf16>, vector<32x256xbf16>, vector<2x256xf32> -> vector<2x256xf32>
    %794 = arith.addf %788, %793 : vector<2x256xf32>
    %795 = vector.extract_strided_slice %739 {offsets = [18, 0], sizes = [2, 32], strides = [1, 1]} : vector<32x32xf32> to vector<2x32xf32>
    %796 = arith.truncf %795 : vector<2x32xf32> to vector<2x32xbf16>
    %c9 = arith.constant 9 : index
    %c0_333 = arith.constant 0 : index
    %c0_334 = arith.constant 0 : index
    %797 = vector.load %arg30[%c9, %c0_333, %c0_334] : memref<16x32x256xbf16, #tpu.memory_space<vmem>>, vector<1x32x256xbf16>
    %798 = vector.shape_cast %797 : vector<1x32x256xbf16> to vector<32x256xbf16>
    %cst_335 = arith.constant dense<0.000000e+00> : vector<2x256xf32>
    %799 = tpu.matmul %796, %798, %cst_335 {dimension_numbers = #tpu.dot_dimension_numbers<[1], [0], [0], [1], [0, 0, 1, 1], [], []>} : vector<2x32xbf16>, vector<32x256xbf16>, vector<2x256xf32> -> vector<2x256xf32>
    %800 = arith.addf %794, %799 : vector<2x256xf32>
    %801 = vector.extract_strided_slice %739 {offsets = [20, 0], sizes = [2, 32], strides = [1, 1]} : vector<32x32xf32> to vector<2x32xf32>
    %802 = arith.truncf %801 : vector<2x32xf32> to vector<2x32xbf16>
    %c10 = arith.constant 10 : index
    %c0_336 = arith.constant 0 : index
    %c0_337 = arith.constant 0 : index
    %803 = vector.load %arg30[%c10, %c0_336, %c0_337] : memref<16x32x256xbf16, #tpu.memory_space<vmem>>, vector<1x32x256xbf16>
    %804 = vector.shape_cast %803 : vector<1x32x256xbf16> to vector<32x256xbf16>
    %cst_338 = arith.constant dense<0.000000e+00> : vector<2x256xf32>
    %805 = tpu.matmul %802, %804, %cst_338 {dimension_numbers = #tpu.dot_dimension_numbers<[1], [0], [0], [1], [0, 0, 1, 1], [], []>} : vector<2x32xbf16>, vector<32x256xbf16>, vector<2x256xf32> -> vector<2x256xf32>
    %806 = arith.addf %800, %805 : vector<2x256xf32>
    %807 = vector.extract_strided_slice %739 {offsets = [22, 0], sizes = [2, 32], strides = [1, 1]} : vector<32x32xf32> to vector<2x32xf32>
    %808 = arith.truncf %807 : vector<2x32xf32> to vector<2x32xbf16>
    %c11 = arith.constant 11 : index
    %c0_339 = arith.constant 0 : index
    %c0_340 = arith.constant 0 : index
    %809 = vector.load %arg30[%c11, %c0_339, %c0_340] : memref<16x32x256xbf16, #tpu.memory_space<vmem>>, vector<1x32x256xbf16>
    %810 = vector.shape_cast %809 : vector<1x32x256xbf16> to vector<32x256xbf16>
    %cst_341 = arith.constant dense<0.000000e+00> : vector<2x256xf32>
    %811 = tpu.matmul %808, %810, %cst_341 {dimension_numbers = #tpu.dot_dimension_numbers<[1], [0], [0], [1], [0, 0, 1, 1], [], []>} : vector<2x32xbf16>, vector<32x256xbf16>, vector<2x256xf32> -> vector<2x256xf32>
    %812 = arith.addf %806, %811 : vector<2x256xf32>
    %813 = vector.extract_strided_slice %739 {offsets = [24, 0], sizes = [2, 32], strides = [1, 1]} : vector<32x32xf32> to vector<2x32xf32>
    %814 = arith.truncf %813 : vector<2x32xf32> to vector<2x32xbf16>
    %c12 = arith.constant 12 : index
    %c0_342 = arith.constant 0 : index
    %c0_343 = arith.constant 0 : index
    %815 = vector.load %arg30[%c12, %c0_342, %c0_343] : memref<16x32x256xbf16, #tpu.memory_space<vmem>>, vector<1x32x256xbf16>
    %816 = vector.shape_cast %815 : vector<1x32x256xbf16> to vector<32x256xbf16>
    %cst_344 = arith.constant dense<0.000000e+00> : vector<2x256xf32>
    %817 = tpu.matmul %814, %816, %cst_344 {dimension_numbers = #tpu.dot_dimension_numbers<[1], [0], [0], [1], [0, 0, 1, 1], [], []>} : vector<2x32xbf16>, vector<32x256xbf16>, vector<2x256xf32> -> vector<2x256xf32>
    %818 = arith.addf %812, %817 : vector<2x256xf32>
    %819 = vector.extract_strided_slice %739 {offsets = [26, 0], sizes = [2, 32], strides = [1, 1]} : vector<32x32xf32> to vector<2x32xf32>
    %820 = arith.truncf %819 : vector<2x32xf32> to vector<2x32xbf16>
    %c13 = arith.constant 13 : index
    %c0_345 = arith.constant 0 : index
    %c0_346 = arith.constant 0 : index
    %821 = vector.load %arg30[%c13, %c0_345, %c0_346] : memref<16x32x256xbf16, #tpu.memory_space<vmem>>, vector<1x32x256xbf16>
    %822 = vector.shape_cast %821 : vector<1x32x256xbf16> to vector<32x256xbf16>
    %cst_347 = arith.constant dense<0.000000e+00> : vector<2x256xf32>
    %823 = tpu.matmul %820, %822, %cst_347 {dimension_numbers = #tpu.dot_dimension_numbers<[1], [0], [0], [1], [0, 0, 1, 1], [], []>} : vector<2x32xbf16>, vector<32x256xbf16>, vector<2x256xf32> -> vector<2x256xf32>
    %824 = arith.addf %818, %823 : vector<2x256xf32>
    %825 = vector.extract_strided_slice %739 {offsets = [28, 0], sizes = [2, 32], strides = [1, 1]} : vector<32x32xf32> to vector<2x32xf32>
    %826 = arith.truncf %825 : vector<2x32xf32> to vector<2x32xbf16>
    %c14 = arith.constant 14 : index
    %c0_348 = arith.constant 0 : index
    %c0_349 = arith.constant 0 : index
    %827 = vector.load %arg30[%c14, %c0_348, %c0_349] : memref<16x32x256xbf16, #tpu.memory_space<vmem>>, vector<1x32x256xbf16>
    %828 = vector.shape_cast %827 : vector<1x32x256xbf16> to vector<32x256xbf16>
    %cst_350 = arith.constant dense<0.000000e+00> : vector<2x256xf32>
    %829 = tpu.matmul %826, %828, %cst_350 {dimension_numbers = #tpu.dot_dimension_numbers<[1], [0], [0], [1], [0, 0, 1, 1], [], []>} : vector<2x32xbf16>, vector<32x256xbf16>, vector<2x256xf32> -> vector<2x256xf32>
    %830 = arith.addf %824, %829 : vector<2x256xf32>
    %831 = vector.extract_strided_slice %739 {offsets = [30, 0], sizes = [2, 32], strides = [1, 1]} : vector<32x32xf32> to vector<2x32xf32>
    %832 = arith.truncf %831 : vector<2x32xf32> to vector<2x32xbf16>
    %c15 = arith.constant 15 : index
    %c0_351 = arith.constant 0 : index
    %c0_352 = arith.constant 0 : index
    %833 = vector.load %arg30[%c15, %c0_351, %c0_352] : memref<16x32x256xbf16, #tpu.memory_space<vmem>>, vector<1x32x256xbf16>
    %834 = vector.shape_cast %833 : vector<1x32x256xbf16> to vector<32x256xbf16>
    %cst_353 = arith.constant dense<0.000000e+00> : vector<2x256xf32>
    %835 = tpu.matmul %832, %834, %cst_353 {dimension_numbers = #tpu.dot_dimension_numbers<[1], [0], [0], [1], [0, 0, 1, 1], [], []>} : vector<2x32xbf16>, vector<32x256xbf16>, vector<2x256xf32> -> vector<2x256xf32>
    %836 = arith.addf %830, %835 : vector<2x256xf32>
    %c0_354 = arith.constant 0 : index
    %c0_355 = arith.constant 0 : index
    %837 = vector.load %arg31[%c0_354, %c0_355] : memref<1x256xf32, #tpu.memory_space<vmem>>, vector<1x256xf32>
    %838 = vector.broadcast %837 : vector<1x256xf32> to vector<2x256xf32>
    %839 = arith.addf %836, %838 : vector<2x256xf32>
    %cst_356 = arith.constant 0.000000e+00 : f32
    %840 = vector.broadcast %cst_356 : f32 to vector<2x256xf32>
    %841 = arith.maximumf %839, %840 : vector<2x256xf32>
    %c0_357 = arith.constant 0 : index
    %c0_358 = arith.constant 0 : index
    %842 = vector.load %arg32[%c0_357, %c0_358] : memref<1x256xf32, #tpu.memory_space<vmem>>, vector<1x256xf32>
    %843 = vector.broadcast %842 : vector<1x256xf32> to vector<2x256xf32>
    %844 = arith.mulf %841, %843 : vector<2x256xf32>
    %c0_359 = arith.constant 0 : index
    %c0_360 = arith.constant 0 : index
    %845 = vector.load %arg33[%c0_359, %c0_360] : memref<1x256xf32, #tpu.memory_space<vmem>>, vector<1x256xf32>
    %846 = vector.broadcast %845 : vector<1x256xf32> to vector<2x256xf32>
    %847 = arith.addf %844, %846 : vector<2x256xf32>
    %848 = arith.truncf %847 : vector<2x256xf32> to vector<2x256xbf16>
    %c0_361 = arith.constant 0 : index
    %c0_362 = arith.constant 0 : index
    %849 = vector.load %arg34[%c0_361, %c0_362] : memref<256x64xbf16, #tpu.memory_space<vmem>>, vector<256x64xbf16>
    %cst_363 = arith.constant dense<0.000000e+00> : vector<2x64xf32>
    %850 = tpu.matmul %848, %849, %cst_363 {dimension_numbers = #tpu.dot_dimension_numbers<[1], [0], [0], [1], [0, 0, 1, 1], [], []>} : vector<2x256xbf16>, vector<256x64xbf16>, vector<2x64xf32> -> vector<2x64xf32>
    %c0_364 = arith.constant 0 : index
    %c0_365 = arith.constant 0 : index
    %851 = vector.load %arg35[%c0_364, %c0_365] : memref<1x64xf32, #tpu.memory_space<vmem>>, vector<1x64xf32>
    %852 = vector.broadcast %851 : vector<1x64xf32> to vector<2x64xf32>
    %853 = arith.addf %850, %852 : vector<2x64xf32>
    %cst_366 = arith.constant 0.000000e+00 : f32
    %854 = vector.broadcast %cst_366 : f32 to vector<2x64xf32>
    %855 = arith.maximumf %853, %854 : vector<2x64xf32>
    %856 = arith.truncf %855 : vector<2x64xf32> to vector<2x64xbf16>
    %c0_367 = arith.constant 0 : index
    %c0_368 = arith.constant 0 : index
    %857 = vector.load %arg36[%c0_367, %c0_368] : memref<64x3xbf16, #tpu.memory_space<vmem>>, vector<64x3xbf16>
    %cst_369 = arith.constant dense<0.000000e+00> : vector<2x3xf32>
    %858 = tpu.matmul %856, %857, %cst_369 {dimension_numbers = #tpu.dot_dimension_numbers<[1], [0], [0], [1], [0, 0, 1, 1], [], []>} : vector<2x64xbf16>, vector<64x3xbf16>, vector<2x3xf32> -> vector<2x3xf32>
    %c0_370 = arith.constant 0 : index
    %c0_371 = arith.constant 0 : index
    %859 = vector.load %arg37[%c0_370, %c0_371] : memref<1x3xf32, #tpu.memory_space<vmem>>, vector<1x3xf32>
    %860 = vector.broadcast %859 : vector<1x3xf32> to vector<2x3xf32>
    %861 = arith.addf %858, %860 : vector<2x3xf32>
    %c0_372 = arith.constant 0 : index
    %c0_373 = arith.constant 0 : index
    %862 = vector.load %arg38[%c0_372, %c0_373] : memref<2x3xf32, #tpu.memory_space<vmem>>, vector<2x3xf32>
    tpu.vector_store %arg38[%c0_372, %c0_373], %861 {strides = array<i32>} : memref<2x3xf32, #tpu.memory_space<vmem>>, vector<2x3xf32>,
    return
  }
}

</mosaic_0001>

<bundles_post_ra>
// kernel: transformer_forward.1
= control target key start
LH: loop header
LB: loop body
LE: loop exit
PB: predicated region body
PF: predicated region fallthrough
CT: control target
= control target key end

     0   :  { %s5509_s6 = smov 1   ;;  %s5510_s10 = smov 2   ;;  %s6578_s0 = inlined_call_operand.smem [shape: u32[39], index: -1, kind: input, shape index: {}] }
   0x1   :  { %s5564_s5 = sld [smem:[%s6578_s0]]   ;;  %s5511_s14 = smov 3  }
   0x2   :  { %s5569_s9 = sld [smem:[%s6578_s0 + %s5509_s6]]   ;;  %s5512_s18 = smov 4  }
   0x3   :  { %s5574_s13 = sld [smem:[%s6578_s0 + %s5510_s10]]   ;;  %s5513_s22 = smov 5  }
   0x4   :  { %s5579_s17 = sld [smem:[%s6578_s0 + %s5511_s14]]   ;;  %s5514_s26 = smov 6  }
   0x5   :  { %s5584_s21 = sld [smem:[%s6578_s0 + %s5512_s18]]   ;;  %s5515_s30 = smov 7  }
   0x6   :  { %s5589_s25 = sld [smem:[%s6578_s0 + %s5513_s22]]   ;;  %s5516_s4 = smov 8  }
   0x7   :  { %s5594_s29 = sld [smem:[%s6578_s0 + %s5514_s26]]   ;;  %s5517_s10 = smov 9  }
   0x8   :  { %s5599_s3 = sld [smem:[%s6578_s0 + %s5515_s30]]   ;;  %s5518_s15 = smov 10  }
   0x9   :  { %s5604_s8 = sld [smem:[%s6578_s0 + %s5516_s4]]   ;;  %s5519_s20 = smov 11  }
   0xa   :  { %s5609_s14 = sld [smem:[%s6578_s0 + %s5517_s10]]   ;;  %s5520_s26 = smov 12  }
   0xb   :  { %6597 = sst [smem:[#allocation5_spill]] %s5584_s21  ;;  %s5521_s1 = smov 13  }
   0xc   :  { %6598 = sst [smem:[#allocation6_spill]] %s5589_s25  ;;  %s5522_s7 = smov 14  }
   0xd   :  { %s5614_s19 = sld [smem:[%s6578_s0 + %s5518_s15]]   ;;  %s5523_s15 = smov 15  }
   0xe   :  { %s5619_s24 = sld [smem:[%s6578_s0 + %s5519_s20]]   ;;  %s5524_s22 = smov 16  }
   0xf   :  { %s5624_s30 = sld [smem:[%s6578_s0 + %s5520_s26]]   ;;  %s5525_s28 = smov 17  }
  0x10   :  { %s5629_s6 = sld [smem:[%s6578_s0 + %s5521_s1]]  }
  0x11   :  { %s5634_s12 = sld [smem:[%s6578_s0 + %s5522_s7]]   ;;  %s5526_s7 = smov 18  }
  0x12   :  { %s5639_s20 = sld [smem:[%s6578_s0 + %s5523_s15]]   ;;  %s5527_s15 = smov 19  }
  0x13   :  { %s5644_s27 = sld [smem:[%s6578_s0 + %s5524_s22]]   ;;  %s5528_s22 = smov 20  }
  0x14   :  { %s5649_s4 = sld [smem:[%s6578_s0 + %s5525_s28]]   ;;  %s5529_s28 = smov 21  }
  0x15   :  { %s5654_s21 = sld [smem:[%s6578_s0 + %s5526_s7]]   ;;  %s5530_s7 = smov 22  }
  0x16   :  { %s5659_s25 = sld [smem:[%s6578_s0 + %s5527_s15]]   ;;  %s5531_s15 = smov 23  }
  0x18   :  { %6599 = sst [smem:[#allocation7_spill]] %s5639_s20 }
  0x19   :  { %6600 = sst [smem:[#allocation8_spill]] %s5644_s27 }
  0x1a   :  { %6601 = sst [smem:[#allocation9_spill]] %s5649_s4 }
  0x1b   :  { %6602 = sst [smem:[#allocation10_spill]] %s5654_s21 }
  0x1c   :  { %6603 = sst [smem:[#allocation11_spill]] %s5659_s25 }
  0x1d   :  { %s5664_s27 = sld [smem:[%s6578_s0 + %s5528_s22]]   ;;  %s5532_s22 = smov 24  }
  0x1e   :  { %s5669_s4 = sld [smem:[%s6578_s0 + %s5529_s28]]   ;;  %s5533_s28 = smov 25  }
  0x1f   :  { %s5674_s21 = sld [smem:[%s6578_s0 + %s5530_s7]]   ;;  %s5534_s7 = smov 26  }
  0x20   :  { %s5679_s25 = sld [smem:[%s6578_s0 + %s5531_s15]]   ;;  %s5535_s15 = smov 27  }
  0x23   :  { %6604 = sst [smem:[#allocation12_spill]] %s5664_s27 }
  0x24   :  { %6605 = sst [smem:[#allocation13_spill]] %s5669_s4 }
  0x25   :  { %6606 = sst [smem:[#allocation14_spill]] %s5674_s21 }
  0x26   :  { %6607 = sst [smem:[#allocation15_spill]] %s5679_s25 }
  0x27   :  { %s5684_s27 = sld [smem:[%s6578_s0 + %s5532_s22]]   ;;  %s5536_s22 = smov 28  }
  0x28   :  { %s5689_s4 = sld [smem:[%s6578_s0 + %s5533_s28]]   ;;  %s5537_s28 = smov 29  }
  0x29   :  { %s5694_s21 = sld [smem:[%s6578_s0 + %s5534_s7]]   ;;  %s5538_s7 = smov 30  }
  0x2a   :  { %s5699_s25 = sld [smem:[%s6578_s0 + %s5535_s15]]   ;;  %s5539_s15 = smov 31  }
  0x2d   :  { %6608 = sst [smem:[#allocation16_spill]] %s5684_s27 }
  0x2e   :  { %6609 = sst [smem:[#allocation17_spill]] %s5689_s4 }
  0x2f   :  { %6610 = sst [smem:[#allocation18_spill]] %s5694_s21 }
  0x30   :  { %6611 = sst [smem:[#allocation19_spill]] %s5699_s25 }
  0x31   :  { %s5704_s27 = sld [smem:[%s6578_s0 + %s5536_s22]]   ;;  %s5540_s22 = smov 32  }
  0x32   :  { %s5709_s4 = sld [smem:[%s6578_s0 + %s5537_s28]]   ;;  %s5541_s28 = smov 33  }
  0x33   :  { %s5714_s21 = sld [smem:[%s6578_s0 + %s5538_s7]]   ;;  %s5542_s7 = smov 34  }
  0x34   :  { %s5719_s25 = sld [smem:[%s6578_s0 + %s5539_s15]]   ;;  %s5543_s15 = smov 35  }
  0x35   :  { %s5734_s20 = sld [smem:[%s6578_s0 + %s5542_s7]]   ;;  %s5546_s7 = smov 38  }
  0x37   :  { %6612 = sst [smem:[#allocation20_spill]] %s5704_s27 }
  0x38   :  { %6613 = sst [smem:[#allocation21_spill]] %s5709_s4 }
  0x39   :  { %s5724_s27 = sld [smem:[%s6578_s0 + %s5540_s22]]   ;;  %s5544_s22 = smov 36  }
  0x3a   :  { %6614 = sst [smem:[#allocation22_spill]] %s5719_s25 }
  0x3b   :  { %s5729_s4 = sld [smem:[%s6578_s0 + %s5541_s28]]   ;;  %s5545_s28 = smov 37  }
  0x3c   :  { %6617 = sst [smem:[#allocation25_spill]] %s5734_s20 }
  0x3d   :  { %s5739_s25 = sld [smem:[%s6578_s0 + %s5543_s15]]  }
  0x3e   :  { %s5754_s20 = sld [smem:[%s6578_s0 + %s5546_s7]]  }
  0x3f   :  { %6615 = sst [smem:[#allocation23_spill]] %s5724_s27 }
  0x40   :  { %s5744_s27 = sld [smem:[%s6578_s0 + %s5544_s22]]  }
  0x41   :  { %6616 = sst [smem:[#allocation24_spill]] %s5729_s4 }
  0x42   :  { %s5749_s4 = sld [smem:[%s6578_s0 + %s5545_s28]]  }
  0x43   :  { %82 = vsyncpa [#allocation3], 0  ;;  %s147_s15 = sshll.u32 %s5714_s21, 4  ;;  %s5547_s16 = smov [#allocation2]   ;;  %s148_s15 = int_to_ptr.hbm [resolvable:$true] %s147_s15 }
  0x44   :  { %s149_s18 = sshll.u32 %s5547_s16, 4  ;;  %s5483_s22 = sshra.s32 %s148_s15, 4  ;;  %s150_s18 = int_to_ptr.vmem [resolvable:$true] %s149_s18  ;;  %s5484_s22 = int_to_ptr.hbm [resolvable:$true] %s5483_s22 }
  0x45   :  { %s5485_s23 = scalar_lea.hbm %s5484_s22, 512  ;;  %s5487_s26 = scalar_lea.hbm %s5714_s21, 512 }
  0x46   :  { %p5486_p0 = scmp.ne.s32.totalorder %s5484_s22, %s5485_s23  ;;  %p5488_p1 = scmp.lt.s32.totalorder %s5484_s22, %s5714_s21 }
  0x47   :  { %p5489_p2 = scmp.lt.s32.totalorder %s5487_s26, %s5485_s23 }
  0x49   :  { %p5490_p3 = por %p5489_p2, %p5488_p1 }
  0x4b   :  { %p5491_p4 = pnand %p5490_p3, %p5486_p0 }
  0x4d   :  { %5494 = shalt.err (!%p5491_p4)
}
  0x4e   :  { %s5548_s0 = smov 128   ;;  %s5549_s28 = smov 8  }
  0x4f   :  { %155 = dma.hbm_to_vmem [thread:$0]  %s148_s15, 8192, %s150_s18, [#allocation3], %s5548_s0, %s5548_s0, %s5549_s28  }
  0x50   :  { %5507 = dma.done.wait [#allocation3], 8192  }
  0x51   :  { %5508 = vsyncadd [#allocation3], 4294959104  ;;  %v5085_v0 = vld [vmem:[%s5594_s29 + $0x8] sm:$0xff]  ;;  %v5084_v1 = vld [vmem:[%s5594_s29] sm:$0xff]  ;;  %vm196_vm0 = vcmask 261120   ;;  %s5550_s21 = smov 120  }
  0x52   :  { %v5762_v2 = vld [vmem:[%s5564_s5] sm:$0xff]  ;;  %v5765_v3 = vld [vmem:[%s5564_s5 + $0x8] sm:$0xff]  ;;  %206 = vmatpush.bf16.msra.mxu3 %v5085_v0  ;;  %s5551_s1 = smov 112   ;;  %s5552_s5 = smov 104   ;;  %vm220_vm1 = vcmask 64512   ;;  %vm241_vm2 = vcmask 130048  }
  0x53   :  { %v179_v4 = vpack.c.bf16 %v5765_v3, %v5762_v2  ;;  %v5778_v13 = vld [vmem:[%s5574_s13] sm:$0xff]  ;;  %v5785_v20 = vld [vmem:[%s5574_s13 + $0x8] sm:$0xff]  ;;  %s5553_s2 = smov 88   ;;  %s5554_s13 = smov 96   ;;  %vm357_vm3 = vcmask 1043456   ;;  %vm529_vm11 = vcmask 523264  }
  0x54   :  { %v214_v63 = vld [vmem:[%s5599_s3] sm:$0xf]  ;;  %s6629_s7 = sld [smem:[#allocation18_spill]] }
  0x55   :  { %v379_v0 = vsel %vm357_vm3, %v214_v63, 0  ;;  %v5264_v63 = vld [vmem:[%s5609_s14] ss:$0 sm:$0xff]  ;;  %s6630_s10 = sld [smem:[#allocation16_spill]] }
  0x56   :  { %207 = vmatpush.bf16.msra.mxu3 %v5084_v1  ;;  %s6631_s11 = sld [smem:[#allocation17_spill]] }
  0x57   :  { %s6632_s15 = sld [smem:[#allocation19_spill]] }
  0x58   :  { %s6633_s16 = sld [smem:[#allocation20_spill]] }
  0x59   :  { %4393 = vmatmul.msk.bf16.vlgmr.msra.gmra.mxu3 %vm196_vm0, %v179_v4  ;;  %s6634_s18 = sld [smem:[#allocation21_spill]] }
  0x5a   :  { %s6639_s22 = sld [smem:[#allocation25_spill]] }
  0x5b   :  { %s6640_s23 = sld [smem:[#allocation22_spill]] }
  0x5c   :  { %s6641_s26 = sld [smem:[#allocation23_spill]] }
  0x5d   :  { %s6642_s0 = sld [smem:[#allocation24_spill]] }
  0xdc   :  { %v209_v5 = vpop.f32.mrf.mxu3 }
  0xe4   :  { %v211_v6 = vpop.f32.mrf.mxu3 }
  0xe5   :  { %v216_v7 = vpack.c.bf16 %v211_v6, %v209_v5  ;;  %v215_v6 = vld [vmem:[%s5599_s3 + $0x4] sm:$0xf] }
  0xe7   :  { %286 = vrot.lane.b32.xlu1 %v216_v7, %s5550_s21  ;;  %218 = vrot.lane.b32.xlu0 %v216_v7, %s5551_s1 }
  0xef   :  { %288 = vrot.lane.b32.xlu0 %v216_v7, %s5552_s5 }
 0x159   :  { %v219_v8 = vpop.permute.xlu0 %218  ;;  %v287_v12 = vpop.permute.xlu1 %286 }
 0x15a   :  { %v225_v9 = vsel %vm220_vm1, %v219_v8, 0 }
 0x15b   :  { %234 = vmatpush.bf16.xpose.msra.mxu1 %v225_v9 }
 0x161   :  { %v289_v10 = vpop.permute.xlu0 %288 }
 0x162   :  { %4394 = vmatmul.msk.bf16.vlgmr.msra.gmra.mxu1 %vm220_vm1, %v216_v7  ;;  %v294_v11 = vsel %vm220_vm1, %v289_v10, 0 }
 0x163   :  { %303 = vmatpush.bf16.xpose.msrb.mxu3 %v294_v11  ;;  %388 = vmatpush.bf16.msrb.mxu1 %v379_v0 }
 0x16a   :  { %4396 = vmatmul.msk.bf16.vlgmr.msrb.gmra.mxu3 %vm220_vm1, %v287_v12 }
 0x1df   :  { %v236_v14 = vpop.f32.mrf.mxu1 }
 0x1e0   :  { %v237_v15 = vadd.f32 %v236_v14, %v5778_v13 }
 0x1e2   :  { %v242_v16 = vsel %vm241_vm2, %v237_v15, -inf }
 0x1e3   :  { %243 = vmax.xlane.f32.xlu1 %v242_v16 }
 0x1e7   :  { %v238_v21 = vpop.f32.mrf.mxu1 }
 0x1e8   :  { %v239_v22 = vadd.f32 %v238_v21, %v5785_v20 }
 0x1ea   :  { %v245_v26 = vsel %vm241_vm2, %v239_v22, -inf }
 0x1ed   :  { %v305_v17 = vpop.f32.mrf.mxu3 }
 0x1ee   :  { %v306_v18 = vadd.f32 %v305_v17, %v5778_v13 }
 0x1f0   :  { %v310_v19 = vsel %vm241_vm2, %v306_v18, -inf }
 0x1f1   :  { %311 = vmax.xlane.f32.xlu2 %v310_v19 }
 0x1f5   :  { %v307_v23 = vpop.f32.mrf.mxu3 }
 0x1f6   :  { %v308_v24 = vadd.f32 %v307_v23, %v5785_v20  ;;  %v5555_v23 = vmov 32.0  }
 0x1f8   :  { %v313_v25 = vsel %vm241_vm2, %v308_v24, -inf }
 0x1f9   :  { %314 = vmax.xlane.f32.xlu0 %v313_v25  ;;  %246 = vmax.xlane.f32.xlu2 %v245_v26 }
 0x20d   :  { %333 = vrot.lane.b32.xlu0 %v216_v7, %s5553_s2 }
 0x256   :  { %v244_v27 = vpop.xlane.xlu1 %243 }
 0x257   :  { %v248_v28 = vsub.f32 %v237_v15, %v244_v27 }
 0x259   :  { %v250_v29 = vmul.f32 1.442695, %v248_v28 }
 0x25b   :  { %5289 = vpow2.f32 %v250_v29 }
 0x261   :  { %v5290_v30 = vpop.eup %5289 }
 0x262   :  { %v254_v31 = vsel %vm241_vm2, %v5290_v30, 0.0 }
 0x263   :  { %255 = vadd.xlane.f32.xlu2 %v254_v31 }
 0x264   :  { %v312_v32 = vpop.xlane.xlu2 %311 }
 0x265   :  { %v316_v33 = vsub.f32 %v306_v18, %v312_v32 }
 0x267   :  { %v318_v34 = vmul.f32 1.442695, %v316_v33 }
 0x269   :  { %5291 = vpow2.f32 %v318_v34 }
 0x26c   :  { %v247_v35 = vpop.xlane.xlu2 %246  ;;  %v315_v42 = vpop.xlane.xlu0 %314 }
 0x26d   :  { %v249_v36 = vsub.f32 %v239_v22, %v247_v35  ;;  %v317_v43 = vsub.f32 %v308_v24, %v315_v42 }
 0x26f   :  { %v5292_v37 = vpop.eup %5291  ;;  %v252_v38 = vmul.f32 1.442695, %v249_v36  ;;  %v320_v44 = vmul.f32 1.442695, %v317_v43  ;;  %v5091_v43 = vld [vmem:[%s5619_s24 + $0x18] sm:$0xff] }
 0x270   :  { %v322_v39 = vsel %vm241_vm2, %v5292_v37, 0.0 }
 0x271   :  { %323 = vadd.xlane.f32.xlu1 %v322_v39  ;;  %5293 = vpow2.f32 %v252_v38  ;;  %v5087_v38 = vld [vmem:[%s5614_s19 + $0x8] sm:$0xff] }
 0x272   :  { %5295 = vpow2.f32 %v320_v44  ;;  %486 = vmatpush.bf16.msra.mxu3 %v5087_v38 }
 0x277   :  { %v5294_v40 = vpop.eup %5293 }
 0x278   :  { %v257_v41 = vsel %vm241_vm2, %v5294_v40, 0.0  ;;  %v5296_v45 = vpop.eup %5295 }
 0x279   :  { %258 = vadd.xlane.f32.xlu2 %v257_v41  ;;  %v325_v46 = vsel %vm241_vm2, %v5296_v45, 0.0  ;;  %v5086_v41 = vld [vmem:[%s5614_s19] sm:$0xff] }
 0x27a   :  { %487 = vmatpush.bf16.msra.mxu3 %v5086_v41 }
 0x27f   :  { %v334_v54 = vpop.permute.xlu0 %333 }
 0x291   :  { %265 = vrot.lane.b32.xlu2 %v216_v7, %s5554_s13  ;;  %v359_v7 = vsel %vm357_vm3, %v215_v6, 0 }
 0x292   :  { %368 = vmatpush.bf16.msra.mxu0 %v359_v7 }
 0x2ba   :  { %326 = vadd.xlane.f32.xlu2 %v325_v46 }
 0x2d6   :  { %v256_v47 = vpop.xlane.xlu2 %255 }
 0x2d7   :  { %5297 = vrcp.f32 %v256_v47 }
 0x2dd   :  { %v5298_v49 = vpop.eup %5297 }
 0x2de   :  { %v262_v52 = vmul.f32 %v5298_v49, %v5290_v30 }
 0x2e4   :  { %v324_v56 = vpop.xlane.xlu1 %323 }
 0x2ec   :  { %v259_v48 = vpop.xlane.xlu2 %258 }
 0x2ed   :  { %5299 = vrcp.f32 %v259_v48 }
 0x2ee   :  { %5301 = vrcp.f32 %v324_v56 }
 0x2f3   :  { %v5300_v50 = vpop.eup %5299 }
 0x2f4   :  { %v266_v51 = vpop.permute.xlu2 %265  ;;  %v263_v53 = vmul.f32 %v5300_v50, %v5294_v40  ;;  %v5302_v58 = vpop.eup %5301 }
 0x2f5   :  { %278 = vmatpush.bf16.msra.mxu2 %v266_v51  ;;  %v330_v60 = vmul.f32 %v5302_v58, %v5292_v37 }
 0x2f6   :  { %v264_v55 = vpack.c.bf16 %v263_v53, %v262_v52 }
 0x2f8   :  { %4395 = vmatmul.msk.bf16.vlgmr.msra.gmra.mxu2 %vm241_vm2, %v264_v55 }
 0x2f9   :  { %346 = vmatpush.bf16.msrb.mxu2 %v334_v54 }
 0x2fd   :  { %537 = vmatpush.bf16.msra.mxu2 %v5091_v43 }
 0x32d   :  { %v327_v57 = vpop.xlane.xlu2 %326 }
 0x32e   :  { %5303 = vrcp.f32 %v327_v57 }
 0x32f   :  { %5305 = vrcp.f32 %v5555_v23 }
 0x334   :  { %v5304_v59 = vpop.eup %5303 }
 0x335   :  { %v331_v61 = vmul.f32 %v5304_v59, %v5296_v45  ;;  %v5306_v24 = vpop.eup %5305  ;;  %v5263_v59 = vld [vmem:[%s5604_s8] ss:$0 sm:$0xff] }
 0x336   :  { %v404_v25 = vmul.f32 32.0, %v5306_v24  ;;  %vm408_vm4 = vweird.f32 %v5306_v24 }
 0x337   :  { %v332_v62 = vpack.c.bf16 %v331_v61, %v330_v60 }
 0x338   :  { %v405_v26 = vsub.f32 1.0, %v404_v25 }
 0x339   :  { %4397 = vmatmul.msk.bf16.vlgmr.msrb.gmra.mxu2 %vm241_vm2, %v332_v62 }
 0x33a   :  { %v406_v27 = vmul.f32 %v5306_v24, %v405_v26 }
 0x33c   :  { %v407_v28 = vadd.f32 %v5306_v24, %v406_v27 }
 0x37b   :  { %v280_v1 = vpop.f32.mrf.mxu2 }
 0x383   :  { %v282_v4 = vpop.f32.mrf.mxu2 }
 0x384   :  { %v285_v5 = vpack.c.bf16 %v282_v4, %v280_v1 }
 0x386   :  { %4399 = vmatmul.msk.bf16.vlgmr.msrb.gmra.mxu1 %vm220_vm1, %v285_v5 }
 0x3bc   :  { %v348_v8 = vpop.f32.mrf.mxu2 }
 0x3c4   :  { %v350_v9 = vpop.f32.mrf.mxu2 }
 0x3c5   :  { %v353_v10 = vpack.c.bf16 %v350_v9, %v348_v8  ;;  %v5090_v8 = vld [vmem:[%s5619_s24 + $0x10] sm:$0xff]  ;;  %v5089_v9 = vld [vmem:[%s5619_s24 + $0x8] sm:$0xff] }
 0x3c6   :  { %538 = vmatpush.bf16.msra.mxu2 %v5090_v8 }
 0x3c7   :  { %4398 = vmatmul.msk.bf16.vlgmr.msra.gmra.mxu0 %vm220_vm1, %v353_v10  ;;  %v5088_v10 = vld [vmem:[%s5619_s24] sm:$0xff] }
 0x3ca   :  { %539 = vmatpush.bf16.msra.mxu2 %v5089_v9 }
 0x3ce   :  { %540 = vmatpush.bf16.msra.mxu2 %v5088_v10 }
 0x403   :  { %v390_v11 = vpop.f32.mrf.mxu1 }
 0x40b   :  { %v392_v17 = vpop.f32.mrf.mxu1 }
 0x444   :  { %v370_v12 = vpop.f32.mrf.mxu0 }
 0x445   :  { %v391_v14 = vadd.f32 %v390_v11, %v370_v12 }
 0x447   :  { %v395_v15 = vadd.f32 %v391_v14, %v5762_v2  ;;  %v5809_v2 = vsel %vm408_vm4, %v5306_v24, %v407_v28 }
 0x449   :  { %v397_v16 = vsel %vm196_vm0, %v395_v15, 0.0 }
 0x44a   :  { %398 = vadd.xlane.f32.xlu1 %v397_v16 }
 0x44c   :  { %v372_v18 = vpop.f32.mrf.mxu0 }
 0x44d   :  { %v393_v19 = vadd.f32 %v392_v17, %v372_v18 }
 0x44f   :  { %v396_v21 = vadd.f32 %v393_v19, %v5765_v3 }
 0x451   :  { %v400_v22 = vsel %vm196_vm0, %v396_v21, 0.0 }
 0x452   :  { %401 = vadd.xlane.f32.xlu1 %v400_v22 }
 0x4bd   :  { %v399_v29 = vpop.xlane.xlu1 %398 }
 0x4be   :  { %v410_v30 = vmul.f32 %v5809_v2, %v399_v29 }
 0x4c0   :  { %v412_v31 = vsub.f32 %v395_v15, %v410_v30 }
 0x4c2   :  { %v414_v3 = vmul.f32 %v412_v31, %v412_v31 }
 0x4c4   :  { %v416_v32 = vsel %vm196_vm0, %v414_v3, 0.0 }
 0x4c5   :  { %417 = vadd.xlane.f32.xlu1 %v416_v32  ;;  %v402_v33 = vpop.xlane.xlu1 %401 }
 0x4c6   :  { %v411_v34 = vmul.f32 %v5809_v2, %v402_v33  ;;  %v5093_v33 = vld [vmem:[%s5594_s29 + $0x18] sm:$0xff] }
 0x4c7   :  { %630 = vmatpush.bf16.msrb.mxu0 %v5093_v33 }
 0x4c8   :  { %v413_v35 = vsub.f32 %v396_v21, %v411_v34 }
 0x4ca   :  { %v415_v36 = vmul.f32 %v413_v35, %v413_v35 }
 0x4cc   :  { %v419_v37 = vsel %vm196_vm0, %v415_v36, 0.0 }
 0x4cd   :  { %420 = vadd.xlane.f32.xlu0 %v419_v37 }
 0x538   :  { %v418_v39 = vpop.xlane.xlu1 %417 }
 0x539   :  { %v422_v40 = vmul.f32 %v418_v39, %v5809_v2 }
 0x53b   :  { %v424_v42 = vadd.f32 1e-05, %v422_v40 }
 0x53d   :  { %5307 = vrsqrt.f32 %v424_v42  ;;  %vm432_vm6 = vweird.f32 %v424_v42 }
 0x540   :  { %v421_v44 = vpop.xlane.xlu0 %420 }
 0x541   :  { %v423_v45 = vmul.f32 %v421_v44, %v5809_v2 }
 0x543   :  { %v5308_v46 = vpop.eup %5307  ;;  %v425_v47 = vadd.f32 1e-05, %v423_v45 }
 0x544   :  { %v427_v48 = vmul.f32 %v5308_v46, %v424_v42  ;;  %vm433_vm5 = vweird.f32 %v5308_v46 }
 0x545   :  { %5309 = vrsqrt.f32 %v425_v47  ;;  %vm434_vm7 = vmor %vm432_vm6, %vm433_vm5  ;;  %vm442_vm9 = vweird.f32 %v425_v47 }
 0x546   :  { %v428_v49 = vmul.f32 %v5308_v46, %v427_v48 }
 0x548   :  { %v429_v50 = vmul.f32 0.5, %v428_v49 }
 0x54a   :  { %v430_v51 = vsub.f32 1.5, %v429_v50 }
 0x54b   :  { %v5310_v52 = vpop.eup %5309 }
 0x54c   :  { %v431_v53 = vmul.f32 %v5308_v46, %v430_v51  ;;  %v437_v54 = vmul.f32 %v5310_v52, %v425_v47  ;;  %vm443_vm8 = vweird.f32 %v5310_v52 }
 0x54d   :  { %vm444_vm10 = vmor %vm442_vm9, %vm443_vm8 }
 0x54e   :  { %v438_v55 = vmul.f32 %v5310_v52, %v437_v54  ;;  %v435_v56 = vsel %vm434_vm7, %v5308_v46, %v431_v53  ;;  %v5265_v54 = vld [vmem:[%s5624_s30] ss:$0 sm:$0xff] }
 0x54f   :  { %v446_v60 = vmul.f32 %v435_v56, %v412_v31 }
 0x550   :  { %v439_v57 = vmul.f32 0.5, %v438_v55 }
 0x551   :  { %v452_v0 = vmul.f32 %v5263_v59, %v446_v60 }
 0x552   :  { %v440_v58 = vsub.f32 1.5, %v439_v57 }
 0x553   :  { %v458_v5 = vadd.f32 %v5264_v63, %v452_v0 }
 0x554   :  { %v441_v61 = vmul.f32 %v5310_v52, %v440_v58 }
 0x556   :  { %v445_v62 = vsel %vm444_vm10, %v5310_v52, %v441_v61 }
 0x557   :  { %v447_v1 = vmul.f32 %v445_v62, %v413_v35  ;;  %v5092_v35 = vld [vmem:[%s5594_s29 + $0x10] sm:$0xff]  ;;  %s6620_s29 = sld [smem:[#allocation11_spill]] }
 0x558   :  { %631 = vmatpush.bf16.msrb.mxu0 %v5092_v35 }
 0x559   :  { %v453_v4 = vmul.f32 %v5263_v59, %v447_v1  ;;  %v5266_v59 = vld [vmem:[%s5629_s6] ss:$0 sm:$0xff] }
 0x55b   :  { %v459_v6 = vadd.f32 %v5264_v63, %v453_v4 }
 0x55d   :  { %v460_v7 = vpack.c.bf16 %v459_v6, %v458_v5 }
 0x55f   :  { %4408 = vmatmul.msk.bf16.vlgmr.msra.gmra.mxu3 %vm196_vm0, %v460_v7 }
 0x5e2   :  { %v489_v11 = vpop.f32.mrf.mxu3 }
 0x5e3   :  { %v494_v14 = vmax.f32 %v489_v11, 0.0 }
 0x5ea   :  { %v491_v12 = vpop.f32.mrf.mxu3 }
 0x5eb   :  { %v495_v15 = vmax.f32 %v491_v12, 0.0 }
 0x5ed   :  { %v496_v16 = vpack.c.bf16 %v495_v15, %v494_v14 }
 0x5ef   :  { %4425 = vmatmul.msk.bf16.vlgmr.msra.gmra.mxu2 %vm529_vm11, %v496_v16 }
 0x672   :  { %v542_v17 = vpop.f32.mrf.mxu2 }
 0x673   :  { %v543_v18 = vadd.f32 %v542_v17, %v458_v5 }
 0x675   :  { %v547_v19 = vsel %vm196_vm0, %v543_v18, 0.0 }
 0x676   :  { %548 = vadd.xlane.f32.xlu1 %v547_v19 }
 0x67a   :  { %v544_v21 = vpop.f32.mrf.mxu2 }
 0x67b   :  { %v545_v22 = vadd.f32 %v544_v21, %v459_v6 }
 0x67d   :  { %v550_v23 = vsel %vm196_vm0, %v545_v22, 0.0 }
 0x67e   :  { %551 = vadd.xlane.f32.xlu1 %v550_v23 }
 0x6e9   :  { %v549_v24 = vpop.xlane.xlu1 %548 }
 0x6ea   :  { %v553_v25 = vmul.f32 %v549_v24, %v5809_v2 }
 0x6ec   :  { %v555_v26 = vsub.f32 %v543_v18, %v553_v25 }
 0x6ee   :  { %v557_v27 = vmul.f32 %v555_v26, %v555_v26 }
 0x6f0   :  { %v559_v28 = vsel %vm196_vm0, %v557_v27, 0.0 }
 0x6f1   :  { %560 = vadd.xlane.f32.xlu2 %v559_v28  ;;  %v552_v29 = vpop.xlane.xlu1 %551 }
 0x6f2   :  { %v554_v30 = vmul.f32 %v552_v29, %v5809_v2 }
 0x6f4   :  { %v556_v31 = vsub.f32 %v545_v22, %v554_v30 }
 0x6f6   :  { %v558_v3 = vmul.f32 %v556_v31, %v556_v31 }
 0x6f8   :  { %v562_v32 = vsel %vm196_vm0, %v558_v3, 0.0 }
 0x6f9   :  { %563 = vadd.xlane.f32.xlu1 %v562_v32 }
 0x764   :  { %v561_v34 = vpop.xlane.xlu2 %560 }
 0x765   :  { %v565_v36 = vmul.f32 %v561_v34, %v5809_v2 }
 0x767   :  { %v567_v37 = vadd.f32 1e-05, %v565_v36 }
 0x769   :  { %5311 = vrsqrt.f32 %v567_v37  ;;  %vm575_vm13 = vweird.f32 %v567_v37 }
 0x76c   :  { %v564_v38 = vpop.xlane.xlu1 %563 }
 0x76d   :  { %v566_v39 = vmul.f32 %v564_v38, %v5809_v2 }
 0x76f   :  { %v5312_v40 = vpop.eup %5311  ;;  %v568_v41 = vadd.f32 1e-05, %v566_v39 }
 0x770   :  { %v570_v42 = vmul.f32 %v5312_v40, %v567_v37  ;;  %vm576_vm12 = vweird.f32 %v5312_v40 }
 0x771   :  { %5313 = vrsqrt.f32 %v568_v41  ;;  %vm577_vm14 = vmor %vm575_vm13, %vm576_vm12  ;;  %vm585_vm4 = vweird.f32 %v568_v41 }
 0x772   :  { %v571_v43 = vmul.f32 %v5312_v40, %v570_v42 }
 0x774   :  { %v572_v44 = vmul.f32 0.5, %v571_v43 }
 0x776   :  { %v573_v45 = vsub.f32 1.5, %v572_v44 }
 0x777   :  { %v5314_v46 = vpop.eup %5313 }
 0x778   :  { %v574_v47 = vmul.f32 %v5312_v40, %v573_v45  ;;  %v580_v48 = vmul.f32 %v5314_v46, %v568_v41  ;;  %vm586_vm15 = vweird.f32 %v5314_v46 }
 0x779   :  { %vm587_vm5 = vmor %vm585_vm4, %vm586_vm15 }
 0x77a   :  { %v581_v49 = vmul.f32 %v5314_v46, %v580_v48  ;;  %v578_v50 = vsel %vm577_vm14, %v5312_v40, %v574_v47 }
 0x77b   :  { %v589_v53 = vmul.f32 %v578_v50, %v555_v26 }
 0x77c   :  { %v582_v51 = vmul.f32 0.5, %v581_v49 }
 0x77d   :  { %v595_v58 = vmul.f32 %v5265_v54, %v589_v53 }
 0x77e   :  { %v583_v52 = vsub.f32 1.5, %v582_v51 }
 0x77f   :  { %v5839_v61 = vadd.f32 %v5266_v59, %v595_v58 }
 0x780   :  { %v584_v55 = vmul.f32 %v5314_v46, %v583_v52 }
 0x782   :  { %v588_v56 = vsel %vm587_vm5, %v5314_v46, %v584_v55 }
 0x783   :  { %v590_v57 = vmul.f32 %v588_v56, %v556_v31 }
 0x785   :  { %v596_v60 = vmul.f32 %v5265_v54, %v590_v57  ;;  %v4439_v57 = vld [vmem:[%s5599_s3 + $0x8] sm:$0xf] }
 0x786   :  { %v801_v58 = vsel %vm357_vm3, %v4439_v57, 0 }
 0x787   :  { %v5841_v62 = vadd.f32 %v5266_v59, %v596_v60  ;;  %v4440_v59 = vld [vmem:[%s5599_s3 + $0xc] sm:$0xf]  ;;  %s6621_s3 = sld [smem:[#allocation8_spill]] }
 0x788   :  { %v781_v60 = vsel %vm357_vm3, %v4440_v59, 0 }
 0x789   :  { %v603_v63 = vpack.c.bf16 %v5841_v62, %v5839_v61 }
 0x78b   :  { %4438 = vmatmul.msk.bf16.vlgmr.msrb.gmra.mxu0 %vm196_vm0, %v603_v63  ;;  %v5101_v63 = vld [vmem:[%s5634_s12 + $0x8] sm:$0xff] }
 0x808   :  { %v633_v0 = vpop.f32.mrf.mxu0 }
 0x810   :  { %v635_v1 = vpop.f32.mrf.mxu0 }
 0x811   :  { %v641_v4 = vpack.c.bf16 %v635_v1, %v633_v0  ;;  %v5100_v0 = vld [vmem:[%s5634_s12] sm:$0xff] }
 0x813   :  { %709 = vrot.lane.b32.xlu0 %v641_v4, %s5550_s21  ;;  %711 = vrot.lane.b32.xlu1 %v641_v4, %s5552_s5 }
 0x814   :  { %643 = vrot.lane.b32.xlu2 %v641_v4, %s5551_s1 }
 0x86e   :  { %v644_v5 = vpop.permute.xlu2 %643 }
 0x86f   :  { %v649_v6 = vsel %vm220_vm1, %v644_v5, 0 }
 0x870   :  { %658 = vmatpush.bf16.xpose.msra.mxu1 %v649_v6 }
 0x877   :  { %4441 = vmatmul.msk.bf16.vlgmr.msra.gmra.mxu1 %vm220_vm1, %v641_v4 }
 0x878   :  { %790 = vmatpush.bf16.msrb.mxu1 %v781_v60  ;;  %v5267_v60 = vld [vmem:[%s5604_s8 + $0x1] ss:$0 sm:$0xff]  ;;  %s6622_s8 = sld [smem:[#allocation9_spill]] }
 0x87c   :  { %1053 = vmatpush.bf16.msra.mxu1 %v5101_v63 }
 0x880   :  { %1054 = vmatpush.bf16.msra.mxu1 %v5100_v0 }
 0x885   :  { %v712_v7 = vpop.permute.xlu1 %711  ;;  %v710_v9 = vpop.permute.xlu0 %709 }
 0x886   :  { %v717_v8 = vsel %vm220_vm1, %v712_v7, 0 }
 0x887   :  { %726 = vmatpush.bf16.xpose.msrb.mxu2 %v717_v8 }
 0x88e   :  { %4443 = vmatmul.msk.bf16.vlgmr.msrb.gmra.mxu2 %vm220_vm1, %v710_v9  ;;  %v5878_v9 = vld [vmem:[%s5569_s9] sm:$0xff] }
 0x8f4   :  { %v660_v10 = vpop.f32.mrf.mxu1 }
 0x8f5   :  { %v661_v11 = vadd.f32 %v660_v10, %v5778_v13  ;;  %v5881_v10 = vld [vmem:[%s5569_s9 + $0x8] sm:$0xff]  ;;  %s6618_s9 = sld [smem:[#allocation7_spill]] }
 0x8f7   :  { %v665_v12 = vsel %vm241_vm2, %v661_v11, -inf }
 0x8f8   :  { %666 = vmax.xlane.f32.xlu2 %v665_v12 }
 0x8fc   :  { %v662_v14 = vpop.f32.mrf.mxu1 }
 0x8fd   :  { %v663_v15 = vadd.f32 %v662_v14, %v5785_v20 }
 0x8ff   :  { %v668_v16 = vsel %vm241_vm2, %v663_v15, -inf }
 0x900   :  { %669 = vmax.xlane.f32.xlu1 %v668_v16 }
 0x911   :  { %v728_v17 = vpop.f32.mrf.mxu2 }
 0x912   :  { %v729_v18 = vadd.f32 %v728_v17, %v5778_v13 }
 0x914   :  { %v733_v19 = vsel %vm241_vm2, %v729_v18, -inf }
 0x915   :  { %734 = vmax.xlane.f32.xlu0 %v733_v19 }
 0x919   :  { %v730_v21 = vpop.f32.mrf.mxu2 }
 0x91a   :  { %v731_v22 = vadd.f32 %v730_v21, %v5785_v20 }
 0x91c   :  { %v736_v23 = vsel %vm241_vm2, %v731_v22, -inf }
 0x91d   :  { %737 = vmax.xlane.f32.xlu2 %v736_v23 }
 0x96b   :  { %v667_v24 = vpop.xlane.xlu2 %666 }
 0x96c   :  { %v671_v25 = vsub.f32 %v661_v11, %v667_v24  ;;  %v1027_v11 = vpack.c.bf16 %v5881_v10, %v5878_v9 }
 0x96e   :  { %v673_v26 = vmul.f32 1.442695, %v671_v25 }
 0x970   :  { %5315 = vpow2.f32 %v673_v26 }
 0x973   :  { %v670_v27 = vpop.xlane.xlu1 %669 }
 0x974   :  { %v672_v28 = vsub.f32 %v663_v15, %v670_v27 }
 0x976   :  { %v5316_v29 = vpop.eup %5315  ;;  %v675_v30 = vmul.f32 1.442695, %v672_v28 }
 0x977   :  { %v677_v31 = vsel %vm241_vm2, %v5316_v29, 0.0 }
 0x978   :  { %5317 = vpow2.f32 %v675_v30  ;;  %678 = vadd.xlane.f32.xlu1 %v677_v31 }
 0x97e   :  { %v5318_v13 = vpop.eup %5317 }
 0x97f   :  { %v680_v3 = vsel %vm241_vm2, %v5318_v13, 0.0 }
 0x980   :  { %681 = vadd.xlane.f32.xlu2 %v680_v3 }
 0x988   :  { %v735_v20 = vpop.xlane.xlu0 %734 }
 0x989   :  { %v739_v32 = vsub.f32 %v729_v18, %v735_v20 }
 0x98b   :  { %v741_v33 = vmul.f32 1.442695, %v739_v32 }
 0x98d   :  { %5319 = vpow2.f32 %v741_v33 }
 0x990   :  { %v738_v34 = vpop.xlane.xlu2 %737 }
 0x991   :  { %688 = vrot.lane.b32.xlu1 %v641_v4, %s5554_s13  ;;  %v740_v35 = vsub.f32 %v731_v22, %v738_v34  ;;  %v5095_v34 = vld [vmem:[%s5614_s19 + $0x18] sm:$0xff] }
 0x992   :  { %904 = vmatpush.bf16.msra.mxu2 %v5095_v34 }
 0x993   :  { %v5320_v36 = vpop.eup %5319  ;;  %v743_v37 = vmul.f32 1.442695, %v740_v35 }
 0x994   :  { %v745_v38 = vsel %vm241_vm2, %v5320_v36, 0.0 }
 0x995   :  { %5321 = vpow2.f32 %v743_v37  ;;  %746 = vadd.xlane.f32.xlu0 %v745_v38  ;;  %v5094_v38 = vld [vmem:[%s5614_s19 + $0x10] sm:$0xff]  ;;  %s6624_s19 = sld [smem:[#allocation13_spill]] }
 0x996   :  { %905 = vmatpush.bf16.msra.mxu2 %v5094_v38 }
 0x99b   :  { %v5322_v39 = vpop.eup %5321 }
 0x99c   :  { %v748_v40 = vsel %vm241_vm2, %v5322_v39, 0.0 }
 0x99d   :  { %749 = vadd.xlane.f32.xlu2 %v748_v40 }
 0x9a9   :  { %756 = vrot.lane.b32.xlu0 %v641_v4, %s5553_s2 }
 0x9eb   :  { %v679_v42 = vpop.xlane.xlu1 %678 }
 0x9f3   :  { %v682_v41 = vpop.xlane.xlu2 %681 }
 0x9f4   :  { %5323 = vrcp.f32 %v682_v41 }
 0x9f5   :  { %5325 = vrcp.f32 %v679_v42 }
 0x9fa   :  { %v5324_v43 = vpop.eup %5323 }
 0x9fb   :  { %v5326_v44 = vpop.eup %5325  ;;  %v686_v45 = vmul.f32 %v5324_v43, %v5318_v13 }
 0x9fc   :  { %v685_v46 = vmul.f32 %v5326_v44, %v5316_v29  ;;  %v5099_v44 = vld [vmem:[%s5619_s24 + $0x38] sm:$0xff] }
 0x9fe   :  { %v687_v48 = vpack.c.bf16 %v686_v45, %v685_v46  ;;  %v5098_v46 = vld [vmem:[%s5619_s24 + $0x30] sm:$0xff] }
 0xa03   :  { %v689_v47 = vpop.permute.xlu1 %688 }
 0xa04   :  { %701 = vmatpush.bf16.msrb.mxu3 %v689_v47 }
 0xa07   :  { %4442 = vmatmul.msk.bf16.vlgmr.msrb.gmra.mxu3 %vm241_vm2, %v687_v48 }
 0xa08   :  { %v747_v49 = vpop.xlane.xlu0 %746  ;;  %810 = vmatpush.bf16.msra.mxu3 %v801_v58 }
 0xa10   :  { %v750_v50 = vpop.xlane.xlu2 %749 }
 0xa11   :  { %5327 = vrcp.f32 %v750_v50  ;;  %v5097_v50 = vld [vmem:[%s5619_s24 + $0x28] sm:$0xff] }
 0xa12   :  { %5329 = vrcp.f32 %v747_v49 }
 0xa17   :  { %v5328_v51 = vpop.eup %5327 }
 0xa18   :  { %v5330_v52 = vpop.eup %5329  ;;  %v754_v53 = vmul.f32 %v5328_v51, %v5322_v39 }
 0xa19   :  { %v753_v54 = vmul.f32 %v5330_v52, %v5320_v36 }
 0xa1b   :  { %v757_v55 = vpop.permute.xlu0 %756  ;;  %v755_v56 = vpack.c.bf16 %v754_v53, %v753_v54  ;;  %v5096_v54 = vld [vmem:[%s5619_s24 + $0x20] sm:$0xff]  ;;  %s6625_s24 = sld [smem:[#allocation14_spill]] }
 0xa1c   :  { %769 = vmatpush.bf16.msra.mxu0 %v757_v55 }
 0xa1f   :  { %4444 = vmatmul.msk.bf16.vlgmr.msra.gmra.mxu0 %vm241_vm2, %v755_v56 }
 0xa20   :  { %955 = vmatpush.bf16.msrb.mxu0 %v5099_v44 }
 0xa24   :  { %956 = vmatpush.bf16.msrb.mxu0 %v5098_v46 }
 0xa28   :  { %957 = vmatpush.bf16.msrb.mxu0 %v5097_v50 }
 0xa2c   :  { %958 = vmatpush.bf16.msrb.mxu0 %v5096_v54 }
 0xa8a   :  { %v703_v1 = vpop.f32.mrf.mxu3 }
 0xa92   :  { %v705_v4 = vpop.f32.mrf.mxu3 }
 0xa93   :  { %v708_v5 = vpack.c.bf16 %v705_v4, %v703_v1  ;;  %v5268_v4 = vld [vmem:[%s5609_s14 + $0x1] ss:$0 sm:$0xff]  ;;  %s6623_s14 = sld [smem:[#allocation12_spill]] }
 0xa95   :  { %4446 = vmatmul.msk.bf16.vlgmr.msra.gmra.mxu3 %vm220_vm1, %v708_v5 }
 0xa9c   :  { %v771_v6 = vpop.f32.mrf.mxu0 }
 0xaa4   :  { %v773_v7 = vpop.f32.mrf.mxu0 }
 0xaa5   :  { %v776_v8 = vpack.c.bf16 %v773_v7, %v771_v6  ;;  %v5917_v7 = vld [vmem:[%s5579_s17] sm:$0xff] }
 0xaa7   :  { %4445 = vmatmul.msk.bf16.vlgmr.msrb.gmra.mxu1 %vm220_vm1, %v776_v8 }
 0xab7   :  { %4497 = vmatmul.msk.bf16.vlgmr.msra.gmra.mxu1 %vm196_vm0, %v1027_v11 }
 0xb18   :  { %v812_v12 = vpop.f32.mrf.mxu3 }
 0xb20   :  { %v814_v18 = vpop.f32.mrf.mxu3 }
 0xb24   :  { %v792_v14 = vpop.f32.mrf.mxu1 }
 0xb25   :  { %v813_v15 = vadd.f32 %v812_v12, %v792_v14 }
 0xb27   :  { %v817_v16 = vadd.f32 %v813_v15, %v5839_v61 }
 0xb29   :  { %v819_v17 = vsel %vm196_vm0, %v817_v16, 0.0 }
 0xb2a   :  { %820 = vadd.xlane.f32.xlu2 %v819_v17 }
 0xb2c   :  { %v794_v19 = vpop.f32.mrf.mxu1 }
 0xb2d   :  { %v815_v21 = vadd.f32 %v814_v18, %v794_v19  ;;  %v5929_v18 = vld [vmem:[%s5579_s17 + $0x8] sm:$0xff]  ;;  %s6619_s17 = sld [smem:[#allocation10_spill]] }
 0xb2f   :  { %v818_v22 = vadd.f32 %v815_v21, %v5841_v62 }
 0xb31   :  { %v822_v23 = vsel %vm196_vm0, %v818_v22, 0.0 }
 0xb32   :  { %823 = vadd.xlane.f32.xlu2 %v822_v23 }
 0xb34   :  { %v1056_v24 = vpop.f32.mrf.mxu1 }
 0xb3c   :  { %v1058_v25 = vpop.f32.mrf.mxu1 }
 0xb3d   :  { %v5890_v26 = vpack.c.bf16 %v1058_v25, %v1056_v24 }
 0xb4a   :  { %1065 = vrot.lane.b32.xlu2 %v5890_v26, %s5551_s1 }
 0xb52   :  { %1133 = vrot.lane.b32.xlu2 %v5890_v26, %s5552_s5 }
 0xb5a   :  { %1131 = vrot.lane.b32.xlu2 %v5890_v26, %s5550_s21 }
 0xb9d   :  { %v821_v61 = vpop.xlane.xlu2 %820 }
 0xb9e   :  { %v825_v62 = vmul.f32 %v821_v61, %v5809_v2 }
 0xba0   :  { %v827_v27 = vsub.f32 %v817_v16, %v825_v62 }
 0xba2   :  { %v829_v28 = vmul.f32 %v827_v27, %v827_v27 }
 0xba4   :  { %v831_v29 = vsel %vm196_vm0, %v829_v28, 0.0 }
 0xba5   :  { %832 = vadd.xlane.f32.xlu1 %v831_v29  ;;  %v824_v30 = vpop.xlane.xlu2 %823 }
 0xba6   :  { %v826_v31 = vmul.f32 %v824_v30, %v5809_v2 }
 0xba8   :  { %v828_v13 = vsub.f32 %v818_v22, %v826_v31 }
 0xbaa   :  { %v830_v3 = vmul.f32 %v828_v13, %v828_v13 }
 0xbac   :  { %v834_v20 = vsel %vm196_vm0, %v830_v3, 0.0 }
 0xbad   :  { %835 = vadd.xlane.f32.xlu0 %v834_v20  ;;  %v1066_v32 = vpop.permute.xlu2 %1065 }
 0xbae   :  { %v1071_v33 = vsel %vm220_vm1, %v1066_v32, 0 }
 0xbaf   :  { %1080 = vmatpush.bf16.xpose.msrb.mxu3 %v1071_v33 }
 0xbb5   :  { %v1134_v57 = vpop.permute.xlu2 %1133 }
 0xbb6   :  { %4498 = vmatmul.msk.bf16.vlgmr.msrb.gmra.mxu3 %vm220_vm1, %v5890_v26  ;;  %v1139_v58 = vsel %vm220_vm1, %v1134_v57, 0 }
 0xbb7   :  { %1148 = vmatpush.bf16.xpose.msra.mxu0 %v1139_v58 }
 0xc18   :  { %v833_v35 = vpop.xlane.xlu1 %832 }
 0xc19   :  { %v837_v36 = vmul.f32 %v833_v35, %v5809_v2 }
 0xc1b   :  { %v839_v37 = vadd.f32 1e-05, %v837_v36 }
 0xc1d   :  { %5331 = vrsqrt.f32 %v839_v37  ;;  %vm847_vm7 = vweird.f32 %v839_v37 }
 0xc20   :  { %v836_v39 = vpop.xlane.xlu0 %835 }
 0xc21   :  { %v838_v40 = vmul.f32 %v836_v39, %v5809_v2 }
 0xc23   :  { %v5332_v41 = vpop.eup %5331  ;;  %v840_v42 = vadd.f32 1e-05, %v838_v40 }
 0xc24   :  { %v842_v43 = vmul.f32 %v5332_v41, %v839_v37  ;;  %vm848_vm6 = vweird.f32 %v5332_v41 }
 0xc25   :  { %5333 = vrsqrt.f32 %v840_v42  ;;  %vm849_vm8 = vmor %vm847_vm7, %vm848_vm6  ;;  %vm857_vm10 = vweird.f32 %v840_v42 }
 0xc26   :  { %v843_v45 = vmul.f32 %v5332_v41, %v842_v43 }
 0xc28   :  { %v844_v47 = vmul.f32 0.5, %v843_v45 }
 0xc2a   :  { %v845_v48 = vsub.f32 1.5, %v844_v47 }
 0xc2b   :  { %v5334_v49 = vpop.eup %5333 }
 0xc2c   :  { %v846_v51 = vmul.f32 %v5332_v41, %v845_v48  ;;  %v852_v52 = vmul.f32 %v5334_v49, %v840_v42  ;;  %vm858_vm9 = vweird.f32 %v5334_v49 }
 0xc2d   :  { %vm859_vm12 = vmor %vm857_vm10, %vm858_vm9 }
 0xc2e   :  { %v853_v53 = vmul.f32 %v5334_v49, %v852_v52  ;;  %v850_v55 = vsel %vm849_vm8, %v5332_v41, %v846_v51 }
 0xc2f   :  { %v861_v63 = vmul.f32 %v850_v55, %v827_v27  ;;  %v1132_v27 = vpop.permute.xlu2 %1131 }
 0xc30   :  { %v854_v56 = vmul.f32 0.5, %v853_v53 }
 0xc31   :  { %v868_v5 = vmul.f32 %v5267_v60, %v861_v63 }
 0xc32   :  { %v855_v59 = vsub.f32 1.5, %v854_v56 }
 0xc33   :  { %v5920_v14 = vadd.f32 %v5268_v4, %v868_v5 }
 0xc34   :  { %v856_v0 = vmul.f32 %v5334_v49, %v855_v59 }
 0xc36   :  { %v860_v1 = vsel %vm859_vm12, %v5334_v49, %v856_v0 }
 0xc37   :  { %v862_v6 = vmul.f32 %v860_v1, %v828_v13 }
 0xc39   :  { %v869_v8 = vmul.f32 %v5267_v60, %v862_v6  ;;  %v1082_v11 = vpop.f32.mrf.mxu3 }
 0xc3a   :  { %v1083_v12 = vadd.f32 %v1082_v11, %v5917_v7  ;;  %v1061_v11 = vld [vmem:[%s6618_s9] sm:$0xf] }
 0xc3b   :  { %v5922_v15 = vadd.f32 %v5268_v4, %v869_v8 }
 0xc3c   :  { %v1087_v16 = vsel %vm241_vm2, %v1083_v12, -inf }
 0xc3d   :  { %v877_v17 = vpack.c.bf16 %v5922_v15, %v5920_v14  ;;  %1088 = vmax.xlane.f32.xlu1 %v1087_v16  ;;  %v1062_v16 = vld [vmem:[%s6618_s9 + $0x4] sm:$0xf] }
 0xc3f   :  { %4461 = vmatmul.msk.bf16.vlgmr.msra.gmra.mxu2 %vm196_vm0, %v877_v17  ;;  %v1203_v17 = vsel %vm357_vm3, %v1062_v16, 0 }
 0xc40   :  { %1212 = vmatpush.bf16.msra.mxu3 %v1203_v17 }
 0xc41   :  { %v1084_v19 = vpop.f32.mrf.mxu3 }
 0xc42   :  { %v1085_v21 = vadd.f32 %v1084_v19, %v5929_v18 }
 0xc44   :  { %v1090_v22 = vsel %vm241_vm2, %v1085_v21, -inf }
 0xc45   :  { %1091 = vmax.xlane.f32.xlu2 %v1090_v22 }
 0xcb0   :  { %v1089_v29 = vpop.xlane.xlu1 %1088 }
 0xcb1   :  { %v1093_v31 = vsub.f32 %v1083_v12, %v1089_v29  ;;  %v1223_v12 = vsel %vm357_vm3, %v1061_v11, 0 }
 0xcb3   :  { %v1095_v13 = vmul.f32 1.442695, %v1093_v31 }
 0xcb5   :  { %5335 = vpow2.f32 %v1095_v13 }
 0xcb8   :  { %v1092_v3 = vpop.xlane.xlu2 %1091 }
 0xcb9   :  { %v1094_v33 = vsub.f32 %v1085_v21, %v1092_v3 }
 0xcbb   :  { %v1097_v35 = vmul.f32 1.442695, %v1094_v33  ;;  %v5336_v36 = vpop.eup %5335 }
 0xcbc   :  { %v1099_v40 = vsel %vm241_vm2, %v5336_v36, 0.0 }
 0xcbd   :  { %5337 = vpow2.f32 %v1097_v35 }
 0xcc2   :  { %v907_v23 = vpop.f32.mrf.mxu2 }
 0xcc3   :  { %v912_v25 = vmax.f32 %v907_v23, 0.0  ;;  %v5338_v41 = vpop.eup %5337 }
 0xcc4   :  { %v1102_v42 = vsel %vm241_vm2, %v5338_v41, 0.0 }
 0xcca   :  { %v909_v24 = vpop.f32.mrf.mxu2 }
 0xccb   :  { %v913_v61 = vmax.f32 %v909_v24, 0.0 }
 0xccd   :  { %v914_v62 = vpack.c.bf16 %v913_v61, %v912_v25 }
 0xccf   :  { %4486 = vmatmul.msk.bf16.vlgmr.msrb.gmra.mxu0 %vm529_vm11, %v914_v62 }
 0xcdf   :  { %4500 = vmatmul.msk.bf16.vlgmr.msra.gmra.mxu0 %vm220_vm1, %v1132_v27 }
 0xd4c   :  { %v5935_v28 = vpop.f32.mrf.mxu0 }
 0xd54   :  { %v5937_v30 = vpop.f32.mrf.mxu0 }
 0xd5c   :  { %v1150_v20 = vpop.f32.mrf.mxu0 }
 0xd5d   :  { %v1151_v32 = vadd.f32 %v1150_v20, %v5917_v7 }
 0xd5f   :  { %v1155_v34 = vsel %vm241_vm2, %v1151_v32, -inf }
 0xd60   :  { %1156 = vmax.xlane.f32.xlu0 %v1155_v34 }
 0xd64   :  { %v1152_v37 = vpop.f32.mrf.mxu0 }
 0xd65   :  { %v1153_v38 = vadd.f32 %v1152_v37, %v5929_v18 }
 0xd67   :  { %v1158_v39 = vsel %vm241_vm2, %v1153_v38, -inf }
 0xd68   :  { %1159 = vmax.xlane.f32.xlu1 %v1158_v39  ;;  %1100 = vadd.xlane.f32.xlu0 %v1099_v40 }
 0xd70   :  { %1103 = vadd.xlane.f32.xlu1 %v1102_v42  ;;  %v5103_v42 = vld [vmem:[%s6619_s17 + $0x8] sm:$0xff] }
 0xd71   :  { %1323 = vmatpush.bf16.msrb.mxu0 %v5103_v42 }
 0xdd3   :  { %v1157_v43 = vpop.xlane.xlu0 %1156 }
 0xdd4   :  { %v1161_v44 = vsub.f32 %v1151_v32, %v1157_v43 }
 0xdd6   :  { %v1163_v45 = vmul.f32 1.442695, %v1161_v44 }
 0xdd8   :  { %5339 = vpow2.f32 %v1163_v45 }
 0xddb   :  { %v1160_v46 = vpop.xlane.xlu1 %1159  ;;  %v1101_v53 = vpop.xlane.xlu0 %1100 }
 0xddc   :  { %v1162_v47 = vsub.f32 %v1153_v38, %v1160_v46  ;;  %v5102_v46 = vld [vmem:[%s6619_s17] sm:$0xff] }
 0xddd   :  { %1324 = vmatpush.bf16.msrb.mxu0 %v5102_v46 }
 0xdde   :  { %v5340_v48 = vpop.eup %5339  ;;  %v1165_v49 = vmul.f32 1.442695, %v1162_v47  ;;  %v5107_v47 = vld [vmem:[%s6620_s29 + $0x18] sm:$0xff] }
 0xddf   :  { %v1167_v50 = vsel %vm241_vm2, %v5340_v48, 0.0 }
 0xde0   :  { %5341 = vpow2.f32 %v1165_v49  ;;  %1168 = vadd.xlane.f32.xlu0 %v1167_v50 }
 0xde3   :  { %v1104_v54 = vpop.xlane.xlu1 %1103 }
 0xde4   :  { %5343 = vrcp.f32 %v1104_v54 }
 0xde5   :  { %5345 = vrcp.f32 %v1101_v53 }
 0xde6   :  { %v5342_v51 = vpop.eup %5341 }
 0xde7   :  { %v1170_v52 = vsel %vm241_vm2, %v5342_v51, 0.0 }
 0xde8   :  { %1171 = vadd.xlane.f32.xlu1 %v1170_v52 }
 0xdea   :  { %v5344_v56 = vpop.eup %5343 }
 0xdeb   :  { %v5346_v57 = vpop.eup %5345  ;;  %v1108_v58 = vmul.f32 %v5344_v56, %v5338_v41 }
 0xdec   :  { %v1107_v60 = vmul.f32 %v5346_v57, %v5336_v36 }
 0xdee   :  { %v1109_v0 = vpack.c.bf16 %v1108_v58, %v1107_v60 }
 0xdf4   :  { %1110 = vrot.lane.b32.xlu0 %v5890_v26, %s5554_s13 }
 0xe01   :  { %1178 = vrot.lane.b32.xlu1 %v5890_v26, %s5553_s2 }
 0xe53   :  { %v1169_v55 = vpop.xlane.xlu0 %1168 }
 0xe5b   :  { %v1172_v59 = vpop.xlane.xlu1 %1171 }
 0xe5c   :  { %5347 = vrcp.f32 %v1172_v59 }
 0xe5d   :  { %5349 = vrcp.f32 %v1169_v55 }
 0xe62   :  { %v5348_v26 = vpop.eup %5347 }
 0xe63   :  { %v5350_v1 = vpop.eup %5349  ;;  %v1176_v4 = vmul.f32 %v5348_v26, %v5342_v51  ;;  %v5269_v26 = vld [vmem:[%s6621_s3] ss:$0 sm:$0xff] }
 0xe64   :  { %v1175_v5 = vmul.f32 %v5350_v1, %v5340_v48 }
 0xe66   :  { %v1111_v63 = vpop.permute.xlu0 %1110  ;;  %v1177_v8 = vpack.c.bf16 %v1176_v4, %v1175_v5 }
 0xe67   :  { %1123 = vmatpush.bf16.msrb.mxu2 %v1111_v63 }
 0xe6a   :  { %4499 = vmatmul.msk.bf16.vlgmr.msrb.gmra.mxu2 %vm241_vm2, %v1109_v0 }
 0xe6b   :  { %1232 = vmatpush.bf16.msra.mxu2 %v1223_v12 }
 0xe73   :  { %v1179_v6 = vpop.permute.xlu1 %1178 }
 0xe74   :  { %1191 = vmatpush.bf16.msrb.mxu1 %v1179_v6  ;;  %v5270_v6 = vld [vmem:[%s6622_s8] ss:$0 sm:$0xff] }
 0xe77   :  { %4501 = vmatmul.msk.bf16.vlgmr.msrb.gmra.mxu1 %vm241_vm2, %v1177_v8 }
 0xe78   :  { %1373 = vmatpush.bf16.msra.mxu1 %v5107_v47 }
 0xeed   :  { %v1125_v19 = vpop.f32.mrf.mxu2 }
 0xef4   :  { %v1193_v21 = vpop.f32.mrf.mxu1 }
 0xef5   :  { %v1127_v22 = vpop.f32.mrf.mxu2 }
 0xef6   :  { %v1130_v23 = vpack.c.bf16 %v1127_v22, %v1125_v19  ;;  %v5105_v22 = vld [vmem:[%s6620_s29 + $0x8] sm:$0xff] }
 0xef8   :  { %4503 = vmatmul.msk.bf16.vlgmr.msra.gmra.mxu2 %vm220_vm1, %v1130_v23  ;;  %v5104_v23 = vld [vmem:[%s6620_s29] sm:$0xff] }
 0xefc   :  { %v1195_v24 = vpop.f32.mrf.mxu1 }
 0xefd   :  { %v1198_v25 = vpack.c.bf16 %v1195_v24, %v1193_v21  ;;  %v5106_v21 = vld [vmem:[%s6620_s29 + $0x10] sm:$0xff] }
 0xefe   :  { %1374 = vmatpush.bf16.msra.mxu1 %v5106_v21 }
 0xeff   :  { %4502 = vmatmul.msk.bf16.vlgmr.msra.gmra.mxu3 %vm220_vm1, %v1198_v25 }
 0xf02   :  { %1375 = vmatpush.bf16.msra.mxu1 %v5105_v22 }
 0xf06   :  { %1376 = vmatpush.bf16.msra.mxu1 %v5104_v23 }
 0xf7b   :  { %v1234_v61 = vpop.f32.mrf.mxu2 }
 0xf82   :  { %v1214_v62 = vpop.f32.mrf.mxu3 }
 0xf83   :  { %v1235_v27 = vadd.f32 %v1234_v61, %v1214_v62  ;;  %v1236_v13 = vpop.f32.mrf.mxu2 }
 0xf85   :  { %v1239_v29 = vadd.f32 %v1235_v27, %v5878_v9 }
 0xf87   :  { %v1241_v31 = vsel %vm196_vm0, %v1239_v29, 0.0 }
 0xf88   :  { %1242 = vadd.xlane.f32.xlu2 %v1241_v31 }
 0xf8a   :  { %v1216_v3 = vpop.f32.mrf.mxu3 }
 0xf8b   :  { %v1237_v20 = vadd.f32 %v1236_v13, %v1216_v3 }
 0xf8d   :  { %v1240_v32 = vadd.f32 %v1237_v20, %v5881_v10 }
 0xf8f   :  { %v1244_v33 = vsel %vm196_vm0, %v1240_v32, 0.0 }
 0xf90   :  { %1245 = vadd.xlane.f32.xlu0 %v1244_v33 }
 0xffb   :  { %v1243_v34 = vpop.xlane.xlu2 %1242 }
 0xffc   :  { %v1247_v35 = vmul.f32 %v1243_v34, %v5809_v2 }
 0xffe   :  { %v1249_v36 = vsub.f32 %v1239_v29, %v1247_v35 }
0x1000   :  { %v1251_v37 = vmul.f32 %v1249_v36, %v1249_v36 }
0x1002   :  { %v1253_v9 = vsel %vm196_vm0, %v1251_v37, 0.0 }
0x1003   :  { %1254 = vadd.xlane.f32.xlu2 %v1253_v9  ;;  %v1246_v38 = vpop.xlane.xlu0 %1245 }
0x1004   :  { %v1248_v39 = vmul.f32 %v1246_v38, %v5809_v2 }
0x1006   :  { %v1250_v40 = vsub.f32 %v1240_v32, %v1248_v39 }
0x1008   :  { %v1252_v41 = vmul.f32 %v1250_v40, %v1250_v40 }
0x100a   :  { %v1256_v10 = vsel %vm196_vm0, %v1252_v41, 0.0 }
0x100b   :  { %1257 = vadd.xlane.f32.xlu1 %v1256_v10  ;;  %v5109_v10 = vld [vmem:[%s5634_s12 + $0x18] sm:$0xff] }
0x100c   :  { %1466 = vmatpush.bf16.msrb.mxu3 %v5109_v10 }
0x1076   :  { %v1255_v43 = vpop.xlane.xlu2 %1254 }
0x1077   :  { %v1259_v44 = vmul.f32 %v1255_v43, %v5809_v2 }
0x1079   :  { %v1261_v45 = vadd.f32 1e-05, %v1259_v44 }
0x107b   :  { %5351 = vrsqrt.f32 %v1261_v45  ;;  %vm1269_vm14 = vweird.f32 %v1261_v45 }
0x107e   :  { %v1258_v48 = vpop.xlane.xlu1 %1257 }
0x107f   :  { %v1260_v49 = vmul.f32 %v1258_v48, %v5809_v2 }
0x1081   :  { %v5352_v50 = vpop.eup %5351  ;;  %v1262_v51 = vadd.f32 1e-05, %v1260_v49 }
0x1082   :  { %v1264_v52 = vmul.f32 %v5352_v50, %v1261_v45  ;;  %vm1270_vm13 = vweird.f32 %v5352_v50  ;;  %v5108_v45 = vld [vmem:[%s5634_s12 + $0x10] sm:$0xff]  ;;  %s6626_s12 = sld [smem:[#allocation6_spill]] }
0x1083   :  { %5353 = vrsqrt.f32 %v1262_v51  ;;  %vm1271_vm15 = vmor %vm1269_vm14, %vm1270_vm13  ;;  %vm1279_vm5 = vweird.f32 %v1262_v51  ;;  %1467 = vmatpush.bf16.msrb.mxu3 %v5108_v45 }
0x1084   :  { %v1265_v53 = vmul.f32 %v5352_v50, %v1264_v52 }
0x1086   :  { %v1266_v54 = vmul.f32 0.5, %v1265_v53 }
0x1088   :  { %v1267_v55 = vsub.f32 1.5, %v1266_v54 }
0x1089   :  { %v5354_v56 = vpop.eup %5353 }
0x108a   :  { %v1268_v57 = vmul.f32 %v5352_v50, %v1267_v55  ;;  %v1274_v58 = vmul.f32 %v5354_v56, %v1262_v51  ;;  %vm1280_vm4 = vweird.f32 %v5354_v56 }
0x108b   :  { %vm1281_vm6 = vmor %vm1279_vm5, %vm1280_vm4 }
0x108c   :  { %v1275_v59 = vmul.f32 %v5354_v56, %v1274_v58  ;;  %v1272_v60 = vsel %vm1271_vm15, %v5352_v50, %v1268_v57 }
0x108d   :  { %v1283_v1 = vmul.f32 %v1272_v60, %v1249_v36 }
0x108e   :  { %v1276_v63 = vmul.f32 0.5, %v1275_v59 }
0x108f   :  { %v1289_v8 = vmul.f32 %v5269_v26, %v1283_v1 }
0x1090   :  { %v1277_v0 = vsub.f32 1.5, %v1276_v63  ;;  %v5271_v63 = vld [vmem:[%s6623_s14] ss:$0 sm:$0xff] }
0x1091   :  { %v1295_v16 = vadd.f32 %v5270_v6, %v1289_v8 }
0x1092   :  { %v1278_v4 = vmul.f32 %v5354_v56, %v1277_v0 }
0x1094   :  { %v1282_v5 = vsel %vm1281_vm6, %v5354_v56, %v1278_v4  ;;  %v5272_v4 = vld [vmem:[%s6624_s19] ss:$0 sm:$0xff] }
0x1095   :  { %v1284_v11 = vmul.f32 %v1282_v5, %v1250_v40 }
0x1097   :  { %v1290_v12 = vmul.f32 %v5269_v26, %v1284_v11 }
0x1099   :  { %v1296_v17 = vadd.f32 %v5270_v6, %v1290_v12 }
0x109b   :  { %v1297_v19 = vpack.c.bf16 %v1296_v17, %v1295_v16 }
0x109d   :  { %4512 = vmatmul.msk.bf16.vlgmr.msrb.gmra.mxu0 %vm196_vm0, %v1297_v19 }
0x111a   :  { %v1326_v24 = vpop.f32.mrf.mxu0 }
0x111b   :  { %v1331_v61 = vmax.f32 %v1326_v24, 0.0 }
0x1122   :  { %v1328_v25 = vpop.f32.mrf.mxu0 }
0x1123   :  { %v1332_v62 = vmax.f32 %v1328_v25, 0.0 }
0x1125   :  { %v1333_v27 = vpack.c.bf16 %v1332_v62, %v1331_v61 }
0x1127   :  { %4529 = vmatmul.msk.bf16.vlgmr.msra.gmra.mxu1 %vm529_vm11, %v1333_v27 }
0x11a4   :  { %v1378_v29 = vpop.f32.mrf.mxu1 }
0x11a5   :  { %v1379_v31 = vadd.f32 %v1378_v29, %v1295_v16 }
0x11a7   :  { %v1383_v13 = vsel %vm196_vm0, %v1379_v31, 0.0 }
0x11a8   :  { %1384 = vadd.xlane.f32.xlu2 %v1383_v13 }
0x11ac   :  { %v1380_v3 = vpop.f32.mrf.mxu1 }
0x11ad   :  { %v1381_v20 = vadd.f32 %v1380_v3, %v1296_v17 }
0x11af   :  { %v1386_v32 = vsel %vm196_vm0, %v1381_v20, 0.0 }
0x11b0   :  { %1387 = vadd.xlane.f32.xlu2 %v1386_v32 }
0x121b   :  { %v1385_v33 = vpop.xlane.xlu2 %1384 }
0x121c   :  { %v1389_v34 = vmul.f32 %v1385_v33, %v5809_v2 }
0x121e   :  { %v1391_v35 = vsub.f32 %v1379_v31, %v1389_v34 }
0x1220   :  { %v1393_v36 = vmul.f32 %v1391_v35, %v1391_v35 }
0x1222   :  { %v1395_v37 = vsel %vm196_vm0, %v1393_v36, 0.0 }
0x1223   :  { %1396 = vadd.xlane.f32.xlu2 %v1395_v37  ;;  %v1388_v9 = vpop.xlane.xlu2 %1387 }
0x1224   :  { %v1390_v38 = vmul.f32 %v1388_v9, %v5809_v2 }
0x1226   :  { %v1392_v39 = vsub.f32 %v1381_v20, %v1390_v38 }
0x1228   :  { %v1394_v40 = vmul.f32 %v1392_v39, %v1392_v39 }
0x122a   :  { %v1398_v41 = vsel %vm196_vm0, %v1394_v40, 0.0 }
0x122b   :  { %1399 = vadd.xlane.f32.xlu2 %v1398_v41 }
0x1296   :  { %v1397_v42 = vpop.xlane.xlu2 %1396 }
0x1297   :  { %v1401_v43 = vmul.f32 %v1397_v42, %v5809_v2 }
0x1299   :  { %v1403_v44 = vadd.f32 1e-05, %v1401_v43 }
0x129b   :  { %5355 = vrsqrt.f32 %v1403_v44  ;;  %vm1411_vm8 = vweird.f32 %v1403_v44 }
0x129e   :  { %v1400_v46 = vpop.xlane.xlu2 %1399 }
0x129f   :  { %v1402_v47 = vmul.f32 %v1400_v46, %v5809_v2 }
0x12a1   :  { %v5356_v48 = vpop.eup %5355  ;;  %v1404_v49 = vadd.f32 1e-05, %v1402_v47 }
0x12a2   :  { %v1406_v50 = vmul.f32 %v5356_v48, %v1403_v44  ;;  %vm1412_vm7 = vweird.f32 %v5356_v48 }
0x12a3   :  { %5357 = vrsqrt.f32 %v1404_v49  ;;  %vm1413_vm9 = vmor %vm1411_vm8, %vm1412_vm7  ;;  %vm1421_vm12 = vweird.f32 %v1404_v49 }
0x12a4   :  { %v1407_v51 = vmul.f32 %v5356_v48, %v1406_v50 }
0x12a6   :  { %v1408_v52 = vmul.f32 0.5, %v1407_v51 }
0x12a8   :  { %v1409_v53 = vsub.f32 1.5, %v1408_v52 }
0x12a9   :  { %v5358_v54 = vpop.eup %5357 }
0x12aa   :  { %v1410_v55 = vmul.f32 %v5356_v48, %v1409_v53  ;;  %v1416_v56 = vmul.f32 %v5358_v54, %v1404_v49  ;;  %vm1422_vm10 = vweird.f32 %v5358_v54  ;;  %v6021_v53 = vadd.f32 %v5935_v28, %v5920_v14 }
0x12ab   :  { %vm1423_vm13 = vmor %vm1421_vm12, %vm1422_vm10 }
0x12ac   :  { %v1417_v57 = vmul.f32 %v5358_v54, %v1416_v56  ;;  %v1414_v58 = vsel %vm1413_vm9, %v5356_v48, %v1410_v55 }
0x12ad   :  { %v1425_v0 = vmul.f32 %v1414_v58, %v1391_v35 }
0x12ae   :  { %v1418_v59 = vmul.f32 0.5, %v1417_v57 }
0x12af   :  { %v1431_v5 = vmul.f32 %v5271_v63, %v1425_v0 }
0x12b0   :  { %v1419_v60 = vsub.f32 1.5, %v1418_v59 }
0x12b1   :  { %v5991_v11 = vadd.f32 %v5272_v4, %v1431_v5 }
0x12b2   :  { %v1420_v26 = vmul.f32 %v5358_v54, %v1419_v60 }
0x12b4   :  { %v1424_v1 = vsel %vm1423_vm13, %v5358_v54, %v1420_v26  ;;  %v965_v54 = vsel %vm196_vm0, %v6021_v53, 0.0 }
0x12b5   :  { %v1426_v6 = vmul.f32 %v1424_v1, %v1392_v39 }
0x12b7   :  { %v1432_v8 = vmul.f32 %v5271_v63, %v1426_v6 }
0x12b9   :  { %v5993_v12 = vadd.f32 %v5272_v4, %v1432_v8 }
0x12bb   :  { %v1439_v16 = vpack.c.bf16 %v5993_v12, %v5991_v11 }
0x12bd   :  { %4542 = vmatmul.msk.bf16.vlgmr.msrb.gmra.mxu3 %vm196_vm0, %v1439_v16  ;;  %v4544_v16 = vld [vmem:[%s6618_s9 + $0xc] sm:$0xf] }
0x1340   :  { %v1469_v17 = vpop.f32.mrf.mxu3 }
0x1348   :  { %v1471_v19 = vpop.f32.mrf.mxu3 }
0x1349   :  { %v1477_v21 = vpack.c.bf16 %v1471_v19, %v1469_v17  ;;  %v1617_v17 = vsel %vm357_vm3, %v4544_v16, 0  ;;  %v4543_v19 = vld [vmem:[%s6618_s9 + $0x8] sm:$0xf] }
0x134b   :  { %1545 = vrot.lane.b32.xlu1 %v1477_v21, %s5550_s21  ;;  %1479 = vrot.lane.b32.xlu2 %v1477_v21, %s5551_s1 }
0x134c   :  { %1547 = vrot.lane.b32.xlu0 %v1477_v21, %s5552_s5 }
0x13a5   :  { %v1480_v22 = vpop.permute.xlu2 %1479 }
0x13a6   :  { %v1485_v23 = vsel %vm220_vm1, %v1480_v22, 0 }
0x13a7   :  { %1494 = vmatpush.bf16.xpose.msrb.mxu2 %v1485_v23 }
0x13ae   :  { %4545 = vmatmul.msk.bf16.vlgmr.msrb.gmra.mxu2 %vm220_vm1, %v1477_v21 }
0x13af   :  { %1626 = vmatpush.bf16.msra.mxu2 %v1617_v17 }
0x13bd   :  { %v1546_v61 = vpop.permute.xlu1 %1545 }
0x13be   :  { %v1548_v24 = vpop.permute.xlu0 %1547 }
0x13bf   :  { %v1553_v25 = vsel %vm220_vm1, %v1548_v24, 0 }
0x13c0   :  { %1562 = vmatpush.bf16.xpose.msrb.mxu1 %v1553_v25 }
0x13c7   :  { %4547 = vmatmul.msk.bf16.vlgmr.msrb.gmra.mxu1 %vm220_vm1, %v1546_v61 }
0x1431   :  { %v1496_v62 = vpop.f32.mrf.mxu2 }
0x1432   :  { %v1497_v27 = vadd.f32 %v1496_v62, %v5917_v7 }
0x1434   :  { %v1501_v29 = vsel %vm241_vm2, %v1497_v27, -inf }
0x1435   :  { %1502 = vmax.xlane.f32.xlu1 %v1501_v29 }
0x1439   :  { %v1498_v20 = vpop.f32.mrf.mxu2 }
0x143a   :  { %v1499_v32 = vadd.f32 %v1498_v20, %v5929_v18 }
0x143c   :  { %v1504_v36 = vsel %vm241_vm2, %v1499_v32, -inf }
0x1444   :  { %v1564_v31 = vpop.f32.mrf.mxu1 }
0x1445   :  { %v1565_v13 = vadd.f32 %v1564_v31, %v5917_v7 }
0x1447   :  { %v1569_v3 = vsel %vm241_vm2, %v1565_v13, -inf }
0x1448   :  { %1570 = vmax.xlane.f32.xlu0 %v1569_v3 }
0x144c   :  { %v1566_v33 = vpop.f32.mrf.mxu1 }
0x144d   :  { %v1567_v34 = vadd.f32 %v1566_v33, %v5929_v18 }
0x144f   :  { %v1572_v35 = vsel %vm241_vm2, %v1567_v34, -inf }
0x1450   :  { %1573 = vmax.xlane.f32.xlu2 %v1572_v35  ;;  %1505 = vmax.xlane.f32.xlu0 %v1504_v36 }
0x14a8   :  { %v1503_v37 = vpop.xlane.xlu1 %1502 }
0x14a9   :  { %v1507_v9 = vsub.f32 %v1497_v27, %v1503_v37 }
0x14ab   :  { %v1509_v38 = vmul.f32 1.442695, %v1507_v9 }
0x14ad   :  { %5359 = vpow2.f32 %v1509_v38 }
0x14b3   :  { %v5360_v7 = vpop.eup %5359 }
0x14b4   :  { %v1513_v39 = vsel %vm241_vm2, %v5360_v7, 0.0 }
0x14b5   :  { %1514 = vadd.xlane.f32.xlu1 %v1513_v39 }
0x14bb   :  { %v1571_v40 = vpop.xlane.xlu0 %1570 }
0x14bc   :  { %v1575_v41 = vsub.f32 %v1565_v13, %v1571_v40 }
0x14be   :  { %v1577_v10 = vmul.f32 1.442695, %v1575_v41 }
0x14c0   :  { %5361 = vpow2.f32 %v1577_v10  ;;  %v963_v10 = vadd.f32 %v5937_v30, %v5922_v15 }
0x14c3   :  { %v1574_v42 = vpop.xlane.xlu2 %1573  ;;  %v1506_v18 = vpop.xlane.xlu0 %1505 }
0x14c4   :  { %v1576_v43 = vsub.f32 %v1567_v34, %v1574_v42  ;;  %v1508_v46 = vsub.f32 %v1499_v32, %v1506_v18  ;;  %v968_v42 = vsel %vm196_vm0, %v963_v10, 0.0  ;;  %v5111_v18 = vld [vmem:[%s6619_s17 + $0x18] sm:$0xff] }
0x14c5   :  { %1740 = vmatpush.bf16.msra.mxu1 %v5111_v18 }
0x14c6   :  { %v5362_v44 = vpop.eup %5361  ;;  %v1579_v45 = vmul.f32 1.442695, %v1576_v43  ;;  %v1511_v48 = vmul.f32 1.442695, %v1508_v46  ;;  %v5110_v46 = vld [vmem:[%s6619_s17 + $0x10] sm:$0xff] }
0x14c7   :  { %v1581_v47 = vsel %vm241_vm2, %v5362_v44, 0.0 }
0x14c8   :  { %5363 = vpow2.f32 %v1579_v45  ;;  %1582 = vadd.xlane.f32.xlu2 %v1581_v47 }
0x14c9   :  { %5365 = vpow2.f32 %v1511_v48  ;;  %1741 = vmatpush.bf16.msra.mxu1 %v5110_v46  ;;  %v5117_v46 = vld [vmem:[%s6625_s24 + $0x8] sm:$0xff] }
0x14ca   :  { %1901 = vmatpush.bf16.msrb.mxu2 %v5117_v46  ;;  %v1862_v46 = vld [vmem:[%s6626_s12 + $0x18] sm:$0xff] }
0x14ce   :  { %v5364_v49 = vpop.eup %5363  ;;  %1524 = vrot.lane.b32.xlu1 %v1477_v21, %s5554_s13 }
0x14cf   :  { %v1584_v50 = vsel %vm241_vm2, %v5364_v49, 0.0  ;;  %v5366_v51 = vpop.eup %5365 }
0x14d0   :  { %1585 = vadd.xlane.f32.xlu0 %v1584_v50  ;;  %v1516_v52 = vsel %vm241_vm2, %v5366_v51, 0.0 }
0x14d8   :  { %1517 = vadd.xlane.f32.xlu0 %v1516_v52 }
0x14e0   :  { %1592 = vrot.lane.b32.xlu2 %v1477_v21, %s5553_s2  ;;  %v1637_v21 = vsel %vm357_vm3, %v4543_v19, 0 }
0x14f8   :  { %966 = vadd.xlane.f32.xlu1 %v965_v54 }
0x1528   :  { %v1515_v55 = vpop.xlane.xlu1 %1514 }
0x153b   :  { %v1583_v56 = vpop.xlane.xlu2 %1582 }
0x153c   :  { %5367 = vrcp.f32 %v1583_v56 }
0x1540   :  { %v1525_v57 = vpop.permute.xlu1 %1524 }
0x1541   :  { %1537 = vmatpush.bf16.msra.mxu0 %v1525_v57 }
0x1542   :  { %v5368_v60 = vpop.eup %5367 }
0x1543   :  { %v1593_v58 = vpop.permute.xlu2 %1592  ;;  %v1586_v59 = vpop.xlane.xlu0 %1585  ;;  %v1589_v14 = vmul.f32 %v5368_v60, %v5362_v44 }
0x1544   :  { %5369 = vrcp.f32 %v1586_v59  ;;  %1605 = vmatpush.bf16.msra.mxu3 %v1593_v58 }
0x1545   :  { %5371 = vrcp.f32 %v1515_v55  ;;  %1646 = vmatpush.bf16.msrb.mxu0 %v1637_v21 }
0x154a   :  { %v5370_v63 = vpop.eup %5369 }
0x154b   :  { %v1590_v28 = vmul.f32 %v5370_v63, %v5364_v49  ;;  %v1518_v0 = vpop.xlane.xlu0 %1517  ;;  %v5372_v1 = vpop.eup %5371 }
0x154c   :  { %5373 = vrcp.f32 %v1518_v0  ;;  %v1521_v5 = vmul.f32 %v5372_v1, %v5360_v7  ;;  %v5273_v1 = vld [vmem:[%s6621_s3 + $0x1] ss:$0 sm:$0xff] }
0x154d   :  { %v1591_v26 = vpack.c.bf16 %v1590_v28, %v1589_v14 }
0x154f   :  { %4548 = vmatmul.msk.bf16.vlgmr.msra.gmra.mxu3 %vm241_vm2, %v1591_v26 }
0x1552   :  { %v5374_v4 = vpop.eup %5373 }
0x1553   :  { %v1522_v6 = vmul.f32 %v5374_v4, %v5366_v51 }
0x1555   :  { %v1523_v8 = vpack.c.bf16 %v1522_v6, %v1521_v5 }
0x1557   :  { %4546 = vmatmul.msk.bf16.vlgmr.msra.gmra.mxu0 %vm241_vm2, %v1523_v8  ;;  %v5274_v8 = vld [vmem:[%s6622_s8 + $0x1] ss:$0 sm:$0xff] }
0x15d2   :  { %v1607_v22 = vpop.f32.mrf.mxu3 }
0x15d4   :  { %v1539_v23 = vpop.f32.mrf.mxu0 }
0x15da   :  { %v1609_v24 = vpop.f32.mrf.mxu3 }
0x15db   :  { %v1612_v25 = vpack.c.bf16 %v1609_v24, %v1607_v22  ;;  %v5115_v24 = vld [vmem:[%s6620_s29 + $0x38] sm:$0xff] }
0x15dc   :  { %v1541_v61 = vpop.f32.mrf.mxu0  ;;  %1791 = vmatpush.bf16.msrb.mxu3 %v5115_v24 }
0x15dd   :  { %v1544_v62 = vpack.c.bf16 %v1541_v61, %v1539_v23  ;;  %4549 = vmatmul.msk.bf16.vlgmr.msra.gmra.mxu2 %vm220_vm1, %v1612_v25  ;;  %v5114_v25 = vld [vmem:[%s6620_s29 + $0x30] sm:$0xff]  ;;  %v5113_v61 = vld [vmem:[%s6620_s29 + $0x28] sm:$0xff] }
0x15df   :  { %4550 = vmatmul.msk.bf16.vlgmr.msrb.gmra.mxu0 %vm220_vm1, %v1544_v62  ;;  %v5112_v62 = vld [vmem:[%s6620_s29 + $0x20] sm:$0xff] }
0x15e0   :  { %1792 = vmatpush.bf16.msrb.mxu3 %v5114_v25 }
0x15e4   :  { %1793 = vmatpush.bf16.msrb.mxu3 %v5113_v61 }
0x15e8   :  { %1794 = vmatpush.bf16.msrb.mxu3 %v5112_v62 }
0x165c   :  { %v1648_v27 = vpop.f32.mrf.mxu0 }
0x1660   :  { %v1628_v29 = vpop.f32.mrf.mxu2 }
0x1661   :  { %v1649_v31 = vadd.f32 %v1648_v27, %v1628_v29 }
0x1663   :  { %v1653_v13 = vadd.f32 %v1649_v31, %v5991_v11 }
0x1664   :  { %v1650_v20 = vpop.f32.mrf.mxu0 }
0x1665   :  { %v1655_v3 = vsel %vm196_vm0, %v1653_v13, 0.0 }
0x1666   :  { %1656 = vadd.xlane.f32.xlu0 %v1655_v3 }
0x1668   :  { %v1630_v32 = vpop.f32.mrf.mxu2 }
0x1669   :  { %v1651_v33 = vadd.f32 %v1650_v20, %v1630_v32 }
0x166b   :  { %v1654_v34 = vadd.f32 %v1651_v33, %v5993_v12 }
0x166d   :  { %v1658_v35 = vsel %vm196_vm0, %v1654_v34, 0.0 }
0x166e   :  { %1659 = vadd.xlane.f32.xlu0 %v1658_v35 }
0x16d9   :  { %v1657_v36 = vpop.xlane.xlu0 %1656 }
0x16da   :  { %v1661_v37 = vmul.f32 %v1657_v36, %v5809_v2 }
0x16dc   :  { %v1663_v9 = vsub.f32 %v1653_v13, %v1661_v37 }
0x16de   :  { %v1665_v38 = vmul.f32 %v1663_v9, %v1663_v9 }
0x16e0   :  { %v1667_v7 = vsel %vm196_vm0, %v1665_v38, 0.0 }
0x16e1   :  { %1668 = vadd.xlane.f32.xlu2 %v1667_v7  ;;  %v1660_v11 = vpop.xlane.xlu0 %1659 }
0x16e2   :  { %v1662_v39 = vmul.f32 %v1660_v11, %v5809_v2 }
0x16e4   :  { %v1664_v40 = vsub.f32 %v1654_v34, %v1662_v39  ;;  %v967_v34 = vpop.xlane.xlu1 %966 }
0x16e5   :  { %v971_v35 = vmul.f32 %v967_v34, %v5809_v2 }
0x16e6   :  { %v1666_v41 = vmul.f32 %v1664_v40, %v1664_v40 }
0x16e8   :  { %v1670_v12 = vsel %vm196_vm0, %v1666_v41, 0.0 }
0x16e9   :  { %1671 = vadd.xlane.f32.xlu0 %v1670_v12 }
0x16f1   :  { %969 = vadd.xlane.f32.xlu0 %v968_v42 }
0x1754   :  { %v1669_v43 = vpop.xlane.xlu2 %1668 }
0x1755   :  { %v1673_v44 = vmul.f32 %v1669_v43, %v5809_v2 }
0x1757   :  { %v1675_v45 = vadd.f32 1e-05, %v1673_v44 }
0x1759   :  { %5375 = vrsqrt.f32 %v1675_v45  ;;  %vm1683_vm14 = vweird.f32 %v1675_v45 }
0x175c   :  { %v1672_v47 = vpop.xlane.xlu0 %1671 }
0x175d   :  { %v1674_v48 = vmul.f32 %v1672_v47, %v5809_v2 }
0x175f   :  { %v5376_v49 = vpop.eup %5375  ;;  %v1676_v50 = vadd.f32 1e-05, %v1674_v48 }
0x1760   :  { %v1678_v51 = vmul.f32 %v5376_v49, %v1675_v45  ;;  %vm1684_vm2 = vweird.f32 %v5376_v49 }
0x1761   :  { %5377 = vrsqrt.f32 %v1676_v50  ;;  %vm1685_vm15 = vmor %vm1683_vm14, %vm1684_vm2  ;;  %vm1693_vm5 = vweird.f32 %v1676_v50 }
0x1762   :  { %v1679_v15 = vmul.f32 %v5376_v49, %v1678_v51 }
0x1764   :  { %v1680_v30 = vmul.f32 0.5, %v1679_v15  ;;  %v970_v52 = vpop.xlane.xlu0 %969 }
0x1765   :  { %v972_v54 = vmul.f32 %v970_v52, %v5809_v2 }
0x1766   :  { %v1681_v55 = vsub.f32 1.5, %v1680_v30 }
0x1767   :  { %v5378_v56 = vpop.eup %5377  ;;  %v6049_v57 = vsub.f32 %v963_v10, %v972_v54 }
0x1768   :  { %v1682_v58 = vmul.f32 %v5376_v49, %v1681_v55  ;;  %v1688_v59 = vmul.f32 %v5378_v56, %v1676_v50  ;;  %vm1694_vm4 = vweird.f32 %v5378_v56 }
0x1769   :  { %v976_v60 = vmul.f32 %v6049_v57, %v6049_v57  ;;  %vm1695_vm6 = vmor %vm1693_vm5, %vm1694_vm4 }
0x176a   :  { %v1689_v63 = vmul.f32 %v5378_v56, %v1688_v59  ;;  %v1686_v28 = vsel %vm1685_vm15, %v5376_v49, %v1682_v58  ;;  %v5116_v49 = vld [vmem:[%s6625_s24] sm:$0xff] }
0x176b   :  { %v980_v14 = vsel %vm196_vm0, %v976_v60, 0.0  ;;  %v1697_v4 = vmul.f32 %v1686_v28, %v1663_v9  ;;  %v973_v9 = vsub.f32 %v6021_v53, %v971_v35  ;;  %1902 = vmatpush.bf16.msrb.mxu2 %v5116_v49 }
0x176c   :  { %v1690_v0 = vmul.f32 0.5, %v1689_v63  ;;  %981 = vadd.xlane.f32.xlu2 %v980_v14 }
0x176d   :  { %v1704_v16 = vmul.f32 %v5273_v1, %v1697_v4  ;;  %v975_v7 = vmul.f32 %v973_v9, %v973_v9 }
0x176e   :  { %v1691_v26 = vsub.f32 1.5, %v1690_v0  ;;  %v5275_v0 = vld [vmem:[%s5624_s30 + $0x1] ss:$0 sm:$0xff]  ;;  %s6627_s30 = sld [smem:[#allocation5_spill]] }
0x176f   :  { %v1711_v21 = vadd.f32 %v5274_v8, %v1704_v16  ;;  %v977_v11 = vsel %vm196_vm0, %v975_v7, 0.0 }
0x1770   :  { %v1692_v5 = vmul.f32 %v5378_v56, %v1691_v26 }
0x1772   :  { %v1696_v6 = vsel %vm1695_vm6, %v5378_v56, %v1692_v5  ;;  %v5276_v5 = vld [vmem:[%s5629_s6 + $0x1] ss:$0 sm:$0xff]  ;;  %s6628_s6 = sld [smem:[#allocation15_spill]] }
0x1773   :  { %v1698_v17 = vmul.f32 %v1696_v6, %v1664_v40 }
0x1775   :  { %v1705_v19 = vmul.f32 %v5273_v1, %v1698_v17 }
0x1777   :  { %v1712_v22 = vadd.f32 %v5274_v8, %v1705_v19 }
0x1779   :  { %v1713_v23 = vpack.c.bf16 %v1712_v22, %v1711_v21 }
0x177b   :  { %4565 = vmatmul.msk.bf16.vlgmr.msra.gmra.mxu1 %vm196_vm0, %v1713_v23 }
0x17df   :  { %v982_v39 = vpop.xlane.xlu2 %981 }
0x17e0   :  { %v984_v40 = vmul.f32 %v982_v39, %v5809_v2  ;;  %v5277_v39 = vld [vmem:[%s6623_s14 + $0x1] ss:$0 sm:$0xff] }
0x17e2   :  { %v986_v41 = vadd.f32 1e-05, %v984_v40 }
0x17e4   :  { %5379 = vrsqrt.f32 %v986_v41  ;;  %vm1003_vm8 = vweird.f32 %v986_v41 }
0x17ea   :  { %v5380_v18 = vpop.eup %5379 }
0x17eb   :  { %v998_v47 = vmul.f32 %v5380_v18, %v986_v41  ;;  %vm1004_vm7 = vweird.f32 %v5380_v18 }
0x17ec   :  { %vm1005_vm9 = vmor %vm1003_vm8, %vm1004_vm7 }
0x17ed   :  { %v999_v51 = vmul.f32 %v5380_v18, %v998_v47 }
0x17ef   :  { %v1000_v54 = vmul.f32 0.5, %v999_v51 }
0x17f1   :  { %v1001_v56 = vsub.f32 1.5, %v1000_v54 }
0x17f3   :  { %v1002_v58 = vmul.f32 %v5380_v18, %v1001_v56 }
0x17f5   :  { %v1006_v63 = vsel %vm1005_vm9, %v5380_v18, %v1002_v58 }
0x17f6   :  { %v1008_v26 = vmul.f32 %v1006_v63, %v6049_v57 }
0x17f8   :  { %v1743_v27 = vpop.f32.mrf.mxu1  ;;  %v1015_v6 = vmul.f32 %v5275_v0, %v1008_v26 }
0x17f9   :  { %v1748_v31 = vmax.f32 %v1743_v27, 0.0 }
0x17fa   :  { %v1022_v17 = vadd.f32 %v5276_v5, %v1015_v6 }
0x1800   :  { %v1745_v29 = vpop.f32.mrf.mxu1 }
0x1801   :  { %v1749_v13 = vmax.f32 %v1745_v29, 0.0 }
0x1803   :  { %v1750_v3 = vpack.c.bf16 %v1749_v13, %v1748_v31 }
0x1805   :  { %4590 = vmatmul.msk.bf16.vlgmr.msrb.gmra.mxu3 %vm529_vm11, %v1750_v3 }
0x1888   :  { %v1796_v20 = vpop.f32.mrf.mxu3 }
0x1889   :  { %v1797_v32 = vadd.f32 %v1796_v20, %v1711_v21  ;;  %v1859_v21 = vld [vmem:[%s6626_s12] sm:$0xff] }
0x188b   :  { %v1801_v33 = vsel %vm196_vm0, %v1797_v32, 0.0 }
0x188c   :  { %1802 = vadd.xlane.f32.xlu0 %v1801_v33 }
0x1890   :  { %v1798_v36 = vpop.f32.mrf.mxu3 }
0x1891   :  { %v1799_v37 = vadd.f32 %v1798_v36, %v1712_v22  ;;  %v1860_v22 = vld [vmem:[%s6626_s12 + $0x8] sm:$0xff] }
0x1892   :  { %v6090_v25 = vadd.f32 %v1860_v22, %v1022_v17  ;;  %v6146_v22 = vld [vmem:[%s6627_s30 + $0x8] sm:$0xff] }
0x1893   :  { %v1804_v38 = vsel %vm196_vm0, %v1799_v37, 0.0 }
0x1894   :  { %1805 = vadd.xlane.f32.xlu0 %v1804_v38 }
0x189c   :  { %978 = vadd.xlane.f32.xlu0 %v977_v11 }
0x18ff   :  { %v1803_v12 = vpop.xlane.xlu0 %1802 }
0x1900   :  { %v1807_v10 = vmul.f32 %v1803_v12, %v5809_v2 }
0x1902   :  { %v6069_v42 = vsub.f32 %v1797_v32, %v1807_v10  ;;  %v5278_v10 = vld [vmem:[%s6624_s19 + $0x1] ss:$0 sm:$0xff] }
0x1904   :  { %v1811_v53 = vmul.f32 %v6069_v42, %v6069_v42 }
0x1906   :  { %v1813_v43 = vsel %vm196_vm0, %v1811_v53, 0.0 }
0x1907   :  { %1814 = vadd.xlane.f32.xlu0 %v1813_v43  ;;  %v1806_v44 = vpop.xlane.xlu0 %1805 }
0x1908   :  { %v1808_v45 = vmul.f32 %v1806_v44, %v5809_v2 }
0x190a   :  { %v6076_v48 = vsub.f32 %v1799_v37, %v1808_v45  ;;  %v1861_v45 = vld [vmem:[%s6626_s12 + $0x10] sm:$0xff] }
0x190c   :  { %v1812_v50 = vmul.f32 %v6076_v48, %v6076_v48 }
0x190e   :  { %v1816_v15 = vsel %vm196_vm0, %v1812_v50, 0.0 }
0x190f   :  { %1817 = vadd.xlane.f32.xlu2 %v1816_v15  ;;  %v979_v30 = vpop.xlane.xlu0 %978 }
0x1910   :  { %v983_v52 = vmul.f32 %v979_v30, %v5809_v2 }
0x1912   :  { %v985_v55 = vadd.f32 1e-05, %v983_v52 }
0x1914   :  { %5381 = vrsqrt.f32 %v985_v55  ;;  %vm993_vm12 = vweird.f32 %v985_v55 }
0x191a   :  { %v5382_v59 = vpop.eup %5381 }
0x191b   :  { %v988_v60 = vmul.f32 %v5382_v59, %v985_v55  ;;  %vm994_vm10 = vweird.f32 %v5382_v59 }
0x191c   :  { %vm995_vm13 = vmor %vm993_vm12, %vm994_vm10 }
0x191d   :  { %v989_v14 = vmul.f32 %v5382_v59, %v988_v60 }
0x191f   :  { %v990_v28 = vmul.f32 0.5, %v989_v14 }
0x1921   :  { %v991_v1 = vsub.f32 1.5, %v990_v28 }
0x1923   :  { %v992_v4 = vmul.f32 %v5382_v59, %v991_v1 }
0x1925   :  { %v996_v8 = vsel %vm995_vm13, %v5382_v59, %v992_v4  ;;  %v6139_v4 = vld [vmem:[%s6627_s30] sm:$0xff] }
0x1926   :  { %v1007_v16 = vmul.f32 %v996_v8, %v973_v9 }
0x1928   :  { %v1014_v19 = vmul.f32 %v5275_v0, %v1007_v16 }
0x192a   :  { %v1021_v23 = vadd.f32 %v5276_v5, %v1014_v19 }
0x192c   :  { %v6088_v24 = vadd.f32 %v1859_v21, %v1021_v23 }
0x192e   :  { %v1871_v57 = vpack.c.bf16 %v6090_v25, %v6088_v24 }
0x1930   :  { %4601 = vmatmul.msk.bf16.vlgmr.msrb.gmra.mxu2 %vm196_vm0, %v1871_v57 }
0x197a   :  { %v1815_v61 = vpop.xlane.xlu0 %1814 }
0x197b   :  { %v1819_v62 = vmul.f32 %v1815_v61, %v5809_v2 }
0x197d   :  { %v1821_v27 = vadd.f32 1e-05, %v1819_v62 }
0x197f   :  { %5383 = vrsqrt.f32 %v1821_v27  ;;  %vm1829_vm14 = vweird.f32 %v1821_v27 }
0x1982   :  { %v1818_v29 = vpop.xlane.xlu2 %1817 }
0x1983   :  { %v1820_v31 = vmul.f32 %v1818_v29, %v5809_v2 }
0x1985   :  { %v5384_v13 = vpop.eup %5383  ;;  %v1822_v3 = vadd.f32 1e-05, %v1820_v31  ;;  %v6153_v31 = vld [vmem:[%s6627_s30 + $0x10] sm:$0xff] }
0x1986   :  { %v1824_v20 = vmul.f32 %v5384_v13, %v1821_v27  ;;  %vm1830_vm2 = vweird.f32 %v5384_v13 }
0x1987   :  { %5385 = vrsqrt.f32 %v1822_v3  ;;  %vm1831_vm15 = vmor %vm1829_vm14, %vm1830_vm2  ;;  %vm1839_vm5 = vweird.f32 %v1822_v3 }
0x1988   :  { %v1825_v32 = vmul.f32 %v5384_v13, %v1824_v20 }
0x198a   :  { %v1826_v33 = vmul.f32 0.5, %v1825_v32 }
0x198c   :  { %v1827_v34 = vsub.f32 1.5, %v1826_v33 }
0x198d   :  { %v5386_v35 = vpop.eup %5385 }
0x198e   :  { %v1828_v36 = vmul.f32 %v5384_v13, %v1827_v34  ;;  %v1834_v37 = vmul.f32 %v5386_v35, %v1822_v3  ;;  %vm1840_vm4 = vweird.f32 %v5386_v35  ;;  %v6163_v34 = vld [vmem:[%s6627_s30 + $0x18] sm:$0xff] }
0x198f   :  { %vm1841_vm6 = vmor %vm1839_vm5, %vm1840_vm4 }
0x1990   :  { %v1832_v9 = vsel %vm1831_vm15, %v5384_v13, %v1828_v36  ;;  %v1835_v38 = vmul.f32 %v5386_v35, %v1834_v37 }
0x1991   :  { %v1843_v11 = vmul.f32 %v1832_v9, %v6069_v42 }
0x1992   :  { %v1836_v7 = vmul.f32 0.5, %v1835_v38 }
0x1993   :  { %v1850_v12 = vmul.f32 %v5277_v39, %v1843_v11 }
0x1994   :  { %v1837_v40 = vsub.f32 1.5, %v1836_v7 }
0x1995   :  { %v1857_v44 = vadd.f32 %v5278_v10, %v1850_v12 }
0x1996   :  { %v1838_v41 = vmul.f32 %v5386_v35, %v1837_v40 }
0x1997   :  { %v6103_v49 = vadd.f32 %v1861_v45, %v1857_v44 }
0x1998   :  { %v1842_v53 = vsel %vm1841_vm6, %v5386_v35, %v1838_v41 }
0x1999   :  { %v1844_v18 = vmul.f32 %v1842_v53, %v6076_v48 }
0x199b   :  { %v1851_v43 = vmul.f32 %v5277_v39, %v1844_v18 }
0x199d   :  { %v1858_v47 = vadd.f32 %v5278_v10, %v1851_v43 }
0x199f   :  { %v6105_v50 = vadd.f32 %v1862_v46, %v1858_v47 }
0x19a1   :  { %v1872_v42 = vpack.c.bf16 %v6105_v50, %v6103_v49 }
0x19a3   :  { %4602 = vmatmul.msk.bf16.gmra.mxu2 %vm196_vm0, %v1872_v42 }
0x19b3   :  { %v1904_v51 = vpop.f32.mrf.mxu2 }
0x19bb   :  { %v1906_v15 = vpop.f32.mrf.mxu2 }
0x19bc   :  { %v6110_v30 = vpack.c.bf16 %v1906_v15, %v1904_v51 }
0x19be   :  { %2038 = vrot.lane.b32.xlu1 %v6110_v30, %s5552_s5 }
0x19c6   :  { %1920 = vrot.lane.b32.xlu1 %v6110_v30, %s5551_s1 }
0x1a26   :  { %v1909_v48 = vpop.f32.mrf.mxu2 }
0x1a2e   :  { %v1911_v52 = vpop.f32.mrf.mxu2 }
0x1a2f   :  { %v6116_v54 = vpack.c.bf16 %v1911_v52, %v1909_v48 }
0x1a30   :  { %v2039_v55 = vpop.permute.xlu1 %2038 }
0x1a31   :  { %2121 = vrot.lane.b32.xlu1 %v6116_v54, %s5553_s2  ;;  %1922 = vrot.lane.b32.xlu2 %v6116_v54, %s5551_s1  ;;  %v2049_v0 = vsel %vm220_vm1, %v2039_v55, 0 }
0x1a32   :  { %2040 = vrot.lane.b32.xlu0 %v6116_v54, %s5552_s5 }
0x1a38   :  { %v1921_v59 = vpop.permute.xlu1 %1920 }
0x1a39   :  { %v1931_v60 = vsel %vm220_vm1, %v1921_v59, 0 }
0x1a3a   :  { %2034 = vrot.lane.b32.xlu0 %v6110_v30, %s5550_s21 }
0x1a42   :  { %2036 = vrot.lane.b32.xlu0 %v6116_v54, %s5550_s21 }
0x1a8b   :  { %v1923_v56 = vpop.permute.xlu2 %1922 }
0x1a8c   :  { %v1934_v58 = vsel %vm220_vm1, %v1923_v56, 0 }
0x1a8d   :  { %1942 = vmatpush.bf16.xpose.msra.mxu0 %v1934_v58 }
0x1a95   :  { %1943 = vmatpush.bf16.xpose.msra.mxu0 %v1931_v60 }
0x1a9c   :  { %4603 = vmatmul.msk.bf16.vlgmr.msra.gmra.mxu0 %vm220_vm1, %v6110_v30 }
0x1aa3   :  { %v2122_v63 = vpop.permute.xlu1 %2121 }
0x1aa4   :  { %v2041_v14 = vpop.permute.xlu0 %2040  ;;  %2137 = vmatpush.bf16.msra.mxu2 %v2122_v63 }
0x1aa5   :  { %v2052_v28 = vsel %vm220_vm1, %v2041_v14, 0 }
0x1aa6   :  { %2060 = vmatpush.bf16.xpose.msra.mxu3 %v2052_v28 }
0x1aac   :  { %4604 = vmatmul.msk.bf16.gmra.mxu0 %vm220_vm1, %v6116_v54  ;;  %v2035_v26 = vpop.permute.xlu0 %2034 }
0x1aae   :  { %2061 = vmatpush.bf16.xpose.msra.mxu3 %v2049_v0 }
0x1ab4   :  { %v2037_v1 = vpop.permute.xlu0 %2036 }
0x1ab5   :  { %4607 = vmatmul.msk.bf16.vlgmr.msra.gmra.mxu3 %vm220_vm1, %v2035_v26 }
0x1ac5   :  { %4608 = vmatmul.msk.bf16.gmra.mxu3 %vm220_vm1, %v2037_v1 }
0x1b19   :  { %v1945_v5 = vpop.f32.mrf.mxu0 }
0x1b1a   :  { %v1946_v6 = vadd.f32 %v1945_v5, %v6139_v4 }
0x1b1c   :  { %v1955_v8 = vsel %vm196_vm0, %v1946_v6, -inf }
0x1b1d   :  { %1956 = vmax.xlane.f32.xlu0 %v1955_v8 }
0x1b21   :  { %v1947_v16 = vpop.f32.mrf.mxu0 }
0x1b22   :  { %v1948_v23 = vadd.f32 %v1947_v16, %v6146_v22 }
0x1b24   :  { %v1958_v29 = vsel %vm196_vm0, %v1948_v23, -inf }
0x1b29   :  { %v1950_v62 = vpop.f32.mrf.mxu0 }
0x1b2a   :  { %v6156_v13 = vadd.f32 %v1950_v62, %v6153_v31 }
0x1b2c   :  { %v1961_v32 = vsel %vm196_vm0, %v6156_v13, -inf }
0x1b31   :  { %v1952_v35 = vpop.f32.mrf.mxu0 }
0x1b32   :  { %v1953_v36 = vadd.f32 %v1952_v35, %v6163_v34 }
0x1b34   :  { %v1964_v7 = vsel %vm196_vm0, %v1953_v36, -inf }
0x1b38   :  { %v2063_v17 = vpop.f32.mrf.mxu3 }
0x1b39   :  { %v2064_v19 = vadd.f32 %v2063_v17, %v6139_v4 }
0x1b3b   :  { %v2073_v21 = vsel %vm196_vm0, %v2064_v19, -inf }
0x1b3c   :  { %2074 = vmax.xlane.f32.xlu2 %v2073_v21 }
0x1b40   :  { %v2065_v57 = vpop.f32.mrf.mxu3 }
0x1b41   :  { %v2066_v61 = vadd.f32 %v2065_v57, %v6146_v22 }
0x1b43   :  { %v2076_v27 = vsel %vm196_vm0, %v2066_v61, -inf }
0x1b44   :  { %2077 = vmax.xlane.f32.xlu1 %v2076_v27  ;;  %1959 = vmax.xlane.f32.xlu2 %v1958_v29 }
0x1b48   :  { %v2068_v3 = vpop.f32.mrf.mxu3 }
0x1b49   :  { %v2069_v20 = vadd.f32 %v2068_v3, %v6153_v31 }
0x1b4b   :  { %v2079_v33 = vsel %vm196_vm0, %v2069_v20, -inf }
0x1b4c   :  { %1962 = vmax.xlane.f32.xlu2 %v1961_v32  ;;  %2080 = vmax.xlane.f32.xlu1 %v2079_v33 }
0x1b50   :  { %v2070_v37 = vpop.f32.mrf.mxu3 }
0x1b51   :  { %v2071_v9 = vadd.f32 %v2070_v37, %v6163_v34 }
0x1b53   :  { %v2082_v38 = vsel %vm196_vm0, %v2071_v9, -inf }
0x1b54   :  { %2083 = vmax.xlane.f32.xlu0 %v2082_v38  ;;  %1965 = vmax.xlane.f32.xlu1 %v1964_v7 }
0x1b6d   :  { %2001 = vrot.lane.b32.xlu1 %v6110_v30, %s5554_s13 }
0x1b90   :  { %v1957_v11 = vpop.xlane.xlu0 %1956 }
0x1b91   :  { %v1967_v39 = vsub.f32 %v1946_v6, %v1957_v11 }
0x1b93   :  { %v1971_v40 = vmul.f32 1.442695, %v1967_v39 }
0x1b95   :  { %5387 = vpow2.f32 %v1971_v40 }
0x1b9b   :  { %v6171_v41 = vpop.eup %5387 }
0x1b9c   :  { %v1979_v12 = vsel %vm196_vm0, %v6171_v41, 0.0 }
0x1b9d   :  { %1980 = vadd.xlane.f32.xlu0 %v1979_v12 }
0x1baf   :  { %v2075_v10 = vpop.xlane.xlu2 %2074 }
0x1bb0   :  { %v2085_v53 = vsub.f32 %v2064_v19, %v2075_v10 }
0x1bb2   :  { %v2089_v18 = vmul.f32 1.442695, %v2085_v53 }
0x1bb4   :  { %5389 = vpow2.f32 %v2089_v18 }
0x1bb7   :  { %v1960_v43 = vpop.xlane.xlu2 %1959  ;;  %v2078_v44 = vpop.xlane.xlu1 %2077 }
0x1bb8   :  { %v1968_v45 = vsub.f32 %v1948_v23, %v1960_v43  ;;  %v2086_v42 = vsub.f32 %v2066_v61, %v2078_v44 }
0x1bba   :  { %v5390_v46 = vpop.eup %5389  ;;  %v1973_v47 = vmul.f32 1.442695, %v1968_v45  ;;  %v2091_v15 = vmul.f32 1.442695, %v2086_v42 }
0x1bbb   :  { %v2097_v51 = vsel %vm196_vm0, %v5390_v46, 0.0 }
0x1bbc   :  { %2098 = vadd.xlane.f32.xlu0 %v2097_v51  ;;  %5391 = vpow2.f32 %v1973_v47 }
0x1bbd   :  { %5393 = vpow2.f32 %v2091_v15 }
0x1bbf   :  { %v2081_v28 = vpop.xlane.xlu1 %2080  ;;  %v1963_v16 = vpop.xlane.xlu2 %1962 }
0x1bc0   :  { %v2087_v0 = vsub.f32 %v2069_v20, %v2081_v28 }
0x1bc2   :  { %v5392_v48 = vpop.eup %5391  ;;  %v2093_v26 = vmul.f32 1.442695, %v2087_v0 }
0x1bc3   :  { %v1982_v52 = vsel %vm196_vm0, %v5392_v48, 0.0  ;;  %v5394_v58 = vpop.eup %5393 }
0x1bc4   :  { %1983 = vadd.xlane.f32.xlu2 %v1982_v52  ;;  %v2100_v60 = vsel %vm196_vm0, %v5394_v58, 0.0 }
0x1bc7   :  { %v2084_v55 = vpop.xlane.xlu0 %2083  ;;  %v1966_v1 = vpop.xlane.xlu1 %1965 }
0x1bc8   :  { %v2088_v56 = vsub.f32 %v2071_v9, %v2084_v55  ;;  %v1970_v5 = vsub.f32 %v1953_v36, %v1966_v1  ;;  %v1915_v55 = vld [vmem:[%s6628_s6 + $0x4] sm:$0xf] }
0x1bca   :  { %v2095_v59 = vmul.f32 1.442695, %v2088_v56  ;;  %v1977_v6 = vmul.f32 1.442695, %v1970_v5  ;;  %v2159_v56 = vsel %vm357_vm3, %v1915_v55, 0 }
0x1bcb   :  { %2168 = vmatpush.bf16.msrb.mxu0 %v2159_v56 }
0x1bcc   :  { %5395 = vpow2.f32 %v2095_v59  ;;  %2101 = vadd.xlane.f32.xlu2 %v2100_v60 }
0x1bcd   :  { %5397 = vpow2.f32 %v2093_v26 }
0x1bce   :  { %5399 = vpow2.f32 %v1977_v6 }
0x1bd0   :  { %2119 = vrot.lane.b32.xlu0 %v6110_v30, %s5553_s2  ;;  %v1969_v30 = vsub.f32 %v6156_v13, %v1963_v16 }
0x1bd2   :  { %v5396_v63 = vpop.eup %5395  ;;  %v1975_v21 = vmul.f32 1.442695, %v1969_v30 }
0x1bd3   :  { %v2106_v14 = vsel %vm196_vm0, %v5396_v63, 0.0  ;;  %v5398_v8 = vpop.eup %5397 }
0x1bd4   :  { %2107 = vadd.xlane.f32.xlu1 %v2106_v14  ;;  %v2103_v17 = vsel %vm196_vm0, %v5398_v8, 0.0  ;;  %v5400_v19 = vpop.eup %5399  ;;  %5401 = vpow2.f32 %v1975_v21 }
0x1bd5   :  { %v1988_v23 = vsel %vm196_vm0, %v5400_v19, 0.0 }
0x1bdf   :  { %v2002_v7 = vpop.permute.xlu1 %2001 }
0x1be4   :  { %2003 = vrot.lane.b32.xlu2 %v6116_v54, %s5554_s13  ;;  %v5402_v54 = vpop.eup %5401 }
0x1be5   :  { %v1985_v57 = vsel %vm196_vm0, %v5402_v54, 0.0 }
0x1bfa   :  { %2104 = vadd.xlane.f32.xlu0 %v2103_v17 }
0x1c02   :  { %1989 = vadd.xlane.f32.xlu0 %v1988_v23 }
0x1c0d   :  { %1986 = vadd.xlane.f32.xlu2 %v1985_v57 }
0x1c10   :  { %v1981_v61 = vpop.xlane.xlu0 %1980 }
0x1c2f   :  { %v2099_v27 = vpop.xlane.xlu0 %2098 }
0x1c30   :  { %5403 = vrcp.f32 %v2099_v27 }
0x1c36   :  { %v5404_v13 = vpop.eup %5403 }
0x1c37   :  { %v1984_v62 = vpop.xlane.xlu2 %1983  ;;  %v2113_v33 = vmul.f32 %v5404_v13, %v5390_v46 }
0x1c38   :  { %5405 = vrcp.f32 %v1984_v62 }
0x1c3e   :  { %v5406_v20 = vpop.eup %5405 }
0x1c3f   :  { %v2102_v29 = vpop.xlane.xlu2 %2101  ;;  %v1996_v9 = vmul.f32 %v5406_v20, %v5392_v48  ;;  %v1914_v48 = vld [vmem:[%s6628_s6] sm:$0xf] }
0x1c40   :  { %5407 = vrcp.f32 %v2102_v29  ;;  %v2187_v52 = vsel %vm357_vm3, %v1914_v48, 0  ;;  %v5118_v48 = vld [vmem:[%s6629_s7] sm:$0xff] }
0x1c41   :  { %5409 = vrcp.f32 %v1981_v61 }
0x1c42   :  { %v2120_v3 = vpop.permute.xlu0 %2119 }
0x1c43   :  { %2138 = vmatpush.bf16.msra.mxu2 %v2120_v3 }
0x1c46   :  { %v5408_v32 = vpop.eup %5407 }
0x1c47   :  { %v2114_v35 = vmul.f32 %v5408_v32, %v5394_v58  ;;  %v2004_v36 = vpop.permute.xlu2 %2003  ;;  %v5410_v37 = vpop.eup %5409 }
0x1c48   :  { %2019 = vmatpush.bf16.msrb.mxu1 %v2004_v36  ;;  %v1995_v11 = vmul.f32 %v5410_v37, %v6171_v41  ;;  %v2108_v40 = vpop.xlane.xlu1 %2107 }
0x1c49   :  { %v2117_v38 = vpack.c.bf16 %v2114_v35, %v2113_v33  ;;  %5411 = vrcp.f32 %v2108_v40 }
0x1c4a   :  { %v1999_v39 = vpack.c.bf16 %v1996_v9, %v1995_v11 }
0x1c4b   :  { %4609 = vmatmul.msk.bf16.vlgmr.msra.gmra.mxu2 %vm196_vm0, %v2117_v38 }
0x1c4c   :  { %2020 = vmatpush.bf16.msrb.mxu1 %v2002_v7 }
0x1c4f   :  { %4605 = vmatmul.msk.bf16.vlgmr.msrb.gmra.mxu1 %vm196_vm0, %v1999_v39  ;;  %v5412_v10 = vpop.eup %5411 }
0x1c50   :  { %v2116_v18 = vmul.f32 %v5412_v10, %v5396_v63  ;;  %2196 = vmatpush.bf16.msra.mxu1 %v2187_v52 }
0x1c6d   :  { %v2105_v12 = vpop.xlane.xlu0 %2104 }
0x1c6e   :  { %5413 = vrcp.f32 %v2105_v12 }
0x1c74   :  { %v5414_v53 = vpop.eup %5413 }
0x1c75   :  { %v2115_v43 = vmul.f32 %v5414_v53, %v5398_v8  ;;  %v1990_v41 = vpop.xlane.xlu0 %1989 }
0x1c76   :  { %5415 = vrcp.f32 %v1990_v41 }
0x1c77   :  { %v2118_v44 = vpack.c.bf16 %v2116_v18, %v2115_v43 }
0x1c79   :  { %4610 = vmatmul.msk.bf16.gmra.mxu2 %vm196_vm0, %v2118_v44 }
0x1c7c   :  { %v5416_v46 = vpop.eup %5415 }
0x1c7d   :  { %v1998_v51 = vmul.f32 %v5416_v46, %v5400_v19 }
0x1c80   :  { %v1987_v45 = vpop.xlane.xlu2 %1986 }
0x1c81   :  { %5417 = vrcp.f32 %v1987_v45 }
0x1c87   :  { %v5418_v47 = vpop.eup %5417 }
0x1c88   :  { %v1997_v42 = vmul.f32 %v5418_v47, %v5402_v54 }
0x1c8a   :  { %v2000_v15 = vpack.c.bf16 %v1998_v51, %v1997_v42  ;;  %v5119_v42 = vld [vmem:[%s6629_s7 + $0x8] sm:$0xff] }
0x1c8b   :  { %2346 = vmatpush.bf16.msrb.mxu3 %v5119_v42 }
0x1c8c   :  { %4606 = vmatmul.msk.bf16.gmra.mxu1 %vm196_vm0, %v2000_v15 }
0x1c8f   :  { %2347 = vmatpush.bf16.msrb.mxu3 %v5118_v48  ;;  %v5121_v48 = vld [vmem:[%s6632_s15 + $0x8] sm:$0xff] }
0x1ccc   :  { %v2022_v58 = vpop.f32.mrf.mxu1 }
0x1cce   :  { %v2140_v59 = vpop.f32.mrf.mxu2 }
0x1cd4   :  { %v2024_v60 = vpop.f32.mrf.mxu1 }
0x1cd5   :  { %v2032_v63 = vpack.c.bf16 %v2024_v60, %v2022_v58 }
0x1cd6   :  { %v2142_v14 = vpop.f32.mrf.mxu2 }
0x1cd7   :  { %v2150_v28 = vpack.c.bf16 %v2142_v14, %v2140_v59  ;;  %4613 = vmatmul.msk.bf16.vlgmr.msra.gmra.mxu1 %vm220_vm1, %v2032_v63 }
0x1cd9   :  { %4611 = vmatmul.msk.bf16.vlgmr.msrb.gmra.mxu0 %vm220_vm1, %v2150_v28 }
0x1cfc   :  { %v2145_v0 = vpop.f32.mrf.mxu2 }
0x1d04   :  { %v2147_v26 = vpop.f32.mrf.mxu2 }
0x1d05   :  { %v2151_v1 = vpack.c.bf16 %v2147_v26, %v2145_v0 }
0x1d07   :  { %4612 = vmatmul.msk.bf16.gmra.mxu0 %vm220_vm1, %v2151_v1 }
0x1d09   :  { %v2027_v5 = vpop.f32.mrf.mxu1 }
0x1d11   :  { %v2029_v6 = vpop.f32.mrf.mxu1 }
0x1d12   :  { %v2033_v8 = vpack.c.bf16 %v2029_v6, %v2027_v5 }
0x1d14   :  { %4614 = vmatmul.msk.bf16.gmra.mxu1 %vm220_vm1, %v2033_v8 }
0x1d54   :  { %v2198_v16 = vpop.f32.mrf.mxu1 }
0x1d56   :  { %v2170_v17 = vpop.f32.mrf.mxu0 }
0x1d57   :  { %v2199_v30 = vadd.f32 %v2198_v16, %v2170_v17  ;;  %v5279_v17 = vld [vmem:[%s6630_s10] ss:$0 sm:$0xff] }
0x1d59   :  { %v2208_v19 = vadd.f32 %v2199_v30, %v6088_v24 }
0x1d5b   :  { %v2212_v21 = vsel %vm196_vm0, %v2208_v19, 0.0 }
0x1d5c   :  { %2213 = vadd.xlane.f32.xlu1 %v2212_v21  ;;  %v2200_v23 = vpop.f32.mrf.mxu1 }
0x1d5e   :  { %v2172_v54 = vpop.f32.mrf.mxu0 }
0x1d5f   :  { %v2201_v57 = vadd.f32 %v2200_v23, %v2172_v54  ;;  %v5280_v23 = vld [vmem:[%s6631_s11] ss:$0 sm:$0xff] }
0x1d61   :  { %v2209_v61 = vadd.f32 %v2201_v57, %v6090_v25 }
0x1d63   :  { %v2215_v62 = vsel %vm196_vm0, %v2209_v61, 0.0 }
0x1d64   :  { %2216 = vadd.xlane.f32.xlu2 %v2215_v62 }
0x1d84   :  { %v2175_v27 = vpop.f32.mrf.mxu0 }
0x1d8c   :  { %v2177_v24 = vpop.f32.mrf.mxu0 }
0x1d91   :  { %v2203_v29 = vpop.f32.mrf.mxu1 }
0x1d92   :  { %v2204_v3 = vadd.f32 %v2203_v29, %v2175_v27 }
0x1d94   :  { %v2210_v13 = vadd.f32 %v2204_v3, %v6103_v49 }
0x1d96   :  { %v2218_v20 = vsel %vm196_vm0, %v2210_v13, 0.0 }
0x1d97   :  { %2219 = vadd.xlane.f32.xlu0 %v2218_v20 }
0x1d99   :  { %v2205_v32 = vpop.f32.mrf.mxu1 }
0x1d9a   :  { %v2206_v33 = vadd.f32 %v2205_v32, %v2177_v24  ;;  %v5123_v24 = vld [vmem:[%s6632_s15 + $0x18] sm:$0xff] }
0x1d9b   :  { %2407 = vmatpush.bf16.msrb.mxu2 %v5123_v24 }
0x1d9c   :  { %v2211_v35 = vadd.f32 %v2206_v33, %v6105_v50 }
0x1d9e   :  { %v2221_v36 = vsel %vm196_vm0, %v2211_v35, 0.0 }
0x1d9f   :  { %2222 = vadd.xlane.f32.xlu1 %v2221_v36 }
0x1dcf   :  { %v2214_v25 = vpop.xlane.xlu1 %2213 }
0x1dd0   :  { %v2224_v37 = vmul.f32 %v2214_v25, %v5809_v2 }
0x1dd2   :  { %v2228_v9 = vsub.f32 %v2208_v19, %v2224_v37 }
0x1dd4   :  { %v2232_v38 = vmul.f32 %v2228_v9, %v2228_v9 }
0x1dd6   :  { %v2236_v7 = vsel %vm196_vm0, %v2232_v38, 0.0 }
0x1dd7   :  { %v2217_v11 = vpop.xlane.xlu2 %2216  ;;  %2237 = vadd.xlane.f32.xlu2 %v2236_v7 }
0x1dd8   :  { %v2225_v49 = vmul.f32 %v2217_v11, %v5809_v2 }
0x1dda   :  { %v2229_v39 = vsub.f32 %v2209_v61, %v2225_v49 }
0x1ddc   :  { %v2233_v40 = vmul.f32 %v2229_v39, %v2229_v39 }
0x1dde   :  { %v2239_v12 = vsel %vm196_vm0, %v2233_v40, 0.0 }
0x1ddf   :  { %2240 = vadd.xlane.f32.xlu0 %v2239_v12 }
0x1e0a   :  { %v2220_v50 = vpop.xlane.xlu0 %2219 }
0x1e0b   :  { %v2226_v10 = vmul.f32 %v2220_v50, %v5809_v2 }
0x1e0d   :  { %v6213_v53 = vsub.f32 %v2210_v13, %v2226_v10 }
0x1e0f   :  { %v2234_v18 = vmul.f32 %v6213_v53, %v6213_v53 }
0x1e11   :  { %v2242_v43 = vsel %vm196_vm0, %v2234_v18, 0.0 }
0x1e12   :  { %v2223_v44 = vpop.xlane.xlu1 %2222  ;;  %2243 = vadd.xlane.f32.xlu1 %v2242_v43 }
0x1e13   :  { %v2227_v41 = vmul.f32 %v2223_v44, %v5809_v2 }
0x1e15   :  { %v6219_v45 = vsub.f32 %v2211_v35, %v2227_v41 }
0x1e17   :  { %v2235_v46 = vmul.f32 %v6219_v45, %v6219_v45 }
0x1e19   :  { %v2245_v47 = vsel %vm196_vm0, %v2235_v46, 0.0 }
0x1e1a   :  { %2246 = vadd.xlane.f32.xlu2 %v2245_v47 }
0x1e4a   :  { %v2238_v51 = vpop.xlane.xlu2 %2237 }
0x1e4b   :  { %v2248_v15 = vmul.f32 %v2238_v51, %v5809_v2 }
0x1e4d   :  { %v2252_v52 = vadd.f32 1e-05, %v2248_v15  ;;  %v5122_v15 = vld [vmem:[%s6632_s15 + $0x10] sm:$0xff] }
0x1e4e   :  { %2408 = vmatpush.bf16.msrb.mxu2 %v5122_v15 }
0x1e4f   :  { %5419 = vrsqrt.f32 %v2252_v52  ;;  %vm2262_vm8 = vweird.f32 %v2252_v52 }
0x1e52   :  { %v2241_v55 = vpop.xlane.xlu0 %2240  ;;  %2409 = vmatpush.bf16.msrb.mxu2 %v5121_v48 }
0x1e53   :  { %v2249_v56 = vmul.f32 %v2241_v55, %v5809_v2 }
0x1e55   :  { %v5420_v58 = vpop.eup %5419  ;;  %v2253_v59 = vadd.f32 1e-05, %v2249_v56 }
0x1e56   :  { %v2257_v60 = vmul.f32 %v5420_v58, %v2252_v52  ;;  %vm2263_vm7 = vweird.f32 %v5420_v58  ;;  %v5120_v52 = vld [vmem:[%s6632_s15] sm:$0xff] }
0x1e57   :  { %5421 = vrsqrt.f32 %v2253_v59  ;;  %vm2264_vm9 = vmor %vm2262_vm8, %vm2263_vm7  ;;  %vm2272_vm12 = vweird.f32 %v2253_v59  ;;  %2410 = vmatpush.bf16.msrb.mxu2 %v5120_v52 }
0x1e58   :  { %v2258_v63 = vmul.f32 %v5420_v58, %v2257_v60 }
0x1e5a   :  { %v2259_v14 = vmul.f32 0.5, %v2258_v63 }
0x1e5c   :  { %v2260_v28 = vsub.f32 1.5, %v2259_v14 }
0x1e5d   :  { %v5422_v0 = vpop.eup %5421 }
0x1e5e   :  { %v2261_v26 = vmul.f32 %v5420_v58, %v2260_v28  ;;  %v2267_v1 = vmul.f32 %v5422_v0, %v2253_v59  ;;  %vm2273_vm10 = vweird.f32 %v5422_v0 }
0x1e5f   :  { %vm2274_vm13 = vmor %vm2272_vm12, %vm2273_vm10 }
0x1e60   :  { %v2268_v5 = vmul.f32 %v5422_v0, %v2267_v1  ;;  %v2265_v6 = vsel %vm2264_vm9, %v5420_v58, %v2261_v26 }
0x1e61   :  { %v2296_v30 = vmul.f32 %v2265_v6, %v2228_v9 }
0x1e62   :  { %v2269_v8 = vmul.f32 0.5, %v2268_v5 }
0x1e63   :  { %v2304_v54 = vmul.f32 %v5279_v17, %v2296_v30 }
0x1e64   :  { %v2270_v16 = vsub.f32 1.5, %v2269_v8 }
0x1e65   :  { %v2312_v62 = vadd.f32 %v5280_v23, %v2304_v54 }
0x1e66   :  { %v2271_v19 = vmul.f32 %v5422_v0, %v2270_v16 }
0x1e68   :  { %v2275_v21 = vsel %vm2274_vm13, %v5422_v0, %v2271_v19 }
0x1e69   :  { %v2297_v57 = vmul.f32 %v2275_v21, %v2229_v39 }
0x1e6b   :  { %v2305_v61 = vmul.f32 %v5279_v17, %v2297_v57 }
0x1e6d   :  { %v6230_v27 = vadd.f32 %v5280_v23, %v2305_v61 }
0x1e6f   :  { %v2316_v29 = vpack.c.bf16 %v6230_v27, %v2312_v62 }
0x1e71   :  { %4623 = vmatmul.msk.bf16.vlgmr.msrb.gmra.mxu3 %vm196_vm0, %v2316_v29 }
0x1e85   :  { %v2244_v3 = vpop.xlane.xlu1 %2243 }
0x1e86   :  { %v2250_v13 = vmul.f32 %v2244_v3, %v5809_v2 }
0x1e88   :  { %v2254_v20 = vadd.f32 1e-05, %v2250_v13 }
0x1e8a   :  { %5423 = vrsqrt.f32 %v2254_v20  ;;  %vm2282_vm14 = vweird.f32 %v2254_v20 }
0x1e8d   :  { %v2247_v32 = vpop.xlane.xlu2 %2246 }
0x1e8e   :  { %v2251_v33 = vmul.f32 %v2247_v32, %v5809_v2 }
0x1e90   :  { %v5424_v35 = vpop.eup %5423  ;;  %v2255_v36 = vadd.f32 1e-05, %v2251_v33 }
0x1e91   :  { %v2277_v25 = vmul.f32 %v5424_v35, %v2254_v20  ;;  %vm2283_vm2 = vweird.f32 %v5424_v35 }
0x1e92   :  { %5425 = vrsqrt.f32 %v2255_v36  ;;  %vm2284_vm15 = vmor %vm2282_vm14, %vm2283_vm2  ;;  %vm2292_vm5 = vweird.f32 %v2255_v36 }
0x1e93   :  { %v2278_v37 = vmul.f32 %v5424_v35, %v2277_v25 }
0x1e95   :  { %v2279_v9 = vmul.f32 0.5, %v2278_v37 }
0x1e97   :  { %v2280_v38 = vsub.f32 1.5, %v2279_v9 }
0x1e98   :  { %v5426_v7 = vpop.eup %5425 }
0x1e99   :  { %v2281_v11 = vmul.f32 %v5424_v35, %v2280_v38  ;;  %v2287_v49 = vmul.f32 %v5426_v7, %v2255_v36  ;;  %vm2293_vm4 = vweird.f32 %v5426_v7 }
0x1e9a   :  { %vm2294_vm6 = vmor %vm2292_vm5, %vm2293_vm4 }
0x1e9b   :  { %v2288_v39 = vmul.f32 %v5426_v7, %v2287_v49  ;;  %v2285_v40 = vsel %vm2284_vm15, %v5424_v35, %v2281_v11  ;;  %v5125_v49 = vld [vmem:[%s6625_s24 + $0x18] sm:$0xff] }
0x1e9c   :  { %v2298_v10 = vmul.f32 %v2285_v40, %v6213_v53  ;;  %2557 = vmatpush.bf16.msra.mxu0 %v5125_v49 }
0x1e9d   :  { %v2289_v12 = vmul.f32 0.5, %v2288_v39 }
0x1e9e   :  { %v2306_v41 = vmul.f32 %v5279_v17, %v2298_v10 }
0x1e9f   :  { %v2290_v50 = vsub.f32 1.5, %v2289_v12  ;;  %v5124_v12 = vld [vmem:[%s6625_s24 + $0x10] sm:$0xff] }
0x1ea0   :  { %v2314_v47 = vadd.f32 %v5280_v23, %v2306_v41  ;;  %2558 = vmatpush.bf16.msra.mxu0 %v5124_v12 }
0x1ea1   :  { %v2291_v18 = vmul.f32 %v5426_v7, %v2290_v50 }
0x1ea3   :  { %v2295_v43 = vsel %vm2294_vm6, %v5426_v7, %v2291_v18 }
0x1ea4   :  { %v2299_v44 = vmul.f32 %v2295_v43, %v6219_v45 }
0x1ea6   :  { %v2307_v46 = vmul.f32 %v5279_v17, %v2299_v44 }
0x1ea8   :  { %v2315_v42 = vadd.f32 %v5280_v23, %v2307_v46 }
0x1eaa   :  { %v2317_v51 = vpack.c.bf16 %v2315_v42, %v2314_v47 }
0x1eac   :  { %4624 = vmatmul.msk.bf16.gmra.mxu3 %vm196_vm0, %v2317_v51 }
0x1ef4   :  { %v2349_v53 = vpop.f32.mrf.mxu3 }
0x1ef5   :  { %v2359_v56 = vmax.f32 %v2349_v53, 0.0 }
0x1efc   :  { %v2351_v55 = vpop.f32.mrf.mxu3 }
0x1efd   :  { %v2360_v58 = vmax.f32 %v2351_v55, 0.0 }
0x1eff   :  { %v2363_v59 = vpack.c.bf16 %v2360_v58, %v2359_v56  ;;  %v5281_v58 = vld [vmem:[%s6633_s16] ss:$0 sm:$0xff] }
0x1f01   :  { %4641 = vmatmul.msk.bf16.vlgmr.msrb.gmra.mxu2 %vm529_vm11, %v2363_v59 }
0x1f2f   :  { %v2354_v45 = vpop.f32.mrf.mxu3 }
0x1f30   :  { %v2361_v63 = vmax.f32 %v2354_v45, 0.0 }
0x1f37   :  { %v2356_v60 = vpop.f32.mrf.mxu3 }
0x1f38   :  { %v2362_v14 = vmax.f32 %v2356_v60, 0.0 }
0x1f3a   :  { %v2364_v28 = vpack.c.bf16 %v2362_v14, %v2361_v63  ;;  %v5282_v63 = vld [vmem:[%s6634_s18] ss:$0 sm:$0xff] }
0x1f3c   :  { %4642 = vmatmul.msk.bf16.gmra.mxu2 %vm529_vm11, %v2364_v28 }
0x1f84   :  { %v2412_v0 = vpop.f32.mrf.mxu2 }
0x1f85   :  { %v2413_v26 = vadd.f32 %v2412_v0, %v2312_v62 }
0x1f87   :  { %v2422_v1 = vsel %vm196_vm0, %v2413_v26, 0.0 }
0x1f88   :  { %2423 = vadd.xlane.f32.xlu0 %v2422_v1 }
0x1f8c   :  { %v2414_v5 = vpop.f32.mrf.mxu2 }
0x1f8d   :  { %v2415_v6 = vadd.f32 %v2414_v5, %v6230_v27 }
0x1f8f   :  { %v2425_v8 = vsel %vm196_vm0, %v2415_v6, 0.0 }
0x1f90   :  { %2426 = vadd.xlane.f32.xlu1 %v2425_v8 }
0x1fbf   :  { %v2417_v16 = vpop.f32.mrf.mxu2 }
0x1fc0   :  { %v2418_v17 = vadd.f32 %v2417_v16, %v2314_v47 }
0x1fc2   :  { %v2428_v30 = vsel %vm196_vm0, %v2418_v17, 0.0 }
0x1fc3   :  { %2429 = vadd.xlane.f32.xlu2 %v2428_v30 }
0x1fc7   :  { %v2419_v19 = vpop.f32.mrf.mxu2 }
0x1fc8   :  { %v2420_v21 = vadd.f32 %v2419_v19, %v2315_v42 }
0x1fca   :  { %v2431_v23 = vsel %vm196_vm0, %v2420_v21, 0.0 }
0x1fcb   :  { %2432 = vadd.xlane.f32.xlu0 %v2431_v23 }
0x1ffb   :  { %v2424_v54 = vpop.xlane.xlu0 %2423 }
0x1ffc   :  { %v2434_v57 = vmul.f32 %v2424_v54, %v5809_v2 }
0x1ffe   :  { %v2438_v61 = vsub.f32 %v2413_v26, %v2434_v57 }
0x2000   :  { %v2442_v62 = vmul.f32 %v2438_v61, %v2438_v61 }
0x2002   :  { %v2446_v27 = vsel %vm196_vm0, %v2442_v62, 0.0 }
0x2003   :  { %v2427_v29 = vpop.xlane.xlu1 %2426  ;;  %2447 = vadd.xlane.f32.xlu1 %v2446_v27 }
0x2004   :  { %v2435_v3 = vmul.f32 %v2427_v29, %v5809_v2 }
0x2006   :  { %v2439_v13 = vsub.f32 %v2415_v6, %v2435_v3 }
0x2008   :  { %v2443_v20 = vmul.f32 %v2439_v13, %v2439_v13 }
0x200a   :  { %v2449_v24 = vsel %vm196_vm0, %v2443_v20, 0.0 }
0x200b   :  { %2450 = vadd.xlane.f32.xlu2 %v2449_v24 }
0x2036   :  { %v2430_v32 = vpop.xlane.xlu2 %2429 }
0x2037   :  { %v2436_v33 = vmul.f32 %v2430_v32, %v5809_v2 }
0x2039   :  { %v6255_v35 = vsub.f32 %v2418_v17, %v2436_v33 }
0x203b   :  { %v2444_v36 = vmul.f32 %v6255_v35, %v6255_v35 }
0x203d   :  { %v2452_v25 = vsel %vm196_vm0, %v2444_v36, 0.0 }
0x203e   :  { %v2433_v37 = vpop.xlane.xlu0 %2432  ;;  %2453 = vadd.xlane.f32.xlu0 %v2452_v25 }
0x203f   :  { %v2437_v9 = vmul.f32 %v2433_v37, %v5809_v2 }
0x2041   :  { %v6261_v38 = vsub.f32 %v2420_v21, %v2437_v9 }
0x2043   :  { %v2445_v7 = vmul.f32 %v6261_v38, %v6261_v38 }
0x2045   :  { %v2455_v11 = vsel %vm196_vm0, %v2445_v7, 0.0 }
0x2046   :  { %2456 = vadd.xlane.f32.xlu1 %v2455_v11 }
0x2076   :  { %v2448_v39 = vpop.xlane.xlu1 %2447 }
0x2077   :  { %v2458_v40 = vmul.f32 %v2448_v39, %v5809_v2 }
0x2079   :  { %v2462_v50 = vadd.f32 1e-05, %v2458_v40 }
0x207b   :  { %5427 = vrsqrt.f32 %v2462_v50  ;;  %vm2472_vm8 = vweird.f32 %v2462_v50 }
0x207e   :  { %v2451_v10 = vpop.xlane.xlu2 %2450 }
0x207f   :  { %v2459_v18 = vmul.f32 %v2451_v10, %v5809_v2 }
0x2081   :  { %v5428_v43 = vpop.eup %5427  ;;  %v2463_v44 = vadd.f32 1e-05, %v2459_v18 }
0x2082   :  { %v2467_v41 = vmul.f32 %v5428_v43, %v2462_v50  ;;  %vm2473_vm7 = vweird.f32 %v5428_v43 }
0x2083   :  { %5429 = vrsqrt.f32 %v2463_v44  ;;  %vm2474_vm9 = vmor %vm2472_vm8, %vm2473_vm7  ;;  %vm2482_vm12 = vweird.f32 %v2463_v44 }
0x2084   :  { %v2468_v46 = vmul.f32 %v5428_v43, %v2467_v41 }
0x2086   :  { %v2469_v47 = vmul.f32 0.5, %v2468_v46 }
0x2088   :  { %v2470_v42 = vsub.f32 1.5, %v2469_v47 }
0x2089   :  { %v5430_v51 = vpop.eup %5429 }
0x208a   :  { %v2471_v15 = vmul.f32 %v5428_v43, %v2470_v42  ;;  %v2477_v48 = vmul.f32 %v5430_v51, %v2463_v44  ;;  %vm2483_vm10 = vweird.f32 %v5430_v51 }
0x208b   :  { %vm2484_vm13 = vmor %vm2482_vm12, %vm2483_vm10 }
0x208c   :  { %v2478_v52 = vmul.f32 %v5430_v51, %v2477_v48  ;;  %v2475_v53 = vsel %vm2474_vm9, %v5428_v43, %v2471_v15 }
0x208d   :  { %v2506_v59 = vmul.f32 %v2475_v53, %v2438_v61 }
0x208e   :  { %v2479_v55 = vmul.f32 0.5, %v2478_v52 }
0x208f   :  { %v2514_v14 = vmul.f32 %v5281_v58, %v2506_v59 }
0x2090   :  { %v2480_v56 = vsub.f32 1.5, %v2479_v55 }
0x2091   :  { %v6272_v26 = vadd.f32 %v5282_v63, %v2514_v14 }
0x2092   :  { %v2481_v45 = vmul.f32 %v5430_v51, %v2480_v56 }
0x2094   :  { %v2485_v60 = vsel %vm2484_vm13, %v5430_v51, %v2481_v45 }
0x2095   :  { %v2507_v28 = vmul.f32 %v2485_v60, %v2439_v13 }
0x2097   :  { %v2515_v0 = vmul.f32 %v5281_v58, %v2507_v28 }
0x2099   :  { %v6274_v1 = vadd.f32 %v5282_v63, %v2515_v0 }
0x209b   :  { %v2526_v5 = vpack.c.bf16 %v6274_v1, %v6272_v26 }
0x209d   :  { %4655 = vmatmul.msk.bf16.vlgmr.msra.gmra.mxu0 %vm196_vm0, %v2526_v5 }
0x20b1   :  { %v2454_v6 = vpop.xlane.xlu0 %2453 }
0x20b2   :  { %v2460_v8 = vmul.f32 %v2454_v6, %v5809_v2 }
0x20b4   :  { %v2464_v16 = vadd.f32 1e-05, %v2460_v8 }
0x20b6   :  { %5431 = vrsqrt.f32 %v2464_v16  ;;  %vm2492_vm14 = vweird.f32 %v2464_v16 }
0x20b9   :  { %v2457_v17 = vpop.xlane.xlu1 %2456 }
0x20ba   :  { %v2461_v30 = vmul.f32 %v2457_v17, %v5809_v2 }
0x20bc   :  { %v5432_v19 = vpop.eup %5431  ;;  %v2465_v21 = vadd.f32 1e-05, %v2461_v30 }
0x20bd   :  { %v2487_v23 = vmul.f32 %v5432_v19, %v2464_v16  ;;  %vm2493_vm2 = vweird.f32 %v5432_v19 }
0x20be   :  { %5433 = vrsqrt.f32 %v2465_v21  ;;  %vm2494_vm15 = vmor %vm2492_vm14, %vm2493_vm2  ;;  %vm2502_vm5 = vweird.f32 %v2465_v21 }
0x20bf   :  { %v2488_v54 = vmul.f32 %v5432_v19, %v2487_v23 }
0x20c1   :  { %v2489_v57 = vmul.f32 0.5, %v2488_v54 }
0x20c3   :  { %v2490_v61 = vsub.f32 1.5, %v2489_v57 }
0x20c4   :  { %v5434_v62 = vpop.eup %5433 }
0x20c5   :  { %v2491_v27 = vmul.f32 %v5432_v19, %v2490_v61  ;;  %v2497_v29 = vmul.f32 %v5434_v62, %v2465_v21  ;;  %vm2503_vm4 = vweird.f32 %v5434_v62 }
0x20c6   :  { %vm2504_vm6 = vmor %vm2502_vm5, %vm2503_vm4 }
0x20c7   :  { %v2498_v3 = vmul.f32 %v5434_v62, %v2497_v29  ;;  %v2495_v13 = vsel %vm2494_vm15, %v5432_v19, %v2491_v27 }
0x20c8   :  { %v2508_v32 = vmul.f32 %v2495_v13, %v6255_v35 }
0x20c9   :  { %v2499_v20 = vmul.f32 0.5, %v2498_v3 }
0x20ca   :  { %v2516_v37 = vmul.f32 %v5281_v58, %v2508_v32 }
0x20cb   :  { %v2500_v24 = vsub.f32 1.5, %v2499_v20 }
0x20cc   :  { %v6283_v7 = vadd.f32 %v5282_v63, %v2516_v37 }
0x20cd   :  { %v2501_v33 = vmul.f32 %v5434_v62, %v2500_v24 }
0x20cf   :  { %v2505_v36 = vsel %vm2504_vm6, %v5434_v62, %v2501_v33 }
0x20d0   :  { %v2509_v25 = vmul.f32 %v2505_v36, %v6261_v38 }
0x20d2   :  { %v2517_v9 = vmul.f32 %v5281_v58, %v2509_v25 }
0x20d4   :  { %v6285_v11 = vadd.f32 %v5282_v63, %v2517_v9 }
0x20d6   :  { %v2527_v49 = vpack.c.bf16 %v6285_v11, %v6283_v7 }
0x20d8   :  { %4656 = vmatmul.msk.bf16.gmra.mxu0 %vm196_vm0, %v2527_v49 }
0x211a   :  { %v2560_v39 = vpop.f32.mrf.mxu0 }
0x2122   :  { %v2562_v40 = vpop.f32.mrf.mxu0 }
0x2123   :  { %v6290_v35 = vpack.c.bf16 %v2562_v40, %v2560_v39 }
0x2125   :  { %2577 = vrot.lane.b32.xlu1 %v6290_v35, %s5551_s1 }
0x2155   :  { %v2565_v12 = vpop.f32.mrf.mxu0 }
0x215d   :  { %v2567_v38 = vpop.f32.mrf.mxu0 }
0x215e   :  { %v2574_v50 = vpack.c.bf16 %v2567_v38, %v2565_v12 }
0x2160   :  { %2697 = vrot.lane.b32.xlu0 %v2574_v50, %s5552_s5  ;;  %2579 = vrot.lane.b32.xlu2 %v2574_v50, %s5551_s1 }
0x2168   :  { %2691 = vrot.lane.b32.xlu0 %v6290_v35, %s5550_s21  ;;  %2695 = vrot.lane.b32.xlu2 %v6290_v35, %s5552_s5 }
0x2170   :  { %2693 = vrot.lane.b32.xlu2 %v2574_v50, %s5550_s21 }
0x2197   :  { %v2578_v43 = vpop.permute.xlu1 %2577 }
0x2198   :  { %v2588_v44 = vsel %vm220_vm1, %v2578_v43, 0 }
0x21ba   :  { %v2580_v10 = vpop.permute.xlu2 %2579 }
0x21bb   :  { %v2591_v18 = vsel %vm220_vm1, %v2580_v10, 0 }
0x21bc   :  { %2599 = vmatpush.bf16.xpose.msrb.mxu1 %v2591_v18 }
0x21c2   :  { %v2696_v47 = vpop.permute.xlu2 %2695 }
0x21c3   :  { %v2706_v42 = vsel %vm220_vm1, %v2696_v47, 0 }
0x21c4   :  { %2600 = vmatpush.bf16.xpose.msrb.mxu1 %v2588_v44 }
0x21ca   :  { %v2694_v15 = vpop.permute.xlu2 %2693 }
0x21cb   :  { %4659 = vmatmul.msk.bf16.vlgmr.msrb.gmra.mxu1 %vm220_vm1, %v6290_v35 }
0x21d2   :  { %v2698_v41 = vpop.permute.xlu0 %2697 }
0x21d3   :  { %v2709_v46 = vsel %vm220_vm1, %v2698_v41, 0 }
0x21d4   :  { %2717 = vmatpush.bf16.xpose.msra.mxu2 %v2709_v46 }
0x21da   :  { %v2692_v51 = vpop.permute.xlu0 %2691 }
0x21db   :  { %4660 = vmatmul.msk.bf16.gmra.mxu1 %vm220_vm1, %v2574_v50 }
0x21dc   :  { %2718 = vmatpush.bf16.xpose.msra.mxu2 %v2706_v42 }
0x21e3   :  { %4663 = vmatmul.msk.bf16.vlgmr.msra.gmra.mxu2 %vm220_vm1, %v2692_v51 }
0x21f3   :  { %4664 = vmatmul.msk.bf16.gmra.mxu2 %vm220_vm1, %v2694_v15 }
0x2248   :  { %v2602_v48 = vpop.f32.mrf.mxu1 }
0x2249   :  { %v2603_v52 = vadd.f32 %v2602_v48, %v6139_v4 }
0x224b   :  { %v2612_v53 = vsel %vm196_vm0, %v2603_v52, -inf }
0x224c   :  { %2613 = vmax.xlane.f32.xlu0 %v2612_v53 }
0x2250   :  { %v2604_v55 = vpop.f32.mrf.mxu1 }
0x2251   :  { %v2605_v56 = vadd.f32 %v2604_v55, %v6146_v22 }
0x2253   :  { %v2615_v58 = vsel %vm196_vm0, %v2605_v56, -inf }
0x2254   :  { %2616 = vmax.xlane.f32.xlu1 %v2615_v58 }
0x2258   :  { %v2607_v0 = vpop.f32.mrf.mxu1 }
0x2259   :  { %v2608_v37 = vadd.f32 %v2607_v0, %v6153_v31 }
0x225b   :  { %v2618_v9 = vsel %vm196_vm0, %v2608_v37, -inf }
0x2260   :  { %2660 = vrot.lane.b32.xlu0 %v2574_v50, %s5554_s13  ;;  %v2609_v6 = vpop.f32.mrf.mxu1 }
0x2261   :  { %v2610_v17 = vadd.f32 %v2609_v6, %v6163_v34 }
0x2266   :  { %v2720_v59 = vpop.f32.mrf.mxu2 }
0x2267   :  { %v2721_v45 = vadd.f32 %v2720_v59, %v6139_v4  ;;  %v2621_v4 = vsel %vm196_vm0, %v2610_v17, -inf }
0x2269   :  { %v2730_v60 = vsel %vm196_vm0, %v2721_v45, -inf }
0x226a   :  { %2731 = vmax.xlane.f32.xlu2 %v2730_v60 }
0x226e   :  { %v2722_v63 = vpop.f32.mrf.mxu2 }
0x226f   :  { %v2723_v14 = vadd.f32 %v2722_v63, %v6146_v22 }
0x2271   :  { %v2733_v28 = vsel %vm196_vm0, %v2723_v14, -inf }
0x2276   :  { %v2725_v33 = vpop.f32.mrf.mxu2 }
0x2277   :  { %v2726_v43 = vadd.f32 %v2725_v33, %v6153_v31 }
0x227e   :  { %v2727_v49 = vpop.f32.mrf.mxu2 }
0x227f   :  { %v2728_v40 = vadd.f32 %v2727_v49, %v6163_v34  ;;  %v2736_v34 = vsel %vm196_vm0, %v2726_v43, -inf }
0x2281   :  { %v2739_v12 = vsel %vm196_vm0, %v2728_v40, -inf }
0x228a   :  { %2734 = vmax.xlane.f32.xlu0 %v2733_v28 }
0x229e   :  { %2778 = vrot.lane.b32.xlu0 %v2574_v50, %s5553_s2 }
0x22bf   :  { %v2614_v5 = vpop.xlane.xlu0 %2613 }
0x22c0   :  { %v2624_v8 = vsub.f32 %v2603_v52, %v2614_v5 }
0x22c2   :  { %v2628_v16 = vmul.f32 1.442695, %v2624_v8 }
0x22c4   :  { %5435 = vpow2.f32 %v2628_v16 }
0x22c7   :  { %v2617_v21 = vpop.xlane.xlu1 %2616 }
0x22c8   :  { %2622 = vmax.xlane.f32.xlu0 %v2621_v4  ;;  %v2625_v57 = vsub.f32 %v2605_v56, %v2617_v21 }
0x22ca   :  { %v5436_v30 = vpop.eup %5435  ;;  %v2630_v62 = vmul.f32 1.442695, %v2625_v57  ;;  %v4657_v57 = vld [vmem:[%s6628_s6 + $0x8] sm:$0xf] }
0x22cb   :  { %v2636_v19 = vsel %vm196_vm0, %v5436_v30, 0.0 }
0x22cc   :  { %2637 = vadd.xlane.f32.xlu1 %v2636_v19 }
0x22d2   :  { %v2661_v22 = vpop.permute.xlu0 %2660 }
0x22d3   :  { %2676 = vmatpush.bf16.msra.mxu3 %v2661_v22 }
0x22dd   :  { %v2732_v23 = vpop.xlane.xlu2 %2731 }
0x22de   :  { %v2742_v54 = vsub.f32 %v2721_v45, %v2732_v23  ;;  %v4658_v23 = vld [vmem:[%s6628_s6 + $0xc] sm:$0xf] }
0x22e0   :  { %v2746_v61 = vmul.f32 1.442695, %v2742_v54  ;;  %v2816_v54 = vsel %vm357_vm3, %v4658_v23, 0 }
0x22e1   :  { %2825 = vmatpush.bf16.msra.mxu1 %v2816_v54 }
0x22e2   :  { %5437 = vpow2.f32 %v2746_v61  ;;  %v2844_v61 = vsel %vm357_vm3, %v4657_v57, 0 }
0x22e3   :  { %5439 = vpow2.f32 %v2630_v62 }
0x22e5   :  { %2658 = vrot.lane.b32.xlu1 %v6290_v35, %s5554_s13 }
0x22e8   :  { %v5438_v27 = vpop.eup %5437 }
0x22e9   :  { %v2754_v29 = vsel %vm196_vm0, %v5438_v27, 0.0  ;;  %v5440_v3 = vpop.eup %5439 }
0x22ea   :  { %2755 = vadd.xlane.f32.xlu2 %v2754_v29  ;;  %v2639_v13 = vsel %vm196_vm0, %v5440_v3, 0.0 }
0x22f2   :  { %2640 = vadd.xlane.f32.xlu2 %v2639_v13 }
0x22fd   :  { %v2735_v20 = vpop.xlane.xlu0 %2734 }
0x22fe   :  { %v2743_v24 = vsub.f32 %v2723_v14, %v2735_v20 }
0x2300   :  { %v2748_v32 = vmul.f32 1.442695, %v2743_v24 }
0x2302   :  { %5441 = vpow2.f32 %v2748_v32 }
0x2308   :  { %v5442_v36 = vpop.eup %5441 }
0x2309   :  { %v2757_v25 = vsel %vm196_vm0, %v5442_v36, 0.0 }
0x230a   :  { %2758 = vadd.xlane.f32.xlu2 %v2757_v25 }
0x230f   :  { %2619 = vmax.xlane.f32.xlu1 %v2618_v9 }
0x2310   :  { %v2779_v39 = vpop.permute.xlu0 %2778 }
0x2311   :  { %2794 = vmatpush.bf16.msrb.mxu0 %v2779_v39 }
0x2317   :  { %2740 = vmax.xlane.f32.xlu1 %v2739_v12 }
0x2322   :  { %2776 = vrot.lane.b32.xlu2 %v6290_v35, %s5553_s2 }
0x233b   :  { %v2623_v38 = vpop.xlane.xlu0 %2622 }
0x233c   :  { %v2627_v50 = vsub.f32 %v2610_v17, %v2623_v38 }
0x233e   :  { %v2634_v10 = vmul.f32 1.442695, %v2627_v50 }
0x233f   :  { %v2638_v41 = vpop.xlane.xlu1 %2637 }
0x2340   :  { %5443 = vpow2.f32 %v2634_v10 }
0x2341   :  { %5445 = vrcp.f32 %v2638_v41 }
0x2346   :  { %v6334_v18 = vpop.eup %5443 }
0x2347   :  { %v2645_v44 = vsel %vm196_vm0, %v6334_v18, 0.0  ;;  %v5446_v42 = vpop.eup %5445 }
0x2348   :  { %2646 = vadd.xlane.f32.xlu1 %v2645_v44  ;;  %v2652_v15 = vmul.f32 %v5446_v42, %v5436_v30 }
0x234b   :  { %2737 = vmax.xlane.f32.xlu2 %v2736_v34 }
0x2357   :  { %v2659_v46 = vpop.permute.xlu1 %2658 }
0x2358   :  { %2677 = vmatpush.bf16.msra.mxu3 %v2659_v46 }
0x235c   :  { %2853 = vmatpush.bf16.msrb.mxu3 %v2844_v61  ;;  %v5126_v61 = vld [vmem:[%s6629_s7 + $0x10] sm:$0xff] }
0x235d   :  { %v2756_v47 = vpop.xlane.xlu2 %2755 }
0x2365   :  { %v2641_v35 = vpop.xlane.xlu2 %2640 }
0x2366   :  { %5447 = vrcp.f32 %v2641_v35 }
0x2367   :  { %5449 = vrcp.f32 %v2756_v47 }
0x236c   :  { %v5448_v51 = vpop.eup %5447 }
0x236d   :  { %v2653_v48 = vmul.f32 %v5448_v51, %v5440_v3  ;;  %v5450_v53 = vpop.eup %5449 }
0x236e   :  { %v2770_v59 = vmul.f32 %v5450_v53, %v5438_v27 }
0x236f   :  { %v2656_v52 = vpack.c.bf16 %v2653_v48, %v2652_v15 }
0x2371   :  { %4661 = vmatmul.msk.bf16.vlgmr.msra.gmra.mxu3 %vm196_vm0, %v2656_v52 }
0x237d   :  { %v2759_v31 = vpop.xlane.xlu2 %2758 }
0x237e   :  { %5451 = vrcp.f32 %v2759_v31 }
0x2382   :  { %v2620_v55 = vpop.xlane.xlu1 %2619 }
0x2383   :  { %v2626_v56 = vsub.f32 %v2608_v37, %v2620_v55 }
0x2384   :  { %v5452_v58 = vpop.eup %5451 }
0x2385   :  { %v2771_v45 = vmul.f32 %v5452_v58, %v5442_v36  ;;  %v2632_v60 = vmul.f32 1.442695, %v2626_v56  ;;  %v2777_v63 = vpop.permute.xlu2 %2776 }
0x2386   :  { %2795 = vmatpush.bf16.msrb.mxu0 %v2777_v63 }
0x2387   :  { %v2774_v14 = vpack.c.bf16 %v2771_v45, %v2770_v59  ;;  %5453 = vpow2.f32 %v2632_v60 }
0x2389   :  { %4665 = vmatmul.msk.bf16.vlgmr.msrb.gmra.mxu0 %vm196_vm0, %v2774_v14 }
0x238a   :  { %v2741_v28 = vpop.xlane.xlu1 %2740 }
0x238b   :  { %v2745_v0 = vsub.f32 %v2728_v40, %v2741_v28 }
0x238d   :  { %v5454_v5 = vpop.eup %5453  ;;  %v2752_v6 = vmul.f32 1.442695, %v2745_v0 }
0x238e   :  { %v2642_v8 = vsel %vm196_vm0, %v5454_v5, 0.0 }
0x238f   :  { %5455 = vpow2.f32 %v2752_v6  ;;  %2643 = vadd.xlane.f32.xlu0 %v2642_v8 }
0x2395   :  { %v5456_v16 = vpop.eup %5455 }
0x2396   :  { %v2763_v17 = vsel %vm196_vm0, %v5456_v16, 0.0 }
0x2397   :  { %2764 = vadd.xlane.f32.xlu1 %v2763_v17 }
0x23bb   :  { %v2647_v62 = vpop.xlane.xlu1 %2646 }
0x23be   :  { %v2738_v4 = vpop.xlane.xlu2 %2737 }
0x23bf   :  { %v2744_v30 = vsub.f32 %v2726_v43, %v2738_v4 }
0x23c1   :  { %v2750_v19 = vmul.f32 1.442695, %v2744_v30 }
0x23c3   :  { %5457 = vpow2.f32 %v2750_v19 }
0x23c4   :  { %5459 = vrcp.f32 %v2647_v62 }
0x23c9   :  { %v5458_v22 = vpop.eup %5457 }
0x23ca   :  { %v2760_v21 = vsel %vm196_vm0, %v5458_v22, 0.0  ;;  %v5460_v3 = vpop.eup %5459 }
0x23cb   :  { %2761 = vadd.xlane.f32.xlu0 %v2760_v21  ;;  %v2655_v20 = vmul.f32 %v5460_v3, %v6334_v18  ;;  %v5127_v21 = vld [vmem:[%s6629_s7 + $0x18] sm:$0xff] }
0x23cc   :  { %3006 = vmatpush.bf16.msrb.mxu2 %v5127_v21 }
0x23d0   :  { %3007 = vmatpush.bf16.msrb.mxu2 %v5126_v61 }
0x23f4   :  { %v2679_v36 = vpop.f32.mrf.mxu3 }
0x23fc   :  { %v2681_v37 = vpop.f32.mrf.mxu3 }
0x23fd   :  { %v2689_v9 = vpack.c.bf16 %v2681_v37, %v2679_v36 }
0x2402   :  { %v2644_v27 = vpop.xlane.xlu0 %2643 }
0x2403   :  { %5461 = vrcp.f32 %v2644_v27 }
0x2406   :  { %v2797_v29 = vpop.f32.mrf.mxu0 }
0x2409   :  { %v5462_v13 = vpop.eup %5461 }
0x240a   :  { %v2654_v24 = vmul.f32 %v5462_v13, %v5454_v5  ;;  %v2765_v49 = vpop.xlane.xlu1 %2764 }
0x240b   :  { %5463 = vrcp.f32 %v2765_v49  ;;  %v6373_v49 = vld [vmem:[%s6630_s10 + $0x1] ss:$0 sm:$0xff] }
0x240c   :  { %v2657_v32 = vpack.c.bf16 %v2655_v20, %v2654_v24 }
0x240e   :  { %4662 = vmatmul.msk.bf16.gmra.mxu3 %vm196_vm0, %v2657_v32  ;;  %v2799_v33 = vpop.f32.mrf.mxu0 }
0x240f   :  { %v2807_v25 = vpack.c.bf16 %v2799_v33, %v2797_v29 }
0x2411   :  { %4667 = vmatmul.msk.bf16.vlgmr.msra.gmra.mxu1 %vm220_vm1, %v2807_v25  ;;  %v5464_v40 = vpop.eup %5463 }
0x2412   :  { %v2773_v38 = vmul.f32 %v5464_v40, %v5456_v16 }
0x241e   :  { %4669 = vmatmul.msk.bf16.vlgmr.msrb.gmra.mxu3 %vm220_vm1, %v2689_v9 }
0x243e   :  { %v2762_v39 = vpop.xlane.xlu0 %2761 }
0x243f   :  { %5465 = vrcp.f32 %v2762_v39 }
0x2445   :  { %v5466_v12 = vpop.eup %5465 }
0x2446   :  { %v2772_v50 = vmul.f32 %v5466_v12, %v5458_v22 }
0x2448   :  { %v2775_v10 = vpack.c.bf16 %v2773_v38, %v2772_v50  ;;  %v6376_v38 = vld [vmem:[%s6631_s11 + $0x1] ss:$0 sm:$0xff] }
0x244a   :  { %4666 = vmatmul.msk.bf16.gmra.mxu0 %vm196_vm0, %v2775_v10 }
0x248e   :  { %v2827_v34 = vpop.f32.mrf.mxu1 }
0x2491   :  { %v2684_v18 = vpop.f32.mrf.mxu3 }
0x2496   :  { %v2829_v42 = vpop.f32.mrf.mxu1 }
0x2499   :  { %v2686_v43 = vpop.f32.mrf.mxu3 }
0x249a   :  { %v2690_v44 = vpack.c.bf16 %v2686_v43, %v2684_v18 }
0x249c   :  { %4670 = vmatmul.msk.bf16.gmra.mxu3 %vm220_vm1, %v2690_v44 }
0x24a1   :  { %v2855_v41 = vpop.f32.mrf.mxu3 }
0x24a2   :  { %v2856_v46 = vadd.f32 %v2855_v41, %v2827_v34  ;;  %v5131_v34 = vld [vmem:[%s6632_s15 + $0x38] sm:$0xff] }
0x24a3   :  { %3068 = vmatpush.bf16.msra.mxu0 %v5131_v34 }
0x24a4   :  { %v2865_v47 = vadd.f32 %v2856_v46, %v6272_v26 }
0x24a6   :  { %v2869_v35 = vsel %vm196_vm0, %v2865_v47, 0.0 }
0x24a7   :  { %2870 = vadd.xlane.f32.xlu0 %v2869_v35 }
0x24a9   :  { %v2857_v51 = vpop.f32.mrf.mxu3 }
0x24aa   :  { %v2858_v15 = vadd.f32 %v2857_v51, %v2829_v42 }
0x24ac   :  { %v2866_v48 = vadd.f32 %v2858_v15, %v6274_v1 }
0x24ae   :  { %v2872_v52 = vsel %vm196_vm0, %v2866_v48, 0.0 }
0x24af   :  { %2873 = vadd.xlane.f32.xlu2 %v2872_v52 }
0x24c7   :  { %v2802_v31 = vpop.f32.mrf.mxu0 }
0x24cf   :  { %v2804_v53 = vpop.f32.mrf.mxu0 }
0x24d0   :  { %v2808_v55 = vpack.c.bf16 %v2804_v53, %v2802_v31 }
0x24d2   :  { %4668 = vmatmul.msk.bf16.gmra.mxu1 %vm220_vm1, %v2808_v55  ;;  %v5130_v55 = vld [vmem:[%s6632_s15 + $0x30] sm:$0xff] }
0x24d3   :  { %3069 = vmatpush.bf16.msra.mxu0 %v5130_v55  ;;  %v5139_v55 = vld [vmem:[#allocation2 + $0x34] sm:$0xf0] }
0x251a   :  { %v2871_v56 = vpop.xlane.xlu0 %2870 }
0x251b   :  { %v2881_v58 = vmul.f32 %v2871_v56, %v5809_v2  ;;  %v5129_v56 = vld [vmem:[%s6632_s15 + $0x28] sm:$0xff] }
0x251c   :  { %3070 = vmatpush.bf16.msra.mxu0 %v5129_v56  ;;  %v5138_v56 = vld [vmem:[#allocation2 + $0x34] sm:$0xf] }
0x251d   :  { %v2885_v26 = vsub.f32 %v2865_v47, %v2881_v58  ;;  %v5128_v58 = vld [vmem:[%s6632_s15 + $0x20] sm:$0xff] }
0x251f   :  { %v2889_v59 = vmul.f32 %v2885_v26, %v2885_v26  ;;  %v2860_v0 = vpop.f32.mrf.mxu3 }
0x2520   :  { %3071 = vmatpush.bf16.msra.mxu0 %v5128_v58 }
0x2521   :  { %v2893_v45 = vsel %vm196_vm0, %v2889_v59, 0.0 }
0x2522   :  { %2894 = vadd.xlane.f32.xlu1 %v2893_v45  ;;  %v2874_v60 = vpop.xlane.xlu2 %2873 }
0x2523   :  { %v2882_v63 = vmul.f32 %v2874_v60, %v5809_v2 }
0x2525   :  { %v2886_v1 = vsub.f32 %v2866_v48, %v2882_v63 }
0x2527   :  { %v2890_v14 = vmul.f32 %v2886_v1, %v2886_v1  ;;  %v2862_v17 = vpop.f32.mrf.mxu3 }
0x2529   :  { %v2896_v28 = vsel %vm196_vm0, %v2890_v14, 0.0 }
0x252a   :  { %2897 = vadd.xlane.f32.xlu0 %v2896_v28 }
0x254f   :  { %v2832_v5 = vpop.f32.mrf.mxu1 }
0x2550   :  { %v2861_v6 = vadd.f32 %v2860_v0, %v2832_v5 }
0x2552   :  { %v2867_v8 = vadd.f32 %v2861_v6, %v6283_v7 }
0x2554   :  { %v2875_v16 = vsel %vm196_vm0, %v2867_v8, 0.0 }
0x2555   :  { %2876 = vadd.xlane.f32.xlu2 %v2875_v16 }
0x2557   :  { %v2834_v4 = vpop.f32.mrf.mxu1 }
0x2558   :  { %v2863_v30 = vadd.f32 %v2862_v17, %v2834_v4 }
0x255a   :  { %v2868_v19 = vadd.f32 %v2863_v30, %v6285_v11 }
0x255c   :  { %v2878_v22 = vsel %vm196_vm0, %v2868_v19, 0.0 }
0x255d   :  { %2879 = vadd.xlane.f32.xlu1 %v2878_v22 }
0x2595   :  { %v2895_v23 = vpop.xlane.xlu1 %2894 }
0x2596   :  { %v2905_v54 = vmul.f32 %v2895_v23, %v5809_v2 }
0x2598   :  { %v2909_v57 = vadd.f32 1e-05, %v2905_v54 }
0x259a   :  { %5467 = vrsqrt.f32 %v2909_v57  ;;  %vm2919_vm3 = vweird.f32 %v2909_v57 }
0x259d   :  { %v2898_v7 = vpop.xlane.xlu0 %2897 }
0x259e   :  { %v2906_v62 = vmul.f32 %v2898_v7, %v5809_v2 }
0x25a0   :  { %v5468_v27 = vpop.eup %5467  ;;  %v2910_v29 = vadd.f32 1e-05, %v2906_v62 }
0x25a1   :  { %v2914_v3 = vmul.f32 %v5468_v27, %v2909_v57  ;;  %vm2920_vm1 = vweird.f32 %v5468_v27 }
0x25a2   :  { %5469 = vrsqrt.f32 %v2910_v29  ;;  %vm2921_vm7 = vmor %vm2919_vm3, %vm2920_vm1  ;;  %vm2929_vm9 = vweird.f32 %v2910_v29 }
0x25a3   :  { %v2915_v11 = vmul.f32 %v5468_v27, %v2914_v3 }
0x25a5   :  { %v2916_v13 = vmul.f32 0.5, %v2915_v11 }
0x25a7   :  { %v2917_v20 = vsub.f32 1.5, %v2916_v13 }
0x25a8   :  { %v5470_v24 = vpop.eup %5469 }
0x25a9   :  { %v2918_v32 = vmul.f32 %v5468_v27, %v2917_v20  ;;  %v2924_v33 = vmul.f32 %v5470_v24, %v2910_v29  ;;  %vm2930_vm8 = vweird.f32 %v5470_v24 }
0x25aa   :  { %vm2931_vm10 = vmor %vm2929_vm9, %vm2930_vm8 }
0x25ab   :  { %v2925_v36 = vmul.f32 %v5470_v24, %v2924_v33  ;;  %v2922_v25 = vsel %vm2921_vm7, %v5468_v27, %v2918_v32 }
0x25ac   :  { %v2953_v39 = vmul.f32 %v2922_v25, %v2885_v26 }
0x25ad   :  { %v2926_v37 = vmul.f32 0.5, %v2925_v36 }
0x25ae   :  { %v2962_v50 = vmul.f32 %v6373_v49, %v2953_v39 }
0x25af   :  { %v2927_v9 = vsub.f32 1.5, %v2926_v37 }
0x25b0   :  { %v6381_v43 = vadd.f32 %v6376_v38, %v2962_v50 }
0x25b1   :  { %v2928_v40 = vmul.f32 %v5470_v24, %v2927_v9 }
0x25b3   :  { %v2932_v12 = vsel %vm2931_vm10, %v5470_v24, %v2928_v40 }
0x25b4   :  { %v2954_v10 = vmul.f32 %v2932_v12, %v2886_v1 }
0x25b6   :  { %v2963_v18 = vmul.f32 %v6373_v49, %v2954_v10 }
0x25b8   :  { %v6384_v44 = vadd.f32 %v6376_v38, %v2963_v18 }
0x25ba   :  { %v2975_v41 = vpack.c.bf16 %v6384_v44, %v6381_v43 }
0x25bc   :  { %4685 = vmatmul.msk.bf16.vlgmr.msrb.gmra.mxu2 %vm196_vm0, %v2975_v41 }
0x25c8   :  { %v2877_v46 = vpop.xlane.xlu2 %2876 }
0x25c9   :  { %v2883_v47 = vmul.f32 %v2877_v46, %v5809_v2 }
0x25cb   :  { %v2887_v35 = vsub.f32 %v2867_v8, %v2883_v47 }
0x25cd   :  { %v2891_v42 = vmul.f32 %v2887_v35, %v2887_v35 }
0x25cf   :  { %v2899_v51 = vsel %vm196_vm0, %v2891_v42, 0.0 }
0x25d0   :  { %v2880_v15 = vpop.xlane.xlu1 %2879  ;;  %2900 = vadd.xlane.f32.xlu0 %v2899_v51 }
0x25d1   :  { %v2884_v48 = vmul.f32 %v2880_v15, %v5809_v2 }
0x25d3   :  { %v2888_v52 = vsub.f32 %v2868_v19, %v2884_v48 }
0x25d5   :  { %v2892_v31 = vmul.f32 %v2888_v52, %v2888_v52 }
0x25d7   :  { %v2902_v53 = vsel %vm196_vm0, %v2892_v31, 0.0 }
0x25d8   :  { %2903 = vadd.xlane.f32.xlu2 %v2902_v53  ;;  %v4725_v53 = vld [vmem:[#allocation2 + $0x30] sm:$0xf] }
0x25d9   :  { %v4726_v58 = vor.u32 %v5139_v55, %v4725_v53 }
0x25db   :  { %3230 = vmatpush.bf16.msrb.mxu1 %v4726_v58  ;;  %v6433_v58 = vld [vmem:[%s6633_s16 + $0x1] ss:$0 sm:$0xff] }
0x263f   :  { %v3009_v26 = vpop.f32.mrf.mxu2 }
0x2640   :  { %v3019_v1 = vmax.f32 %v3009_v26, 0.0  ;;  %v4727_v26 = vld [vmem:[#allocation2 + $0x38] sm:$0xf0] }
0x2643   :  { %v2901_v59 = vpop.xlane.xlu0 %2900 }
0x2644   :  { %v2907_v45 = vmul.f32 %v2901_v59, %v5809_v2  ;;  %v4761_v59 = vld [vmem:[#allocation2 + $0x50] sm:$0xf] }
0x2646   :  { %v2911_v60 = vadd.f32 1e-05, %v2907_v45  ;;  %v5143_v45 = vld [vmem:[#allocation2 + $0x54] sm:$0xf0] }
0x2647   :  { %v3011_v63 = vpop.f32.mrf.mxu2 }
0x2648   :  { %5471 = vrsqrt.f32 %v2911_v60  ;;  %v3020_v14 = vmax.f32 %v3011_v63, 0.0  ;;  %vm2939_vm13 = vweird.f32 %v2911_v60  ;;  %v4762_v63 = vor.u32 %v5143_v45, %v4761_v59  ;;  %v6436_v45 = vld [vmem:[%s6634_s18 + $0x1] ss:$0 sm:$0xff] }
0x264a   :  { %v3023_v28 = vpack.c.bf16 %v3020_v14, %v3019_v1  ;;  %v5142_v1 = vld [vmem:[#allocation2 + $0x54] sm:$0xf]  ;;  %v4763_v14 = vld [vmem:[#allocation2 + $0x58] sm:$0xf0]  ;;  %3334 = vmatpush.bf16.msra.mxu2 %v4762_v63 }
0x264b   :  { %v2904_v0 = vpop.xlane.xlu2 %2903 }
0x264c   :  { %v2908_v5 = vmul.f32 %v2904_v0, %v5809_v2  ;;  %4711 = vmatmul.msk.bf16.vlgmr.msra.gmra.mxu0 %vm529_vm11, %v3023_v28  ;;  %v4766_v28 = vor.u32 %v5142_v1, %v4763_v14  ;;  %v4717_v0 = vld [vmem:[#allocation2 + $0x20] sm:$0xf] }
0x264e   :  { %v5472_v6 = vpop.eup %5471  ;;  %v2912_v8 = vadd.f32 1e-05, %v2908_v5  ;;  %v5137_v5 = vld [vmem:[#allocation2 + $0x24] sm:$0xf0]  ;;  %3347 = vmatpush.bf16.msrb.mxu0 %v4766_v28 }
0x264f   :  { %v2934_v16 = vmul.f32 %v5472_v6, %v2911_v60  ;;  %vm2940_vm12 = vweird.f32 %v5472_v6  ;;  %v4730_v60 = vor.u32 %v5138_v56, %v4727_v26 }
0x2650   :  { %5473 = vrsqrt.f32 %v2912_v8  ;;  %vm2941_vm2 = vmor %vm2939_vm13, %vm2940_vm12  ;;  %vm2949_vm15 = vweird.f32 %v2912_v8 }
0x2651   :  { %v2935_v17 = vmul.f32 %v5472_v6, %v2934_v16  ;;  %3243 = vmatpush.bf16.msra.mxu3 %v4730_v60  ;;  %v4719_v16 = vld [vmem:[#allocation2 + $0x28] sm:$0xf0] }
0x2653   :  { %v2936_v4 = vmul.f32 0.5, %v2935_v17  ;;  %v4753_v17 = vld [vmem:[#allocation2 + $0x40] sm:$0xf] }
0x2655   :  { %v2937_v30 = vsub.f32 1.5, %v2936_v4  ;;  %v5141_v4 = vld [vmem:[#allocation2 + $0x44] sm:$0xf0] }
0x2656   :  { %v5474_v19 = vpop.eup %5473 }
0x2657   :  { %v2938_v22 = vmul.f32 %v5472_v6, %v2937_v30  ;;  %v2944_v21 = vmul.f32 %v5474_v19, %v2912_v8  ;;  %vm2950_vm14 = vweird.f32 %v5474_v19  ;;  %v4718_v8 = vor.u32 %v5137_v5, %v4717_v0  ;;  %v4779_v0 = vld [vmem:[#allocation2 + $0x70] sm:$0xf]  ;;  %v5147_v5 = vld [vmem:[#allocation2 + $0x74] sm:$0xf0] }
0x2658   :  { %vm2951_vm4 = vmor %vm2949_vm15, %vm2950_vm14 }
0x2659   :  { %v2945_v23 = vmul.f32 %v5474_v19, %v2944_v21  ;;  %v2942_v54 = vsel %vm2941_vm2, %v5472_v6, %v2938_v22  ;;  %v5136_v6 = vld [vmem:[#allocation2 + $0x24] sm:$0xf]  ;;  %v4755_v21 = vld [vmem:[#allocation2 + $0x48] sm:$0xf0]  ;;  %3231 = vmatpush.bf16.msrb.mxu1 %v4718_v8  ;;  %v4781_v8 = vld [vmem:[#allocation2 + $0x78] sm:$0xf0] }
0x265a   :  { %v2955_v7 = vmul.f32 %v2942_v54, %v2887_v35  ;;  %v4722_v30 = vor.u32 %v5136_v6, %v4719_v16  ;;  %v5140_v22 = vld [vmem:[#allocation2 + $0x44] sm:$0xf]  ;;  %v5146_v6 = vld [vmem:[#allocation2 + $0x74] sm:$0xf]  ;;  %v4833_v16 = vld [vmem:[#allocation2 + $0xd0] sm:$0xf] }
0x265b   :  { %v2946_v57 = vmul.f32 0.5, %v2945_v23  ;;  %v4758_v23 = vor.u32 %v5140_v22, %v4755_v21  ;;  %v4835_v22 = vld [vmem:[#allocation2 + $0xd8] sm:$0xf0] }
0x265c   :  { %v2964_v3 = vmul.f32 %v6373_v49, %v2955_v7  ;;  %3244 = vmatpush.bf16.msra.mxu3 %v4722_v30  ;;  %v4743_v7 = vld [vmem:[#allocation2 + $0x10] sm:$0xf]  ;;  %v5159_v30 = vld [vmem:[#allocation2 + $0xd4] sm:$0xf0] }
0x265d   :  { %v2947_v61 = vsub.f32 1.5, %v2946_v57  ;;  %3348 = vmatpush.bf16.msrb.mxu0 %v4758_v23 }
0x265e   :  { %v2973_v13 = vadd.f32 %v6376_v38, %v2964_v3  ;;  %v4745_v3 = vld [vmem:[#allocation2 + $0x18] sm:$0xf0] }
0x265f   :  { %v2948_v62 = vmul.f32 %v5474_v19, %v2947_v61 }
0x2661   :  { %v2952_v27 = vsel %vm2951_vm4, %v5474_v19, %v2948_v62  ;;  %v4754_v19 = vor.u32 %v5141_v4, %v4753_v17  ;;  %v5135_v62 = vld [vmem:[#allocation2 + $0x14] sm:$0xf0] }
0x2662   :  { %v2956_v29 = vmul.f32 %v2952_v27, %v2888_v52  ;;  %v5134_v27 = vld [vmem:[#allocation2 + $0x14] sm:$0xf] }
0x2663   :  { %3335 = vmatpush.bf16.msra.mxu2 %v4754_v19  ;;  %v5158_v19 = vld [vmem:[#allocation2 + $0xd4] sm:$0xf] }
0x2664   :  { %v2965_v11 = vmul.f32 %v6373_v49, %v2956_v29  ;;  %v4744_v29 = vor.u32 %v5135_v62, %v4743_v7  ;;  %v5145_v7 = vld [vmem:[#allocation2 + $0x64] sm:$0xf0]  ;;  %v4834_v62 = vor.u32 %v5159_v30, %v4833_v16  ;;  %v4845_v30 = vld [vmem:[#allocation2 + $0xe8] sm:$0xf0] }
0x2665   :  { %v5161_v16 = vld [vmem:[#allocation2 + $0xe4] sm:$0xf0] }
0x2666   :  { %v2974_v20 = vadd.f32 %v6376_v38, %v2965_v11  ;;  %v4797_v11 = vld [vmem:[#allocation2 + $0x90] sm:$0xf]  ;;  %3279 = vmatpush.bf16.msra.mxu1 %v4744_v29  ;;  %v5144_v29 = vld [vmem:[#allocation2 + $0x64] sm:$0xf] }
0x2668   :  { %v2976_v24 = vpack.c.bf16 %v2974_v20, %v2973_v13 }
0x266a   :  { %4686 = vmatmul.msk.bf16.gmra.mxu2 %vm196_vm0, %v2976_v24 }
0x26c9   :  { %v3073_v32 = vpop.f32.mrf.mxu0 }
0x26ca   :  { %v3074_v33 = vadd.f32 %v3073_v32, %v6381_v43  ;;  %v5150_v32 = vld [vmem:[#allocation2 + $0x94] sm:$0xf] }
0x26cc   :  { %v3083_v36 = vsel %vm196_vm0, %v3074_v33, 0.0 }
0x26cd   :  { %3084 = vadd.xlane.f32.xlu1 %v3083_v36  ;;  %v4735_v36 = vld [vmem:[#allocation2] sm:$0xf] }
0x26d1   :  { %v3075_v25 = vpop.f32.mrf.mxu0 }
0x26d2   :  { %v3076_v37 = vadd.f32 %v3075_v25, %v6384_v44 }
0x26d4   :  { %v3086_v9 = vsel %vm196_vm0, %v3076_v37, 0.0 }
0x26d5   :  { %3087 = vadd.xlane.f32.xlu0 %v3086_v9  ;;  %v5133_v9 = vld [vmem:[#allocation2 + $0x4] sm:$0xf0] }
0x26ed   :  { %v3014_v49 = vpop.f32.mrf.mxu2 }
0x26ee   :  { %v3021_v40 = vmax.f32 %v3014_v49, 0.0  ;;  %v5132_v49 = vld [vmem:[#allocation2 + $0x4] sm:$0xf] }
0x26f5   :  { %v3016_v39 = vpop.f32.mrf.mxu2 }
0x26f6   :  { %v3022_v12 = vmax.f32 %v3016_v39, 0.0  ;;  %v4737_v39 = vld [vmem:[#allocation2 + $0x8] sm:$0xf0] }
0x26f8   :  { %v3024_v38 = vpack.c.bf16 %v3022_v12, %v3021_v40  ;;  %v4736_v12 = vor.u32 %v5133_v9, %v4735_v36 }
0x26fa   :  { %4712 = vmatmul.msk.bf16.gmra.mxu0 %vm529_vm11, %v3024_v38  ;;  %v4740_v38 = vor.u32 %v5132_v49, %v4737_v39  ;;  %3280 = vmatpush.bf16.msra.mxu1 %v4736_v12  ;;  %v4815_v39 = vld [vmem:[#allocation2 + $0xb0] sm:$0xf]  ;;  %v5155_v12 = vld [vmem:[#allocation2 + $0xb4] sm:$0xf0] }
0x2740   :  { %v3085_v50 = vpop.xlane.xlu1 %3084 }
0x2741   :  { %v3095_v10 = vmul.f32 %v3085_v50, %v5809_v2  ;;  %v4789_v50 = vld [vmem:[#allocation2 + $0x80] sm:$0xf] }
0x2743   :  { %v6411_v18 = vsub.f32 %v3074_v33, %v3095_v10  ;;  %v4799_v33 = vld [vmem:[#allocation2 + $0x98] sm:$0xf0]  ;;  %v5149_v10 = vld [vmem:[#allocation2 + $0x84] sm:$0xf0] }
0x2745   :  { %v3103_v43 = vmul.f32 %v6411_v18, %v6411_v18 }
0x2747   :  { %v3107_v44 = vsel %vm196_vm0, %v3103_v43, 0.0  ;;  %v5148_v43 = vld [vmem:[#allocation2 + $0x84] sm:$0xf] }
0x2748   :  { %3108 = vadd.xlane.f32.xlu2 %v3107_v44  ;;  %v3088_v34 = vpop.xlane.xlu0 %3087  ;;  %v4790_v44 = vor.u32 %v5149_v10, %v4789_v50  ;;  %v4817_v50 = vld [vmem:[#allocation2 + $0xb8] sm:$0xf0]  ;;  %v4816_v10 = vor.u32 %v5155_v12, %v4815_v39 }
0x2749   :  { %v3096_v41 = vmul.f32 %v3088_v34, %v5809_v2  ;;  %v4791_v34 = vld [vmem:[#allocation2 + $0x88] sm:$0xf0] }
0x274b   :  { %v6417_v46 = vsub.f32 %v3076_v37, %v3096_v41  ;;  %v4802_v37 = vor.u32 %v5150_v32, %v4799_v33  ;;  %v4827_v32 = vld [vmem:[#allocation2 + $0xc8] sm:$0xf0] }
0x274d   :  { %v3104_v47 = vmul.f32 %v6417_v46, %v6417_v46  ;;  %3461 = vmatpush.bf16.msra.mxu0 %v4802_v37 }
0x274f   :  { %v3110_v35 = vsel %vm196_vm0, %v3104_v47, 0.0 }
0x2750   :  { %3111 = vadd.xlane.f32.xlu0 %v3110_v35  ;;  %v4794_v35 = vor.u32 %v5148_v43, %v4791_v34  ;;  %v5153_v34 = vld [vmem:[#allocation2 + $0xa4] sm:$0xf0] }
0x2752   :  { %3462 = vmatpush.bf16.msra.mxu0 %v4794_v35 }
0x2777   :  { %v3078_v42 = vpop.f32.mrf.mxu0 }
0x2778   :  { %v6422_v51 = vadd.f32 %v3078_v42, %v2973_v13  ;;  %v5151_v13 = vld [vmem:[#allocation2 + $0x94] sm:$0xf0] }
0x2779   :  { %v4798_v24 = vor.u32 %v5151_v13, %v4797_v11  ;;  %v4825_v11 = vld [vmem:[#allocation2 + $0xc0] sm:$0xf] }
0x277a   :  { %v3089_v15 = vsel %vm196_vm0, %v6422_v51, 0.0 }
0x277b   :  { %3090 = vadd.xlane.f32.xlu1 %v3089_v15  ;;  %3448 = vmatpush.bf16.msrb.mxu2 %v4798_v24  ;;  %v5156_v24 = vld [vmem:[#allocation2 + $0xc4] sm:$0xf] }
0x277c   :  { %v4830_v9 = vor.u32 %v5156_v24, %v4827_v32  ;;  %v5170_v24 = vld [vmem:[#allocation2 + $0x134] sm:$0xf] }
0x277f   :  { %v3080_v48 = vpop.f32.mrf.mxu0  ;;  %3449 = vmatpush.bf16.msrb.mxu2 %v4790_v44  ;;  %v4807_v44 = vld [vmem:[#allocation2 + $0xa0] sm:$0xf] }
0x2780   :  { %v6426_v52 = vadd.f32 %v3080_v48, %v2974_v20  ;;  %v4748_v20 = vor.u32 %v5134_v27, %v4745_v3  ;;  %v4838_v27 = vor.u32 %v5158_v19, %v4835_v22  ;;  %v4773_v3 = vld [vmem:[#allocation2 + $0x68] sm:$0xf0] }
0x2781   :  { %v4776_v36 = vor.u32 %v5144_v29, %v4773_v3  ;;  %v4871_v29 = vld [vmem:[#allocation2 + $0x118] sm:$0xf0] }
0x2782   :  { %v3092_v31 = vsel %vm196_vm0, %v6426_v52, 0.0  ;;  %3292 = vmatpush.bf16.msrb.mxu3 %v4748_v20  ;;  %v5157_v20 = vld [vmem:[#allocation2 + $0xc4] sm:$0xf0] }
0x2783   :  { %3093 = vadd.xlane.f32.xlu2 %v3092_v31  ;;  %v4826_v37 = vor.u32 %v5157_v20, %v4825_v11  ;;  %v5171_v20 = vld [vmem:[#allocation2 + $0x134] sm:$0xf0] }
0x2786   :  { %3293 = vmatpush.bf16.msrb.mxu3 %v4740_v38  ;;  %v5154_v38 = vld [vmem:[#allocation2 + $0xb4] sm:$0xf] }
0x2787   :  { %v4820_v43 = vor.u32 %v5154_v38, %v4817_v50  ;;  %v4879_v38 = vld [vmem:[#allocation2 + $0x120] sm:$0xf]  ;;  %v5169_v50 = vld [vmem:[#allocation2 + $0x124] sm:$0xf0] }
0x27bb   :  { %v3109_v54 = vpop.xlane.xlu2 %3108 }
0x27bc   :  { %v3119_v57 = vmul.f32 %v3109_v54, %v5809_v2  ;;  %v4780_v54 = vor.u32 %v5147_v5, %v4779_v0 }
0x27be   :  { %v3123_v61 = vadd.f32 1e-05, %v3119_v57  ;;  %v4784_v57 = vor.u32 %v5146_v6, %v4781_v8  ;;  %v4843_v8 = vld [vmem:[#allocation2 + $0xe0] sm:$0xf] }
0x27c0   :  { %5475 = vrsqrt.f32 %v3123_v61  ;;  %vm3133_vm6 = vweird.f32 %v3123_v61 }
0x27c3   :  { %v3112_v25 = vpop.xlane.xlu0 %3111 }
0x27c4   :  { %v3120_v40 = vmul.f32 %v3112_v25, %v5809_v2 }
0x27c6   :  { %v5476_v41 = vpop.eup %5475  ;;  %v3124_v47 = vadd.f32 1e-05, %v3120_v40 }
0x27c7   :  { %v3128_v42 = vmul.f32 %v5476_v41, %v3123_v61  ;;  %vm3134_vm5 = vweird.f32 %v5476_v41  ;;  %v4771_v61 = vld [vmem:[#allocation2 + $0x60] sm:$0xf] }
0x27c8   :  { %5477 = vrsqrt.f32 %v3124_v47  ;;  %vm3135_vm1 = vmor %vm3133_vm6, %vm3134_vm5  ;;  %vm3143_vm7 = vweird.f32 %v3124_v47  ;;  %v4772_v33 = vor.u32 %v5145_v7, %v4771_v61  ;;  %v5167_v61 = vld [vmem:[#allocation2 + $0x114] sm:$0xf0]  ;;  %v5166_v7 = vld [vmem:[#allocation2 + $0x114] sm:$0xf] }
0x27c9   :  { %v3129_v15 = vmul.f32 %v5476_v41, %v3128_v42  ;;  %v4808_v42 = vor.u32 %v5153_v34, %v4807_v44  ;;  %v4874_v11 = vor.u32 %v5166_v7, %v4871_v29  ;;  %v4881_v44 = vld [vmem:[#allocation2 + $0x128] sm:$0xf0] }
0x27ca   :  { %v4899_v7 = vld [vmem:[#allocation2 + $0x148] sm:$0xf0] }
0x27cb   :  { %v3130_v48 = vmul.f32 0.5, %v3129_v15 }
0x27cd   :  { %v3131_v31 = vsub.f32 1.5, %v3130_v48 }
0x27ce   :  { %v5478_v53 = vpop.eup %5477 }
0x27cf   :  { %v3132_v55 = vmul.f32 %v5476_v41, %v3131_v31  ;;  %v3138_v56 = vmul.f32 %v5478_v53, %v3124_v47  ;;  %vm3144_vm3 = vweird.f32 %v5478_v53  ;;  %v4809_v47 = vld [vmem:[#allocation2 + $0xa8] sm:$0xf0] }
0x27d0   :  { %vm6443_vm8 = vmor %vm3143_vm7, %vm3144_vm3 }
0x27d1   :  { %v3136_v26 = vsel %vm3135_vm1, %v5476_v41, %v3132_v55  ;;  %v3139_v59 = vmul.f32 %v5478_v53, %v3138_v56  ;;  %v5152_v41 = vld [vmem:[#allocation2 + $0xa4] sm:$0xf] }
0x27d2   :  { %v3167_v60 = vmul.f32 %v3136_v26, %v6411_v18  ;;  %v4812_v15 = vor.u32 %v5152_v41, %v4809_v47 }
0x27d3   :  { %v3140_v63 = vmul.f32 0.5, %v3139_v59  ;;  %v4851_v59 = vld [vmem:[#allocation2 + $0xf0] sm:$0xf] }
0x27d4   :  { %v3176_v1 = vmul.f32 %v6433_v58, %v3167_v60  ;;  %v5163_v60 = vld [vmem:[#allocation2 + $0xf4] sm:$0xf0] }
0x27d5   :  { %v3141_v14 = vsub.f32 1.5, %v3140_v63  ;;  %v5162_v63 = vld [vmem:[#allocation2 + $0xf4] sm:$0xf] }
0x27d6   :  { %v3185_v28 = vadd.f32 %v6436_v45, %v3176_v1  ;;  %v4853_v1 = vld [vmem:[#allocation2 + $0xf8] sm:$0xf0] }
0x27d7   :  { %v3142_v4 = vmul.f32 %v5478_v53, %v3141_v14  ;;  %v4856_v6 = vor.u32 %v5162_v63, %v4853_v1 }
0x27d8   :  { %v6441_v17 = vpack.c.bf16 %v3185_v28, %v3185_v28  ;;  %v4852_v28 = vor.u32 %v5163_v60, %v4851_v59  ;;  %v5175_v59 = vld [vmem:[#allocation2 + $0x154] sm:$0xf0]  ;;  %v5174_v60 = vld [vmem:[#allocation2 + $0x154] sm:$0xf] }
0x27d9   :  { %v3146_v13 = vsel %vm6443_vm8, %v5478_v53, %v3142_v4  ;;  %v5160_v4 = vld [vmem:[#allocation2 + $0xe4] sm:$0xf] }
0x27da   :  { %v3200_v21 = vrot.slane %v6441_v17, 1  ;;  %v3304_v23 = vrot.slane %v6441_v17, 2  ;;  %v3168_v25 = vmul.f32 %v3146_v13, %v6417_v46  ;;  %v4848_v19 = vor.u32 %v5160_v4, %v4845_v30  ;;  %v4887_v13 = vld [vmem:[#allocation2 + $0x130] sm:$0xf]  ;;  %v5178_v4 = vld [vmem:[#allocation2 + $0x174] sm:$0xf] }
0x27dc   :  { %4731 = vmatmul.msk.bf16.vlgmr.msrb.gmra.mxu1 %vm196_vm0, %v3200_v21  ;;  %4732 = vmatmul.msk.bf16.vlgmr.msra.gmra.mxu3 %vm196_vm0, %v3200_v21  ;;  %v3177_v49 = vmul.f32 %v6433_v58, %v3168_v25 }
0x27dd   :  { %4767 = vmatmul.msk.bf16.vlgmr.msra.gmra.mxu2 %vm196_vm0, %v3304_v23  ;;  %4768 = vmatmul.msk.bf16.vlgmr.msrb.gmra.mxu0 %vm196_vm0, %v3304_v23 }
0x27de   :  { %3391 = vmatpush.bf16.msrb.mxu1 %v4780_v54  ;;  %3404 = vmatpush.bf16.msra.mxu3 %v4784_v57  ;;  %v3186_v40 = vadd.f32 %v6436_v45, %v3177_v49  ;;  %v4869_v57 = vld [vmem:[#allocation2 + $0x110] sm:$0xf]  ;;  %v5164_v49 = vld [vmem:[#allocation2 + $0x104] sm:$0xf] }
0x27df   :  { %3563 = vmatpush.bf16.msra.mxu2 %v4834_v62  ;;  %3576 = vmatpush.bf16.msrb.mxu0 %v4838_v27  ;;  %v4870_v27 = vor.u32 %v5167_v61, %v4869_v57  ;;  %v5172_v61 = vld [vmem:[#allocation2 + $0x144] sm:$0xf] }
0x27e0   :  { %v3413_v46 = vpack.c.bf16 %v3186_v40, %v3186_v40  ;;  %v4863_v40 = vld [vmem:[#allocation2 + $0x108] sm:$0xf0]  ;;  %v4902_v29 = vor.u32 %v5172_v61, %v4899_v7 }
0x27e1   :  { %v4866_v12 = vor.u32 %v5164_v49, %v4863_v40 }
0x27e2   :  { %3392 = vmatpush.bf16.msrb.mxu1 %v4772_v33  ;;  %3405 = vmatpush.bf16.msra.mxu3 %v4776_v36  ;;  %v3533_v0 = vrot.slane %v3413_v46, 2  ;;  %v3476_v22 = vrot.slane %v3413_v46, 1  ;;  %v3590_v18 = vrot.slane %v3413_v46, 3  ;;  %v4888_v33 = vor.u32 %v5171_v20, %v4887_v13  ;;  %v4889_v36 = vld [vmem:[#allocation2 + $0x138] sm:$0xf0] }
0x27e3   :  { %3564 = vmatpush.bf16.msra.mxu2 %v4826_v37  ;;  %3577 = vmatpush.bf16.msrb.mxu0 %v4830_v9  ;;  %v4892_v25 = vor.u32 %v5170_v24, %v4889_v36  ;;  %v4861_v37 = vld [vmem:[#allocation2 + $0x100] sm:$0xf]  ;;  %v5165_v9 = vld [vmem:[#allocation2 + $0x104] sm:$0xf0]  ;;  %v4917_v20 = vld [vmem:[#allocation2 + $0x168] sm:$0xf0] }
0x27e4   :  { %v4862_v39 = vor.u32 %v5165_v9, %v4861_v37 }
0x27ec   :  { %4749 = vmatmul.msk.bf16.vlgmr.msra.gmra.mxu1 %vm196_vm0, %v6441_v17  ;;  %4750 = vmatmul.msk.bf16.vlgmr.msrb.gmra.mxu3 %vm196_vm0, %v6441_v17 }
0x27ed   :  { %4803 = vmatmul.msk.bf16.vlgmr.msrb.gmra.mxu2 %vm196_vm0, %v3413_v46  ;;  %4804 = vmatmul.msk.bf16.vlgmr.msra.gmra.mxu0 %vm196_vm0, %v3413_v46 }
0x27ee   :  { %v3091_v35 = vpop.xlane.xlu1 %3090  ;;  %3506 = vmatpush.bf16.msra.mxu1 %v4816_v10  ;;  %3519 = vmatpush.bf16.msrb.mxu3 %v4820_v43  ;;  %v5168_v10 = vld [vmem:[#allocation2 + $0x124] sm:$0xf]  ;;  %v4880_v43 = vor.u32 %v5169_v50, %v4879_v38 }
0x27ef   :  { %v3097_v48 = vmul.f32 %v3091_v35, %v5809_v2  ;;  %3677 = vmatpush.bf16.msrb.mxu2 %v4870_v27  ;;  %3690 = vmatpush.bf16.msra.mxu0 %v4874_v11  ;;  %v4884_v34 = vor.u32 %v5168_v10, %v4881_v44  ;;  %v5177_v11 = vld [vmem:[#allocation2 + $0x164] sm:$0xf0] }
0x27f1   :  { %v6466_v31 = vsub.f32 %v6422_v51, %v3097_v48  ;;  %v3361_v51 = vrot.slane %v6441_v17, 3  ;;  %v4844_v17 = vor.u32 %v5161_v16, %v4843_v8  ;;  %v4923_v8 = vld [vmem:[#allocation2 + $0x170] sm:$0xf]  ;;  %v5179_v16 = vld [vmem:[#allocation2 + $0x174] sm:$0xf0] }
0x27f2   :  { %3507 = vmatpush.bf16.msra.mxu1 %v4808_v42  ;;  %3520 = vmatpush.bf16.msrb.mxu3 %v4812_v15 }
0x27f3   :  { %v3105_v53 = vmul.f32 %v6466_v31, %v6466_v31  ;;  %3678 = vmatpush.bf16.msrb.mxu2 %v4862_v39  ;;  %3691 = vmatpush.bf16.msra.mxu0 %v4866_v12 }
0x27f5   :  { %v3113_v55 = vsel %vm196_vm0, %v3105_v53, 0.0 }
0x27f6   :  { %3114 = vadd.xlane.f32.xlu1 %v3113_v55  ;;  %v3094_v56 = vpop.xlane.xlu2 %3093 }
0x27f7   :  { %v3098_v26 = vmul.f32 %v3094_v56, %v5809_v2 }
0x27f9   :  { %v6473_v14 = vsub.f32 %v6426_v52, %v3098_v26  ;;  %v4905_v26 = vld [vmem:[#allocation2 + $0x150] sm:$0xf] }
0x27fb   :  { %v3106_v5 = vmul.f32 %v6473_v14, %v6473_v14 }
0x27fc   :  { %4785 = vmatmul.msk.bf16.vlgmr.msrb.gmra.mxu1 %vm196_vm0, %v3361_v51  ;;  %4786 = vmatmul.msk.bf16.vlgmr.msra.gmra.mxu3 %vm196_vm0, %v3361_v51  ;;  %v4906_v51 = vor.u32 %v5175_v59, %v4905_v26  ;;  %v4959_v26 = vld [vmem:[#allocation2 + $0x1b0] sm:$0xf] }
0x27fd   :  { %4839 = vmatmul.msk.bf16.vlgmr.msra.gmra.mxu2 %vm196_vm0, %v3533_v0  ;;  %4840 = vmatmul.msk.bf16.vlgmr.msrb.gmra.mxu0 %vm196_vm0, %v3533_v0  ;;  %v3116_v52 = vsel %vm196_vm0, %v3106_v5, 0.0 }
0x27fe   :  { %3117 = vadd.xlane.f32.xlu0 %v3116_v52  ;;  %3620 = vmatpush.bf16.msrb.mxu1 %v4852_v28  ;;  %v4907_v28 = vld [vmem:[#allocation2 + $0x158] sm:$0xf0] }
0x27ff   :  { %3633 = vmatpush.bf16.msra.mxu3 %v4856_v6  ;;  %v4910_v6 = vor.u32 %v5174_v60, %v4907_v28  ;;  %3792 = vmatpush.bf16.msra.mxu2 %v4906_v51  ;;  %v5187_v60 = vld [vmem:[#allocation2 + $0x1b4] sm:$0xf0] }
0x2801   :  { %3805 = vmatpush.bf16.msrb.mxu0 %v4910_v6  ;;  %v5181_v6 = vld [vmem:[#allocation2 + $0x184] sm:$0xf0] }
0x2802   :  { %3621 = vmatpush.bf16.msrb.mxu1 %v4844_v17 }
0x2803   :  { %3634 = vmatpush.bf16.msra.mxu3 %v4848_v19  ;;  %v4924_v19 = vor.u32 %v5179_v16, %v4923_v8  ;;  %v5180_v8 = vld [vmem:[#allocation2 + $0x184] sm:$0xf]  ;;  %v4935_v16 = vld [vmem:[#allocation2 + $0x188] sm:$0xf0] }
0x2804   :  { %v4938_v7 = vor.u32 %v5180_v8, %v4935_v16 }
0x2805   :  { %3806 = vmatpush.bf16.msrb.mxu0 %v4902_v29 }
0x280c   :  { %4821 = vmatmul.msk.bf16.vlgmr.msra.gmra.mxu1 %vm196_vm0, %v3476_v22  ;;  %4822 = vmatmul.msk.bf16.vlgmr.msrb.gmra.mxu3 %vm196_vm0, %v3476_v22  ;;  %v4925_v22 = vld [vmem:[#allocation2 + $0x178] sm:$0xf0] }
0x280d   :  { %3735 = vmatpush.bf16.msra.mxu1 %v4888_v33  ;;  %3748 = vmatpush.bf16.msrb.mxu3 %v4892_v25 }
0x2811   :  { %3736 = vmatpush.bf16.msra.mxu1 %v4880_v43  ;;  %3749 = vmatpush.bf16.msrb.mxu3 %v4884_v34 }
0x281c   :  { %4857 = vmatmul.msk.bf16.vlgmr.msrb.gmra.mxu1 %vm196_vm0, %v3590_v18  ;;  %4858 = vmatmul.msk.bf16.vlgmr.msra.gmra.mxu3 %vm196_vm0, %v3590_v18  ;;  %v4897_v18 = vld [vmem:[#allocation2 + $0x140] sm:$0xf] }
0x281d   :  { %3849 = vmatpush.bf16.msrb.mxu1 %v4924_v19 }
0x2859   :  { %v3233_v21 = vpop.f32.mrf.mxu1 }
0x285a   :  { %v6487_v23 = vpop.f32.mrf.mxu0 }
0x285f   :  { %v3246_v54 = vpop.f32.mrf.mxu3 }
0x2860   :  { %v3337_v62 = vpop.f32.mrf.mxu2 }
0x2861   :  { %v3235_v3 = vpop.f32.mrf.mxu1 }
0x2862   :  { %v3352_v32 = vpop.f32.mrf.mxu0 }
0x2867   :  { %v3248_v46 = vpop.f32.mrf.mxu3 }
0x2868   :  { %v3339_v41 = vpop.f32.mrf.mxu2 }
0x2869   :  { %v3115_v47 = vpop.xlane.xlu1 %3114  ;;  %v3282_v35 = vpop.f32.mrf.mxu1 }
0x286a   :  { %v3121_v42 = vmul.f32 %v3115_v47, %v5809_v2  ;;  %v3283_v15 = vadd.f32 %v3282_v35, %v3233_v21  ;;  %v6490_v48 = vpop.f32.mrf.mxu0  ;;  %v5173_v21 = vld [vmem:[#allocation2 + $0x144] sm:$0xf0]  ;;  %v4941_v47 = vld [vmem:[#allocation2 + $0x190] sm:$0xf] }
0x286b   :  { %v4898_v57 = vor.u32 %v5173_v21, %v4897_v18  ;;  %v5184_v18 = vld [vmem:[#allocation2 + $0x1a4] sm:$0xf]  ;;  %v4953_v21 = vld [vmem:[#allocation2 + $0x1a8] sm:$0xf0] }
0x286c   :  { %v3125_v53 = vadd.f32 1e-05, %v3121_v42  ;;  %v3354_v55 = vadd.f32 %v3337_v62, %v3283_v15 }
0x286d   :  { %3793 = vmatpush.bf16.msra.mxu2 %v4898_v57 }
0x286e   :  { %5479 = vrsqrt.f32 %v3125_v53  ;;  %vm3153_vm10 = vweird.f32 %v3125_v53 }
0x286f   :  { %v3295_v56 = vpop.f32.mrf.mxu3 }
0x2870   :  { %v3296_v63 = vadd.f32 %v3295_v56, %v3246_v54  ;;  %v3451_v1 = vpop.f32.mrf.mxu2  ;;  %v4928_v54 = vor.u32 %v5178_v4, %v4925_v22  ;;  %v4943_v56 = vld [vmem:[#allocation2 + $0x198] sm:$0xf0]  ;;  %v4960_v4 = vor.u32 %v5187_v60, %v4959_v26  ;;  %v4989_v26 = vld [vmem:[#allocation2 + $0x1e8] sm:$0xf0] }
0x2871   :  { %v3284_v0 = vpop.f32.mrf.mxu1  ;;  %v3118_v5 = vpop.xlane.xlu0 %3117 }
0x2872   :  { %v3466_v30 = vpop.f32.mrf.mxu0  ;;  %v3122_v52 = vmul.f32 %v3118_v5, %v5809_v2  ;;  %v3355_v17 = vadd.f32 %v6487_v23, %v3296_v63  ;;  %3862 = vmatpush.bf16.msra.mxu3 %v4928_v54  ;;  %v4915_v2 = vld [vmem:[#allocation2 + $0x160] sm:$0xf]  ;;  %v5176_v23 = vld [vmem:[#allocation2 + $0x164] sm:$0xf]  ;;  %v4961_v63 = vld [vmem:[#allocation2 + $0x1b8] sm:$0xf0] }
0x2873   :  { %v4916_v13 = vor.u32 %v5177_v11, %v4915_v2  ;;  %v4920_v33 = vor.u32 %v5176_v23, %v4917_v20  ;;  %v4933_v0 = vld [vmem:[#allocation2 + $0x180] sm:$0xf] }
0x2874   :  { %v5480_v62 = vpop.eup %5479  ;;  %v6494_v27 = vadd.f32 1e-05, %v3122_v52  ;;  %v4951_v52 = vld [vmem:[#allocation2 + $0x1a0] sm:$0xf]  ;;  %v4934_v61 = vor.u32 %v5181_v6, %v4933_v0 }
0x2875   :  { %v3148_v3 = vmul.f32 %v5480_v62, %v3125_v53  ;;  %3850 = vmatpush.bf16.msrb.mxu1 %v4916_v13  ;;  %vm3154_vm9 = vweird.f32 %v5480_v62  ;;  %v5183_v53 = vld [vmem:[#allocation2 + $0x194] sm:$0xf0] }
0x2876   :  { %5481 = vrsqrt.f32 %v6494_v27  ;;  %3863 = vmatpush.bf16.msra.mxu3 %v4920_v33  ;;  %vm3155_vm12 = vmor %vm3153_vm10, %vm3154_vm9  ;;  %v4942_v51 = vor.u32 %v5183_v53, %v4941_v47  ;;  %vm3163_vm2 = vweird.f32 %v6494_v27  ;;  %v4987_v53 = vld [vmem:[#allocation2 + $0x1e0] sm:$0xf] }
0x2877   :  { %v3149_v24 = vmul.f32 %v5480_v62, %v3148_v3  ;;  %v3297_v32 = vpop.f32.mrf.mxu3  ;;  %v4956_v3 = vor.u32 %v5184_v18, %v4953_v21  ;;  %v5202_v21 = vld [vmem:[%s6639_s22 + $0x30] sm:$0xff] }
0x2878   :  { %v3453_v36 = vpop.f32.mrf.mxu2  ;;  %v4977_v32 = vld [vmem:[#allocation2 + $0x1d0] sm:$0xf] }
0x2879   :  { %v3150_v25 = vmul.f32 0.5, %v3149_v24  ;;  %v3394_v37 = vpop.f32.mrf.mxu1  ;;  %v5191_v36 = vld [vmem:[#allocation2 + $0x1d4] sm:$0xf0] }
0x287a   :  { %v3411_v9 = vadd.f32 %v3394_v37, %v3354_v55  ;;  %v6497_v49 = vpop.f32.mrf.mxu0  ;;  %v5182_v55 = vld [vmem:[#allocation2 + $0x194] sm:$0xf]  ;;  %v4979_v37 = vld [vmem:[#allocation2 + $0x1d8] sm:$0xf0] }
0x287b   :  { %v3151_v39 = vsub.f32 1.5, %v3150_v25  ;;  %v4946_v28 = vor.u32 %v5182_v55, %v4943_v56  ;;  %v5190_v25 = vld [vmem:[#allocation2 + $0x1d4] sm:$0xf]  ;;  %v5192_v56 = vld [vmem:[#allocation2 + $0x1e4] sm:$0xf] }
0x287c   :  { %v3468_v40 = vadd.f32 %v3451_v1, %v3411_v9  ;;  %v6499_v38 = vpop.eup %5481  ;;  %v5197_v9 = vld [vmem:[%s6639_s22 + $0x8] sm:$0xff] }
0x287d   :  { %v3152_v12 = vmul.f32 %v5480_v62, %v3151_v39  ;;  %v3158_v34 = vmul.f32 %v6499_v38, %v6494_v27  ;;  %vm3164_vm13 = vweird.f32 %v6499_v38  ;;  %v4995_v39 = vld [vmem:[#allocation2 + $0x1f0] sm:$0xf]  ;;  %v4978_v27 = vor.u32 %v5191_v36, %v4977_v32 }
0x287e   :  { %vm6521_vm14 = vmor %vm3163_vm2, %vm3164_vm13  ;;  %v5198_v36 = vld [vmem:[%s6639_s22 + $0x10] sm:$0xff] }
0x287f   :  { %v3156_v50 = vsel %vm3155_vm12, %v5480_v62, %v3152_v12  ;;  %v3407_v10 = vpop.f32.mrf.mxu3  ;;  %v3159_v1 = vmul.f32 %v6499_v38, %v3158_v34  ;;  %v5194_v12 = vld [vmem:[#allocation2 + $0x1f4] sm:$0xf]  ;;  %v5188_v34 = vld [vmem:[#allocation2 + $0x1c4] sm:$0xf] }
0x2880   :  { %v3169_v43 = vmul.f32 %v3156_v50, %v6466_v31  ;;  %v3412_v44 = vadd.f32 %v3407_v10, %v3355_v17  ;;  %v3566_v46 = vpop.f32.mrf.mxu2  ;;  %v5186_v31 = vld [vmem:[#allocation2 + $0x1b4] sm:$0xf]  ;;  %v5185_v17 = vld [vmem:[#allocation2 + $0x1a4] sm:$0xf0]  ;;  %v4997_v50 = vld [vmem:[#allocation2 + $0x1f8] sm:$0xf0] }
0x2881   :  { %v3396_v41 = vpop.f32.mrf.mxu1  ;;  %v4964_v30 = vor.u32 %v5186_v31, %v4961_v63  ;;  %v3160_v54 = vmul.f32 0.5, %v3159_v1  ;;  %v4952_v29 = vor.u32 %v5185_v17, %v4951_v52  ;;  %v4992_v1 = vor.u32 %v5192_v56, %v4989_v26  ;;  %v5203_v52 = vld [vmem:[%s6639_s22 + $0x38] sm:$0xff] }
0x2882   :  { %v3178_v35 = vmul.f32 %v6433_v58, %v3169_v43  ;;  %v3581_v42 = vpop.f32.mrf.mxu0  ;;  %v3469_v15 = vadd.f32 %v6490_v48, %v3412_v44  ;;  %v4982_v44 = vor.u32 %v5190_v25, %v4979_v37  ;;  %v4971_v41 = vld [vmem:[#allocation2 + $0x1c8] sm:$0xf0]  ;;  %v5211_v17 = vld [vmem:[%s6639_s22 + $0x78] sm:$0xff]  ;;  %v5206_v25 = vld [vmem:[%s6639_s22 + $0x50] sm:$0xff] }
0x2883   :  { %v3161_v11 = vsub.f32 1.5, %v3160_v54  ;;  %v4974_v31 = vor.u32 %v5188_v34, %v4971_v41  ;;  %v5210_v54 = vld [vmem:[%s6639_s22 + $0x70] sm:$0xff] }
0x2884   :  { %v3187_v59 = vadd.f32 %v6436_v45, %v3178_v35 }
0x2885   :  { %v3162_v20 = vmul.f32 %v6499_v38, %v3161_v11  ;;  %v5208_v11 = vld [vmem:[%s6639_s22 + $0x60] sm:$0xff] }
0x2886   :  { %v6508_v5 = vpack.c.bf16 %v3187_v59, %v3187_v59 }
0x2887   :  { %v3409_v48 = vpop.f32.mrf.mxu3  ;;  %v3166_v10 = vsel %vm6521_vm14, %v6499_v38, %v3162_v20  ;;  %v5193_v38 = vld [vmem:[#allocation2 + $0x1e4] sm:$0xf0]  ;;  %v5207_v20 = vld [vmem:[%s6639_s22 + $0x58] sm:$0xff] }
0x2888   :  { %v3568_v19 = vpop.f32.mrf.mxu2  ;;  %4875 = vmatmul.msk.bf16.vlgmr.msrb.gmra.mxu2 %vm196_vm0, %v6508_v5  ;;  %4876 = vmatmul.msk.bf16.vlgmr.msra.gmra.mxu0 %vm196_vm0, %v6508_v5  ;;  %v3705_v22 = vrot.slane %v6508_v5, 1  ;;  %v3762_v43 = vrot.slane %v6508_v5, 2  ;;  %v3819_v35 = vrot.slane %v6508_v5, 3  ;;  %v3170_v55 = vmul.f32 %v3166_v10, %v6473_v14  ;;  %v5196_v10 = vld [vmem:[%s6639_s22] sm:$0xff] }
0x2889   :  { %v3509_v57 = vpop.f32.mrf.mxu1  ;;  %3906 = vmatpush.bf16.msrb.mxu2 %v4942_v51  ;;  %3919 = vmatpush.bf16.msra.mxu0 %v4946_v28  ;;  %v4988_v14 = vor.u32 %v5193_v38, %v4987_v53 }
0x288a   :  { %v3526_v62 = vadd.f32 %v3509_v57, %v3468_v40  ;;  %4893 = vmatmul.msk.bf16.vlgmr.msra.gmra.mxu1 %vm196_vm0, %v3705_v22  ;;  %4894 = vmatmul.msk.bf16.vlgmr.msrb.gmra.mxu3 %vm196_vm0, %v3705_v22  ;;  %v5195_v40 = vld [vmem:[#allocation2 + $0x1f4] sm:$0xf0]  ;;  %v3179_v51 = vmul.f32 %v6433_v58, %v3170_v55 }
0x288b   :  { %3964 = vmatpush.bf16.msra.mxu1 %v4960_v4  ;;  %3977 = vmatpush.bf16.msrb.mxu3 %v4964_v30  ;;  %v4996_v42 = vor.u32 %v5195_v40, %v4995_v39  ;;  %v5205_v39 = vld [vmem:[%s6639_s22 + $0x48] sm:$0xff] }
0x288c   :  { %v3583_v2 = vadd.f32 %v3566_v46, %v3526_v62  ;;  %v5189_v46 = vld [vmem:[#allocation2 + $0x1c4] sm:$0xf0]  ;;  %v3188_v0 = vadd.f32 %v6436_v45, %v3179_v51 }
0x288d   :  { %3907 = vmatpush.bf16.msrb.mxu2 %v4934_v61  ;;  %3920 = vmatpush.bf16.msra.mxu0 %v4938_v7  ;;  %v5201_v61 = vld [vmem:[%s6639_s22 + $0x28] sm:$0xff] }
0x288e   :  { %v3871_v8 = vpack.c.bf16 %v3188_v0, %v3188_v0  ;;  %v5209_v7 = vld [vmem:[%s6639_s22 + $0x68] sm:$0xff] }
0x288f   :  { %v3522_v23 = vpop.f32.mrf.mxu3  ;;  %3965 = vmatpush.bf16.msra.mxu1 %v4952_v29  ;;  %3978 = vmatpush.bf16.msrb.mxu3 %v4956_v3 }
0x2890   :  { %v3527_v13 = vadd.f32 %v3522_v23, %v3469_v15  ;;  %v5000_v15 = vor.u32 %v5194_v12, %v4997_v50  ;;  %v3934_v48 = vrot.slane %v3871_v8, 1  ;;  %v3991_v58 = vrot.slane %v3871_v8, 2 }
0x2891   :  { %v3511_v24 = vpop.f32.mrf.mxu1  ;;  %v4048_v45 = vrot.slane %v3871_v8, 3 }
0x2892   :  { %v3584_v33 = vadd.f32 %v6497_v49, %v3527_v13  ;;  %v4969_v49 = vld [vmem:[#allocation2 + $0x1c0] sm:$0xf]  ;;  %v5199_v13 = vld [vmem:[%s6639_s22 + $0x18] sm:$0xff] }
0x2893   :  { %v4970_v60 = vor.u32 %v5189_v46, %v4969_v49 }
0x2897   :  { %v3524_v47 = vpop.f32.mrf.mxu3 }
0x2898   :  { %4911 = vmatmul.msk.bf16.vlgmr.msra.gmra.mxu2 %vm196_vm0, %v3762_v43  ;;  %4912 = vmatmul.msk.bf16.vlgmr.msrb.gmra.mxu0 %vm196_vm0, %v3762_v43  ;;  %v5204_v43 = vld [vmem:[%s6639_s22 + $0x40] sm:$0xff] }
0x2899   :  { %v3623_v59 = vpop.f32.mrf.mxu1  ;;  %4021 = vmatpush.bf16.msra.mxu2 %v4978_v27  ;;  %4034 = vmatpush.bf16.msrb.mxu0 %v4982_v44 }
0x289a   :  { %v6533_v63 = vadd.f32 %v3623_v59, %v3583_v2  ;;  %4929 = vmatmul.msk.bf16.vlgmr.msrb.gmra.mxu1 %vm196_vm0, %v3819_v35  ;;  %4930 = vmatmul.msk.bf16.vlgmr.msra.gmra.mxu3 %vm196_vm0, %v3819_v35  ;;  %v5200_v2 = vld [vmem:[%s6639_s22 + $0x20] sm:$0xff] }
0x289b   :  { %4078 = vmatpush.bf16.msrb.mxu1 %v4996_v42  ;;  %4091 = vmatpush.bf16.msra.mxu3 %v5000_v15 }
0x289d   :  { %4022 = vmatpush.bf16.msra.mxu2 %v4970_v60  ;;  %4035 = vmatpush.bf16.msrb.mxu0 %v4974_v31 }
0x289f   :  { %v3636_v28 = vpop.f32.mrf.mxu3  ;;  %4079 = vmatpush.bf16.msrb.mxu1 %v4988_v14  ;;  %4092 = vmatpush.bf16.msra.mxu3 %v4992_v1  ;;  %v4100_v14 = vld [vmem:[%s6640_s23] sm:$0x3] }
0x28a0   :  { %v6539_v5 = vadd.f32 %v3636_v28, %v3584_v33 }
0x28a1   :  { %v3625_v6 = vpop.f32.mrf.mxu1 }
0x28a7   :  { %v3638_v16 = vpop.f32.mrf.mxu3 }
0x28a8   :  { %4947 = vmatmul.msk.bf16.vlgmr.msrb.gmra.mxu2 %vm196_vm0, %v3871_v8  ;;  %4948 = vmatmul.msk.bf16.vlgmr.msra.gmra.mxu0 %vm196_vm0, %v3871_v8  ;;  %v4103_v8 = vperm.slane %v4100_v14, 1  ;;  %v4110_v16 = vld [vmem:[%s6641_s26] sm:$0x3] }
0x28a9   :  { %4260 = vmatpush.bf16.msrb.mxu2 %v5203_v52  ;;  %4273 = vmatpush.bf16.msra.mxu0 %v5211_v17 }
0x28aa   :  { %4965 = vmatmul.msk.bf16.vlgmr.msra.gmra.mxu1 %vm196_vm0, %v3934_v48  ;;  %4966 = vmatmul.msk.bf16.vlgmr.msrb.gmra.mxu3 %vm196_vm0, %v3934_v48 }
0x28ad   :  { %4261 = vmatpush.bf16.msrb.mxu2 %v5202_v21  ;;  %4274 = vmatpush.bf16.msra.mxu0 %v5210_v54 }
0x28b1   :  { %4262 = vmatpush.bf16.msrb.mxu2 %v5201_v61  ;;  %4275 = vmatpush.bf16.msra.mxu0 %v5209_v7 }
0x28b5   :  { %4263 = vmatpush.bf16.msrb.mxu2 %v5200_v2  ;;  %4276 = vmatpush.bf16.msra.mxu0 %v5208_v11 }
0x28b8   :  { %4983 = vmatmul.msk.bf16.vlgmr.msra.gmra.mxu2 %vm196_vm0, %v3991_v58  ;;  %4984 = vmatmul.msk.bf16.vlgmr.msrb.gmra.mxu0 %vm196_vm0, %v3991_v58 }
0x28b9   :  { %4264 = vmatpush.bf16.msrb.mxu2 %v5199_v13  ;;  %4277 = vmatpush.bf16.msra.mxu0 %v5207_v20  ;;  %v5215_v20 = vld [vmem:[%s5744_s27 + $0x18] sm:$0xff] }
0x28ba   :  { %5001 = vmatmul.msk.bf16.vlgmr.msrb.gmra.mxu1 %vm196_vm0, %v4048_v45  ;;  %5002 = vmatmul.msk.bf16.vlgmr.msra.gmra.mxu3 %vm196_vm0, %v4048_v45  ;;  %vm4340_vm0 = vcmask 17408  }
0x28bb   :  { %4331 = vmatpush.bf16.msra.mxu1 %v5215_v20 }
0x28bd   :  { %4265 = vmatpush.bf16.msrb.mxu2 %v5198_v36  ;;  %4278 = vmatpush.bf16.msra.mxu0 %v5206_v25  ;;  %v5287_v25 = vld [vmem:[%s5739_s25] ss:$0 sm:$0xff] }
0x28c1   :  { %4266 = vmatpush.bf16.msrb.mxu2 %v5197_v9  ;;  %4279 = vmatpush.bf16.msra.mxu0 %v5205_v39 }
0x28c5   :  { %4267 = vmatpush.bf16.msrb.mxu2 %v5196_v10  ;;  %4280 = vmatpush.bf16.msra.mxu0 %v5204_v43  ;;  %v5288_v43 = vld [vmem:[%s5749_s4] ss:$0 sm:$0xff] }
0x2905   :  { %v3693_v4 = vpop.f32.mrf.mxu0 }
0x2906   :  { %v3698_v35 = vadd.f32 %v3693_v4, %v6539_v5  ;;  %v4102_v5 = vperm.slane %v4100_v14, 0 }
0x2907   :  { %v3738_v30 = vpop.f32.mrf.mxu1 }
0x290b   :  { %v3680_v19 = vpop.f32.mrf.mxu2 }
0x290c   :  { %v3697_v44 = vadd.f32 %v3680_v19, %v6533_v63  ;;  %v4112_v19 = vperm.slane %v4110_v16, 0 }
0x290d   :  { %v3695_v22 = vpop.f32.mrf.mxu0  ;;  %v3751_v18 = vpop.f32.mrf.mxu3 }
0x290e   :  { %v3755_v41 = vadd.f32 %v3738_v30, %v3697_v44  ;;  %v3756_v15 = vadd.f32 %v3751_v18, %v3698_v35  ;;  %v4118_v30 = vld [vmem:[%s6642_s0] sm:$0x3]  ;;  %v4113_v18 = vperm.slane %v4110_v16, 1 }
0x290f   :  { %v3740_v57 = vpop.f32.mrf.mxu1  ;;  %v4120_v54 = vperm.slane %v4118_v30, 0  ;;  %v4121_v61 = vperm.slane %v4118_v30, 1 }
0x2913   :  { %v3682_v62 = vpop.f32.mrf.mxu2 }
0x2915   :  { %v3753_v29 = vpop.f32.mrf.mxu3  ;;  %v3808_v3 = vpop.f32.mrf.mxu0 }
0x2916   :  { %v3813_v55 = vadd.f32 %v3808_v3, %v3756_v15 }
0x2917   :  { %v3852_v23 = vpop.f32.mrf.mxu1 }
0x291b   :  { %v3795_v24 = vpop.f32.mrf.mxu2 }
0x291c   :  { %v3812_v42 = vadd.f32 %v3795_v24, %v3755_v41  ;;  %v5214_v24 = vld [vmem:[%s5744_s27 + $0x10] sm:$0xff] }
0x291d   :  { %v3810_v32 = vpop.f32.mrf.mxu0  ;;  %v3865_v33 = vpop.f32.mrf.mxu3  ;;  %4332 = vmatpush.bf16.msra.mxu1 %v5214_v24 }
0x291e   :  { %v3869_v38 = vadd.f32 %v3852_v23, %v3812_v42  ;;  %v3870_v59 = vadd.f32 %v3865_v33, %v3813_v55  ;;  %v5213_v32 = vld [vmem:[%s5744_s27 + $0x8] sm:$0xff]  ;;  %v5212_v33 = vld [vmem:[%s5744_s27] sm:$0xff] }
0x291f   :  { %v3854_v37 = vpop.f32.mrf.mxu1 }
0x2921   :  { %4333 = vmatpush.bf16.msra.mxu1 %v5213_v32 }
0x2923   :  { %v3797_v40 = vpop.f32.mrf.mxu2 }
0x2925   :  { %v3867_v12 = vpop.f32.mrf.mxu3  ;;  %v3922_v50 = vpop.f32.mrf.mxu0  ;;  %4334 = vmatpush.bf16.msra.mxu1 %v5212_v33 }
0x2926   :  { %v3927_v63 = vadd.f32 %v3922_v50, %v3870_v59 }
0x2927   :  { %v3967_v27 = vpop.f32.mrf.mxu1 }
0x292b   :  { %v3909_v49 = vpop.f32.mrf.mxu2 }
0x292c   :  { %v3926_v60 = vadd.f32 %v3909_v49, %v3869_v38 }
0x292d   :  { %v3924_v46 = vpop.f32.mrf.mxu0  ;;  %v3980_v34 = vpop.f32.mrf.mxu3 }
0x292e   :  { %v3985_v1 = vadd.f32 %v3980_v34, %v3927_v63  ;;  %v3984_v51 = vadd.f32 %v3967_v27, %v3926_v60 }
0x292f   :  { %v3969_v47 = vpop.f32.mrf.mxu1 }
0x2933   :  { %v3911_v53 = vpop.f32.mrf.mxu2 }
0x2935   :  { %v3982_v56 = vpop.f32.mrf.mxu3  ;;  %v4037_v26 = vpop.f32.mrf.mxu0 }
0x2936   :  { %v4042_v0 = vadd.f32 %v4037_v26, %v3985_v1 }
0x2937   :  { %v4081_v31 = vpop.f32.mrf.mxu1 }
0x293b   :  { %v4024_v28 = vpop.f32.mrf.mxu2 }
0x293c   :  { %v4041_v6 = vadd.f32 %v4024_v28, %v3984_v51 }
0x293d   :  { %v4039_v48 = vpop.f32.mrf.mxu0  ;;  %v4094_v58 = vpop.f32.mrf.mxu3 }
0x293e   :  { %v4098_v45 = vadd.f32 %v4081_v31, %v4041_v6  ;;  %v4099_v4 = vadd.f32 %v4094_v58, %v4042_v0 }
0x293f   :  { %v4083_v52 = vpop.f32.mrf.mxu1 }
0x2940   :  { %v4106_v17 = vadd.f32 %v4102_v5, %v4098_v45  ;;  %v4107_v22 = vadd.f32 %v4103_v8, %v4099_v4 }
0x2942   :  { %v4108_v21 = vmax.f32 %v4106_v17, 0.0  ;;  %v4109_v57 = vmax.f32 %v4107_v22, 0.0 }
0x2943   :  { %v4026_v7 = vpop.f32.mrf.mxu2 }
0x2944   :  { %v4116_v62 = vmul.f32 %v4112_v19, %v4108_v21  ;;  %v4117_v29 = vmul.f32 %v4113_v18, %v4109_v57 }
0x2945   :  { %v4096_v3 = vpop.f32.mrf.mxu3 }
0x2946   :  { %v4124_v2 = vadd.f32 %v4120_v54, %v4116_v62  ;;  %v4125_v11 = vadd.f32 %v4121_v61, %v4117_v29 }
0x2948   :  { %v4126_v23 = vpack.c.bf16 %v4124_v2, %v4124_v2  ;;  %v4127_v13 = vpack.c.bf16 %v4125_v11, %v4125_v11 }
0x294a   :  { %4268 = vmatmul.bf16.vlgmr.msrb.gmra.mxu2 %v4126_v23  ;;  %4281 = vmatmul.bf16.vlgmr.msra.gmra.mxu0 %v4127_v13 }
0x29c7   :  { %v4282_v36 = vpop.f32.mrf.mxu0 }
0x29cd   :  { %v4269_v37 = vpop.f32.mrf.mxu2 }
0x29ce   :  { %v4270_v9 = vadd.f32 %v5287_v25, %v4269_v37 }
0x29cf   :  { %v4284_v39 = vpop.f32.mrf.mxu0 }
0x29d0   :  { %v4283_v40 = vadd.f32 %v4282_v36, %v4270_v9 }
0x29d2   :  { %v4286_v12 = vmax.f32 %v4283_v40, 0.0 }
0x29d4   :  { %v4287_v50 = vpack.c.bf16 %v4286_v12, %v4286_v12 }
0x29d5   :  { %v4271_v10 = vpop.f32.mrf.mxu2 }
0x29d6   :  { %5083 = vmatmul.msk.bf16.vlgmr.msra.gmra.mxu1 %vm529_vm11, %v4287_v50 }
0x2a53   :  { %v4336_v27 = vpop.f32.mrf.mxu1 }
0x2a54   :  { %v4337_v44 = vadd.f32 %v5288_v43, %v4336_v27 }
0x2a56   :  { %4341 = vst.msk [vmem:[%s5754_s20] sm:$0x3] %vm4340_vm0, %v4337_v44 }
0x2a5b   :  { %v4338_v49 = vpop.f32.mrf.mxu1 }
0x2a5c   :  { %4346 = vsyncpa [#allocation3], 1 }

</bundles_post_ra>
